<compile_context>
chip_gen: v6e
topology: v6e:2x2x1
jax: 0.10.0
libtpu: 0.0.40
codegen_flags: <defaults>
</compile_context>

<pallas_src>
import math
import numpy as np

import jax
import jax.numpy as jnp
from jax.experimental import pallas as pl
from jax.experimental.pallas import tpu as pltpu  # noqa: F401  (kept for optional tuning)


# ----------------------------------------------------------------------------- config
BATCH        = 2
DIM_FEATURE  = 8     # number of multivariate channels
DIM_TIMESTEP = 16    # sequence length
DIM_MODEL    = 32
DIM_HIDDEN   = 64
DIM_Q        = 8
DIM_V        = 8
NUM_HEADS    = 4
NUM_ENCODERS = 2
NUM_CLASS    = 4
N_GATE       = 2
LN_EPS       = 1e-5


# ----------------------------------------------------------------------------- kernel
def make_fused_gtn_kernel(B, T, F, D, HID, H, DQ, DV, NENC, NCLS, eps=LN_EPS):
    """Single fused kernel: embeddings -> both encoder towers -> gate + output head."""
    NOUT = N_GATE + NCLS
    HDQ = H * DQ
    HDV = H * DV
    TD = T * D
    FD = F * D

    def kernel(xt_ref, xf_ref,                       # batch-folded bf16 inputs
               embwt_ref, embwf_ref, embv_ref,       # embedding weights / (PE+bias) vecs
               wqkv_ref, wo_ref, wf1_ref, wf2_ref,   # per-layer packed matmul weights
               vecs_ref,                             # per-layer biases + LN params
               hw_ref, hb_ref,                       # gate+out head weights / biases
               o_ref):

        def bf16(a):
            return a.astype(jnp.bfloat16)

        def layer_norm(y, g, b):
            mu = jnp.mean(y, axis=-1, keepdims=True)
            var = jnp.mean((y - mu) ** 2, axis=-1, keepdims=True)
            return (y - mu) * jax.lax.rsqrt(var + eps) * g + b

        def encoder_apply(x2, S, l):
            """One encoder layer on batch-folded rows x2: (B*S, D) f32."""
            vl = vecs_ref[l]                                   # (8, 96) f32
            bqkv = vl[0:1, :]                                  # (1, 96)
            bo   = vl[1:2, :D]
            bf1  = vl[2:3, :HID]
            bf2  = vl[3:4, :D]
            ln1g = vl[4:5, :D]; ln1b = vl[5:6, :D]
            ln2g = vl[6:7, :D]; ln2b = vl[7:8, :D]

            # fused Q/K/V projection: ONE (B*S, D) @ (D, 3*H*DQ) matmul (bf16 MXU inputs,
            # 1/sqrt(dq) pre-folded into the Q columns on the host)
            qkv = jnp.dot(bf16(x2), wqkv_ref[l],
                          preferred_element_type=jnp.float32) + bqkv    # (B*S, 96) f32

            heads = []
            for h in range(H):
                qh = qkv[:, h * DQ:(h + 1) * DQ].reshape(B, S, DQ)
                kh = qkv[:, HDQ + h * DQ:HDQ + (h + 1) * DQ].reshape(B, S, DQ)
                vh = qkv[:, 2 * HDQ + h * DV:2 * HDQ + (h + 1) * DV].reshape(B, S, DV)
                s = jnp.einsum('bqd,bkd->bqk', bf16(qh), bf16(kh),
                               preferred_element_type=jnp.float32)      # (B, S, S)
                s = s - jnp.max(s, axis=-1, keepdims=True)
                p = jnp.exp(s)
                p = p * pl.reciprocal(jnp.sum(p, axis=-1, keepdims=True), approx=True)
                heads.append(jnp.einsum('bqk,bkd->bqd', bf16(p), bf16(vh),
                                        preferred_element_type=jnp.float32))

            # fused output projection: lane-concat heads, ONE (B*S, HDV) @ (HDV, D) matmul
            cat = jnp.concatenate(heads, axis=-1).reshape(B * S, HDV)
            mha = jnp.dot(bf16(cat), wo_ref[l],
                          preferred_element_type=jnp.float32)           # (B*S, D)

            # residual + LN1, feed-forward, residual + LN2 (all f32 elementwise math)
            y = layer_norm(x2 + mha + bo, ln1g, ln1b)
            hdn = jnp.maximum(
                jnp.dot(bf16(y), wf1_ref[l], preferred_element_type=jnp.float32) + bf1, 0.0)
            ff = jnp.dot(bf16(hdn), wf2_ref[l], preferred_element_type=jnp.float32) + bf2
            return layer_norm(y + ff, ln2g, ln2b)

        # ---- embeddings (inputs already batch-folded + bf16 from the wrapper) ----
        zt = jnp.dot(xt_ref[...], embwt_ref[...], preferred_element_type=jnp.float32)
        zt = (zt.reshape(B, T, D) + embv_ref[0:T, :][None, :, :]).reshape(B * T, D)

        zf = jnp.dot(xf_ref[...], embwf_ref[...], preferred_element_type=jnp.float32)
        zf = zf + embv_ref[T:T + 1, :]
        # feature ("channel") tower has no positional encoding (all-zeros in reference).

        # ---- encoder towers (layers 0..NENC-1 timestep, NENC..2*NENC-1 feature) ----
        for l in range(NENC):
            zt = encoder_apply(zt, T, l)
        for l in range(NENC):
            zf = encoder_apply(zf, F, NENC + l)

        # ---- gate + output head: ONE matmul per tower on the flattened activations ----
        def flatten_rows(z, ns):
            # (B*ns, D) row-major -> (B, ns*D) built only from contiguous row slices
            # + lane/sublane concats (guaranteed-lowerable ops, off the MXU chain).
            rows = []
            for b in range(B):
                rows.append(jnp.concatenate(
                    [z[b * ns + s:b * ns + s + 1, :] for s in range(ns)], axis=1))
            return jnp.concatenate(rows, axis=0)               # (B, ns*D)

        hw = hw_ref[...]                                        # (TD+FD, NOUT) bf16
        at6 = jnp.dot(bf16(flatten_rows(zt, T)), hw[0:TD, :],
                      preferred_element_type=jnp.float32)       # (B, NOUT)
        af6 = jnp.dot(bf16(flatten_rows(zf, F)), hw[TD:TD + FD, :],
                      preferred_element_type=jnp.float32)       # (B, NOUT)

        hb = hb_ref[...]                                        # (1, NOUT) f32
        logits = at6[:, :N_GATE] + af6[:, :N_GATE] + hb[:, :N_GATE]       # (B, 2)
        logits = logits - jnp.max(logits, axis=-1, keepdims=True)
        e = jnp.exp(logits)
        gate = e / jnp.sum(e, axis=-1, keepdims=True)           # exact division (tiny)
        out = (gate[:, 0:1] * at6[:, N_GATE:]
               + gate[:, 1:2] * af6[:, N_GATE:]) + hb[:, N_GATE:]          # (B, NCLS)
        o_ref[...] = out.astype(o_ref.dtype)

    return kernel


# ----------------------------------------------------------------------------- params
def dense_init(key, n_in, n_out):
    k1, k2 = jax.random.split(key)
    bound = 1.0 / math.sqrt(n_in)
    w = jax.random.uniform(k1, (n_in, n_out), jnp.float32, -bound, bound)
    b = jax.random.uniform(k2, (1, n_out), jnp.float32, -bound, bound)
    return w, b


def encoder_init(key):
    ks = jax.random.split(key, 6)
    wq, bq = dense_init(ks[0], DIM_MODEL, DIM_Q * NUM_HEADS)
    wk, bk = dense_init(ks[1], DIM_MODEL, DIM_Q * NUM_HEADS)
    wv, bv = dense_init(ks[2], DIM_MODEL, DIM_V * NUM_HEADS)
    wo, bo = dense_init(ks[3], DIM_V * NUM_HEADS, DIM_MODEL)
    wf1, bf1 = dense_init(ks[4], DIM_MODEL, DIM_HIDDEN)
    wf2, bf2 = dense_init(ks[5], DIM_HIDDEN, DIM_MODEL)
    ln1g = jnp.ones((1, DIM_MODEL), jnp.float32); ln1b = jnp.zeros((1, DIM_MODEL), jnp.float32)
    ln2g = jnp.ones((1, DIM_MODEL), jnp.float32); ln2b = jnp.zeros((1, DIM_MODEL), jnp.float32)
    return (wq, bq, wk, bk, wv, bv, wo, bo, ln1g, ln1b, wf1, bf1, wf2, bf2, ln2g, ln2b)


def static_positional_encoding(seq_len, d_model):
    position = np.arange(seq_len, dtype=np.float32)[:, None]
    div = np.exp(np.arange(0, d_model, 2, dtype=np.float32) * -(math.log(10000.0) / d_model))
    ang = position * div
    pe = np.zeros((seq_len, d_model), dtype=np.float32)
    pe[:, 0::2] = np.sin(ang)
    pe[:, 1::2] = np.cos(ang)
    return jnp.asarray(pe)


def init_gated_transformer(key):
    keys = jax.random.split(key, 4 + 2 * NUM_ENCODERS)
    params = {}
    # timestep embedding: Linear(dim_feature -> dim_model) on x^T, plus static PE
    params["emb_t_w"], params["emb_t_b"] = dense_init(keys[0], DIM_FEATURE, DIM_MODEL)
    params["pe_t"] = static_positional_encoding(DIM_TIMESTEP, DIM_MODEL)
    # feature embedding: Linear(dim_timestep -> dim_model) on x, no PE
    params["emb_f_w"], params["emb_f_b"] = dense_init(keys[1], DIM_TIMESTEP, DIM_MODEL)
    params["enc_t"] = [encoder_init(keys[2 + i]) for i in range(NUM_ENCODERS)]
    params["enc_f"] = [encoder_init(keys[2 + NUM_ENCODERS + i]) for i in range(NUM_ENCODERS)]
    feat_total = DIM_TIMESTEP * DIM_MODEL + DIM_FEATURE * DIM_MODEL
    params["gate_w"], params["gate_b"] = dense_init(keys[2 + 2 * NUM_ENCODERS], feat_total, N_GATE)
    params["out_w"], params["out_b"] = dense_init(keys[3 + 2 * NUM_ENCODERS], feat_total, NUM_CLASS)
    return params


# ----------------------------------------------------------------------------- host-side weight prep
def prepare_operands(params):
    """Pack / scale weights into the kernel-native layout (mathematically exact).

    12 operands total instead of 27: packed QKV weights, one bias/LN slab per layer,
    merged gate+out head, bf16 MXU weights (bias / LN / PE stay f32).
    """
    bf = jnp.bfloat16
    scale = 1.0 / math.sqrt(DIM_Q)
    layers = list(params["enc_t"]) + list(params["enc_f"])   # order: t0, t1, f0, f1

    def pad_lanes(v, w):
        return jnp.pad(v, ((0, 0), (0, w - v.shape[1])))

    wqkv_l, wo_l, wf1_l, wf2_l, vecs_l = [], [], [], [], []
    for (wq, bq, wk, bk, wv, bv, wo, bo, ln1g, ln1b, wf1, bf1, wf2, bf2,
         ln2g, ln2b) in layers:
        wqkv_l.append(jnp.concatenate([wq * scale, wk, wv], axis=1))      # (D, 3*H*DQ)
        wo_l.append(wo); wf1_l.append(wf1); wf2_l.append(wf2)
        bqkv = jnp.concatenate([bq * scale, bk, bv], axis=1)              # (1, 96)
        width = bqkv.shape[1]
        vecs_l.append(jnp.concatenate(
            [bqkv] + [pad_lanes(v, width) for v in
                      (bo, bf1, bf2, ln1g, ln1b, ln2g, ln2b)], axis=0))   # (8, 96)

    stk = lambda xs: jnp.stack(xs, axis=0)
    wqkv = stk(wqkv_l).astype(bf)          # (NL, 32, 96)
    wo   = stk(wo_l).astype(bf)            # (NL, 32, 32)
    wf1  = stk(wf1_l).astype(bf)           # (NL, 32, 64)
    wf2  = stk(wf2_l).astype(bf)           # (NL, 64, 32)
    vecs = stk(vecs_l)                     # (NL, 8, 96) f32

    embwt = params["emb_t_w"].astype(bf)                                   # (F, D)
    embwf = params["emb_f_w"].astype(bf)                                   # (T, D)
    embv = jnp.concatenate([params["pe_t"] + params["emb_t_b"],
                            params["emb_f_b"]], axis=0)                    # (T+1, D) f32

    # gate + output head: merge gate/out columns, keep timestep rows first then feature
    TD = DIM_TIMESTEP * DIM_MODEL
    hw = jnp.concatenate(
        [jnp.concatenate([params["gate_w"][:TD], params["out_w"][:TD]], axis=1),
         jnp.concatenate([params["gate_w"][TD:], params["out_w"][TD:]], axis=1)],
        axis=0).astype(bf)                                                  # (TD+FD, 2+C)
    hb = jnp.concatenate([params["gate_b"], params["out_b"]], axis=1)       # (1, 2+C) f32

    return (embwt, embwf, embv, wqkv, wo, wf1, wf2, vecs, hw, hb)


# ----------------------------------------------------------------------------- forward
def _forward(params, x):
    # x: (B, dim_feature, dim_timestep).  Eval ('test') semantics: dropout = identity.
    B = x.shape[0]
    # batch-fold reshapes done host-side (free layout plumbing); bf16 MXU inputs
    xt2 = jnp.transpose(x, (0, 2, 1)).reshape(B * DIM_TIMESTEP, DIM_FEATURE).astype(jnp.bfloat16)
    xf2 = x.reshape(B * DIM_FEATURE, DIM_TIMESTEP).astype(jnp.bfloat16)
    ops = prepare_operands(params)

    kernel = make_fused_gtn_kernel(B, DIM_TIMESTEP, DIM_FEATURE, DIM_MODEL, DIM_HIDDEN,
                                   NUM_HEADS, DIM_Q, DIM_V, NUM_ENCODERS, NUM_CLASS)
    # Single fused invocation (no grid): every operand is a full-array VMEM block; the
    # only HBM traffic is the tiny packed inputs/weights in and the (B, num_class) out.
    # Total VMEM footprint << 1 MiB, so no vmem_limit / tiling needed on any generation.
    return pl.pallas_call(
        kernel,
        out_shape=jax.ShapeDtypeStruct((B, NUM_CLASS), jnp.float32),
    )(xt2, xf2, *ops)


gated_transformer_forward = jax.jit(_forward)


# ----------------------------------------------------------------------------- main
if __name__ == "__main__":
    key = jax.random.PRNGKey(0)
    k_param, k_data = jax.random.split(key)

    params = init_gated_transformer(k_param)
    x = jax.random.normal(k_data, (BATCH, DIM_FEATURE, DIM_TIMESTEP), jnp.float32)

    out = gated_transformer_forward(params, x)
    out = jax.block_until_ready(out)

    assert out.shape == (BATCH, NUM_CLASS), out.shape
    assert bool(jnp.all(jnp.isfinite(out)))
    print("KERNEL_OK")
</pallas_src>

<mosaic_0001>
module attributes {stable_mosaic.version = 11 : i64} {
  func.func @kernel(%arg0: memref<32x8xbf16, #tpu.memory_space<vmem>>, %arg1: memref<16x16xbf16, #tpu.memory_space<vmem>>, %arg2: memref<8x32xbf16, #tpu.memory_space<vmem>>, %arg3: memref<16x32xbf16, #tpu.memory_space<vmem>>, %arg4: memref<17x32xf32, #tpu.memory_space<vmem>>, %arg5: memref<4x32x96xbf16, #tpu.memory_space<vmem>>, %arg6: memref<4x32x32xbf16, #tpu.memory_space<vmem>>, %arg7: memref<4x32x64xbf16, #tpu.memory_space<vmem>>, %arg8: memref<4x64x32xbf16, #tpu.memory_space<vmem>>, %arg9: memref<4x8x96xf32, #tpu.memory_space<vmem>>, %arg10: memref<768x6xbf16, #tpu.memory_space<vmem>>, %arg11: memref<1x6xf32, #tpu.memory_space<vmem>>, %arg12: memref<2x4xf32, #tpu.memory_space<vmem>>) attributes {dimension_semantics = [], scalar_prefetch = 0 : i64, scratch_operands = 0 : i64, tpu.core_type = #tpu.core_type<tc>} {
    %c0 = arith.constant 0 : index
    %c0_0 = arith.constant 0 : index
    %0 = vector.load %arg0[%c0, %c0_0] : memref<32x8xbf16, #tpu.memory_space<vmem>>, vector<32x8xbf16>
    %c0_1 = arith.constant 0 : index
    %c0_2 = arith.constant 0 : index
    %1 = vector.load %arg2[%c0_1, %c0_2] : memref<8x32xbf16, #tpu.memory_space<vmem>>, vector<8x32xbf16>
    %cst = arith.constant dense<0.000000e+00> : vector<32x32xf32>
    %2 = tpu.matmul %0, %1, %cst {dimension_numbers = #tpu.dot_dimension_numbers<[1], [0], [0], [1], [0, 0, 1, 1], [], []>} : vector<32x8xbf16>, vector<8x32xbf16>, vector<32x32xf32> -> vector<32x32xf32>
    %3 = vector.shape_cast %2 : vector<32x32xf32> to vector<2x16x32xf32>
    %c0_3 = arith.constant 0 : index
    %c0_4 = arith.constant 0 : index
    %4 = vector.load %arg4[%c0_3, %c0_4] : memref<17x32xf32, #tpu.memory_space<vmem>>, vector<16x32xf32>
    %5 = vector.shape_cast %4 : vector<16x32xf32> to vector<1x16x32xf32>
    %6 = vector.broadcast %5 : vector<1x16x32xf32> to vector<2x16x32xf32>
    %7 = arith.addf %3, %6 : vector<2x16x32xf32>
    %8 = vector.shape_cast %7 : vector<2x16x32xf32> to vector<32x32xf32>
    %c0_5 = arith.constant 0 : index
    %c0_6 = arith.constant 0 : index
    %9 = vector.load %arg1[%c0_5, %c0_6] : memref<16x16xbf16, #tpu.memory_space<vmem>>, vector<16x16xbf16>
    %c0_7 = arith.constant 0 : index
    %c0_8 = arith.constant 0 : index
    %10 = vector.load %arg3[%c0_7, %c0_8] : memref<16x32xbf16, #tpu.memory_space<vmem>>, vector<16x32xbf16>
    %cst_9 = arith.constant dense<0.000000e+00> : vector<16x32xf32>
    %11 = tpu.matmul %9, %10, %cst_9 {dimension_numbers = #tpu.dot_dimension_numbers<[1], [0], [0], [1], [0, 0, 1, 1], [], []>} : vector<16x16xbf16>, vector<16x32xbf16>, vector<16x32xf32> -> vector<16x32xf32>
    %c16 = arith.constant 16 : index
    %c0_10 = arith.constant 0 : index
    %12 = vector.load %arg4[%c16, %c0_10] : memref<17x32xf32, #tpu.memory_space<vmem>>, vector<1x32xf32>
    %13 = vector.broadcast %12 : vector<1x32xf32> to vector<16x32xf32>
    %14 = arith.addf %11, %13 : vector<16x32xf32>
    %c0_11 = arith.constant 0 : index
    %c0_12 = arith.constant 0 : index
    %c0_13 = arith.constant 0 : index
    %15 = vector.load %arg9[%c0_11, %c0_12, %c0_13] : memref<4x8x96xf32, #tpu.memory_space<vmem>>, vector<1x8x96xf32>
    %16 = vector.shape_cast %15 : vector<1x8x96xf32> to vector<8x96xf32>
    %17 = vector.extract_strided_slice %16 {offsets = [0, 0], sizes = [1, 96], strides = [1, 1]} : vector<8x96xf32> to vector<1x96xf32>
    %18 = vector.extract_strided_slice %16 {offsets = [1, 0], sizes = [1, 32], strides = [1, 1]} : vector<8x96xf32> to vector<1x32xf32>
    %19 = vector.extract_strided_slice %16 {offsets = [2, 0], sizes = [1, 64], strides = [1, 1]} : vector<8x96xf32> to vector<1x64xf32>
    %20 = vector.extract_strided_slice %16 {offsets = [3, 0], sizes = [1, 32], strides = [1, 1]} : vector<8x96xf32> to vector<1x32xf32>
    %21 = vector.extract_strided_slice %16 {offsets = [4, 0], sizes = [1, 32], strides = [1, 1]} : vector<8x96xf32> to vector<1x32xf32>
    %22 = vector.extract_strided_slice %16 {offsets = [5, 0], sizes = [1, 32], strides = [1, 1]} : vector<8x96xf32> to vector<1x32xf32>
    %23 = vector.extract_strided_slice %16 {offsets = [6, 0], sizes = [1, 32], strides = [1, 1]} : vector<8x96xf32> to vector<1x32xf32>
    %24 = vector.extract_strided_slice %16 {offsets = [7, 0], sizes = [1, 32], strides = [1, 1]} : vector<8x96xf32> to vector<1x32xf32>
    %25 = arith.truncf %8 : vector<32x32xf32> to vector<32x32xbf16>
    %c0_14 = arith.constant 0 : index
    %c0_15 = arith.constant 0 : index
    %c0_16 = arith.constant 0 : index
    %26 = vector.load %arg5[%c0_14, %c0_15, %c0_16] : memref<4x32x96xbf16, #tpu.memory_space<vmem>>, vector<1x32x96xbf16>
    %27 = vector.shape_cast %26 : vector<1x32x96xbf16> to vector<32x96xbf16>
    %cst_17 = arith.constant dense<0.000000e+00> : vector<32x96xf32>
    %28 = tpu.matmul %25, %27, %cst_17 {dimension_numbers = #tpu.dot_dimension_numbers<[1], [0], [0], [1], [0, 0, 1, 1], [], []>} : vector<32x32xbf16>, vector<32x96xbf16>, vector<32x96xf32> -> vector<32x96xf32>
    %29 = vector.broadcast %17 : vector<1x96xf32> to vector<32x96xf32>
    %30 = arith.addf %28, %29 : vector<32x96xf32>
    %31 = vector.extract_strided_slice %30 {offsets = [0, 0], sizes = [32, 8], strides = [1, 1]} : vector<32x96xf32> to vector<32x8xf32>
    %32 = vector.shape_cast %31 : vector<32x8xf32> to vector<2x16x8xf32>
    %33 = vector.extract_strided_slice %30 {offsets = [0, 32], sizes = [32, 8], strides = [1, 1]} : vector<32x96xf32> to vector<32x8xf32>
    %34 = vector.shape_cast %33 : vector<32x8xf32> to vector<2x16x8xf32>
    %35 = vector.extract_strided_slice %30 {offsets = [0, 64], sizes = [32, 8], strides = [1, 1]} : vector<32x96xf32> to vector<32x8xf32>
    %36 = vector.shape_cast %35 : vector<32x8xf32> to vector<2x16x8xf32>
    %37 = arith.truncf %32 : vector<2x16x8xf32> to vector<2x16x8xbf16>
    %38 = arith.truncf %34 : vector<2x16x8xf32> to vector<2x16x8xbf16>
    "tpu.trace_start"() <{level = 10 : i32, message = "bqd,bkd->bqk"}> : () -> ()
    %cst_18 = arith.constant dense<0.000000e+00> : vector<2x16x16xf32>
    %39 = tpu.matmul %37, %38, %cst_18 {dimension_numbers = #tpu.dot_dimension_numbers<[2], [2], [1], [1], [0, 0, 0, 1, 1, 1], [0], [0]>} : vector<2x16x8xbf16>, vector<2x16x8xbf16>, vector<2x16x16xf32> -> vector<2x16x16xf32>
    "tpu.trace_stop"() : () -> ()
    %cst_19 = arith.constant dense<0xFF800000> : vector<2x16xf32>
    %40 = vector.multi_reduction <maximumf>, %39, %cst_19 [2] : vector<2x16x16xf32> to vector<2x16xf32>
    %41 = vector.shape_cast %40 : vector<2x16xf32> to vector<2x16x1xf32>
    %42 = vector.broadcast %41 : vector<2x16x1xf32> to vector<2x16x16xf32>
    %43 = arith.subf %39, %42 : vector<2x16x16xf32>
    %44 = math.exp %43 : vector<2x16x16xf32>
    %cst_20 = arith.constant dense<0.000000e+00> : vector<2x16xf32>
    %45 = vector.multi_reduction <add>, %44, %cst_20 [2] : vector<2x16x16xf32> to vector<2x16xf32>
    %46 = vector.shape_cast %45 : vector<2x16xf32> to vector<2x16x1xf32>
    %47 = tpu.reciprocal %46 {approx = true} : vector<2x16x1xf32> -> vector<2x16x1xf32>
    %48 = vector.broadcast %47 : vector<2x16x1xf32> to vector<2x16x16xf32>
    %49 = arith.mulf %44, %48 : vector<2x16x16xf32>
    %50 = arith.truncf %49 : vector<2x16x16xf32> to vector<2x16x16xbf16>
    %51 = arith.truncf %36 : vector<2x16x8xf32> to vector<2x16x8xbf16>
    "tpu.trace_start"() <{level = 10 : i32, message = "bqk,bkd->bqd"}> : () -> ()
    %cst_21 = arith.constant dense<0.000000e+00> : vector<2x16x8xf32>
    %52 = tpu.matmul %50, %51, %cst_21 {dimension_numbers = #tpu.dot_dimension_numbers<[2], [1], [1], [2], [0, 0, 0, 1, 1, 2], [0], [0]>} : vector<2x16x16xbf16>, vector<2x16x8xbf16>, vector<2x16x8xf32> -> vector<2x16x8xf32>
    "tpu.trace_stop"() : () -> ()
    %53 = vector.extract_strided_slice %30 {offsets = [0, 8], sizes = [32, 8], strides = [1, 1]} : vector<32x96xf32> to vector<32x8xf32>
    %54 = vector.shape_cast %53 : vector<32x8xf32> to vector<2x16x8xf32>
    %55 = vector.extract_strided_slice %30 {offsets = [0, 40], sizes = [32, 8], strides = [1, 1]} : vector<32x96xf32> to vector<32x8xf32>
    %56 = vector.shape_cast %55 : vector<32x8xf32> to vector<2x16x8xf32>
    %57 = vector.extract_strided_slice %30 {offsets = [0, 72], sizes = [32, 8], strides = [1, 1]} : vector<32x96xf32> to vector<32x8xf32>
    %58 = vector.shape_cast %57 : vector<32x8xf32> to vector<2x16x8xf32>
    %59 = arith.truncf %54 : vector<2x16x8xf32> to vector<2x16x8xbf16>
    %60 = arith.truncf %56 : vector<2x16x8xf32> to vector<2x16x8xbf16>
    "tpu.trace_start"() <{level = 10 : i32, message = "bqd,bkd->bqk"}> : () -> ()
    %cst_22 = arith.constant dense<0.000000e+00> : vector<2x16x16xf32>
    %61 = tpu.matmul %59, %60, %cst_22 {dimension_numbers = #tpu.dot_dimension_numbers<[2], [2], [1], [1], [0, 0, 0, 1, 1, 1], [0], [0]>} : vector<2x16x8xbf16>, vector<2x16x8xbf16>, vector<2x16x16xf32> -> vector<2x16x16xf32>
    "tpu.trace_stop"() : () -> ()
    %cst_23 = arith.constant dense<0xFF800000> : vector<2x16xf32>
    %62 = vector.multi_reduction <maximumf>, %61, %cst_23 [2] : vector<2x16x16xf32> to vector<2x16xf32>
    %63 = vector.shape_cast %62 : vector<2x16xf32> to vector<2x16x1xf32>
    %64 = vector.broadcast %63 : vector<2x16x1xf32> to vector<2x16x16xf32>
    %65 = arith.subf %61, %64 : vector<2x16x16xf32>
    %66 = math.exp %65 : vector<2x16x16xf32>
    %cst_24 = arith.constant dense<0.000000e+00> : vector<2x16xf32>
    %67 = vector.multi_reduction <add>, %66, %cst_24 [2] : vector<2x16x16xf32> to vector<2x16xf32>
    %68 = vector.shape_cast %67 : vector<2x16xf32> to vector<2x16x1xf32>
    %69 = tpu.reciprocal %68 {approx = true} : vector<2x16x1xf32> -> vector<2x16x1xf32>
    %70 = vector.broadcast %69 : vector<2x16x1xf32> to vector<2x16x16xf32>
    %71 = arith.mulf %66, %70 : vector<2x16x16xf32>
    %72 = arith.truncf %71 : vector<2x16x16xf32> to vector<2x16x16xbf16>
    %73 = arith.truncf %58 : vector<2x16x8xf32> to vector<2x16x8xbf16>
    "tpu.trace_start"() <{level = 10 : i32, message = "bqk,bkd->bqd"}> : () -> ()
    %cst_25 = arith.constant dense<0.000000e+00> : vector<2x16x8xf32>
    %74 = tpu.matmul %72, %73, %cst_25 {dimension_numbers = #tpu.dot_dimension_numbers<[2], [1], [1], [2], [0, 0, 0, 1, 1, 2], [0], [0]>} : vector<2x16x16xbf16>, vector<2x16x8xbf16>, vector<2x16x8xf32> -> vector<2x16x8xf32>
    "tpu.trace_stop"() : () -> ()
    %75 = vector.extract_strided_slice %30 {offsets = [0, 16], sizes = [32, 8], strides = [1, 1]} : vector<32x96xf32> to vector<32x8xf32>
    %76 = vector.shape_cast %75 : vector<32x8xf32> to vector<2x16x8xf32>
    %77 = vector.extract_strided_slice %30 {offsets = [0, 48], sizes = [32, 8], strides = [1, 1]} : vector<32x96xf32> to vector<32x8xf32>
    %78 = vector.shape_cast %77 : vector<32x8xf32> to vector<2x16x8xf32>
    %79 = vector.extract_strided_slice %30 {offsets = [0, 80], sizes = [32, 8], strides = [1, 1]} : vector<32x96xf32> to vector<32x8xf32>
    %80 = vector.shape_cast %79 : vector<32x8xf32> to vector<2x16x8xf32>
    %81 = arith.truncf %76 : vector<2x16x8xf32> to vector<2x16x8xbf16>
    %82 = arith.truncf %78 : vector<2x16x8xf32> to vector<2x16x8xbf16>
    "tpu.trace_start"() <{level = 10 : i32, message = "bqd,bkd->bqk"}> : () -> ()
    %cst_26 = arith.constant dense<0.000000e+00> : vector<2x16x16xf32>
    %83 = tpu.matmul %81, %82, %cst_26 {dimension_numbers = #tpu.dot_dimension_numbers<[2], [2], [1], [1], [0, 0, 0, 1, 1, 1], [0], [0]>} : vector<2x16x8xbf16>, vector<2x16x8xbf16>, vector<2x16x16xf32> -> vector<2x16x16xf32>
    "tpu.trace_stop"() : () -> ()
    %cst_27 = arith.constant dense<0xFF800000> : vector<2x16xf32>
    %84 = vector.multi_reduction <maximumf>, %83, %cst_27 [2] : vector<2x16x16xf32> to vector<2x16xf32>
    %85 = vector.shape_cast %84 : vector<2x16xf32> to vector<2x16x1xf32>
    %86 = vector.broadcast %85 : vector<2x16x1xf32> to vector<2x16x16xf32>
    %87 = arith.subf %83, %86 : vector<2x16x16xf32>
    %88 = math.exp %87 : vector<2x16x16xf32>
    %cst_28 = arith.constant dense<0.000000e+00> : vector<2x16xf32>
    %89 = vector.multi_reduction <add>, %88, %cst_28 [2] : vector<2x16x16xf32> to vector<2x16xf32>
    %90 = vector.shape_cast %89 : vector<2x16xf32> to vector<2x16x1xf32>
    %91 = tpu.reciprocal %90 {approx = true} : vector<2x16x1xf32> -> vector<2x16x1xf32>
    %92 = vector.broadcast %91 : vector<2x16x1xf32> to vector<2x16x16xf32>
    %93 = arith.mulf %88, %92 : vector<2x16x16xf32>
    %94 = arith.truncf %93 : vector<2x16x16xf32> to vector<2x16x16xbf16>
    %95 = arith.truncf %80 : vector<2x16x8xf32> to vector<2x16x8xbf16>
    "tpu.trace_start"() <{level = 10 : i32, message = "bqk,bkd->bqd"}> : () -> ()
    %cst_29 = arith.constant dense<0.000000e+00> : vector<2x16x8xf32>
    %96 = tpu.matmul %94, %95, %cst_29 {dimension_numbers = #tpu.dot_dimension_numbers<[2], [1], [1], [2], [0, 0, 0, 1, 1, 2], [0], [0]>} : vector<2x16x16xbf16>, vector<2x16x8xbf16>, vector<2x16x8xf32> -> vector<2x16x8xf32>
    "tpu.trace_stop"() : () -> ()
    %97 = vector.extract_strided_slice %30 {offsets = [0, 24], sizes = [32, 8], strides = [1, 1]} : vector<32x96xf32> to vector<32x8xf32>
    %98 = vector.shape_cast %97 : vector<32x8xf32> to vector<2x16x8xf32>
    %99 = vector.extract_strided_slice %30 {offsets = [0, 56], sizes = [32, 8], strides = [1, 1]} : vector<32x96xf32> to vector<32x8xf32>
    %100 = vector.shape_cast %99 : vector<32x8xf32> to vector<2x16x8xf32>
    %101 = vector.extract_strided_slice %30 {offsets = [0, 88], sizes = [32, 8], strides = [1, 1]} : vector<32x96xf32> to vector<32x8xf32>
    %102 = vector.shape_cast %101 : vector<32x8xf32> to vector<2x16x8xf32>
    %103 = arith.truncf %98 : vector<2x16x8xf32> to vector<2x16x8xbf16>
    %104 = arith.truncf %100 : vector<2x16x8xf32> to vector<2x16x8xbf16>
    "tpu.trace_start"() <{level = 10 : i32, message = "bqd,bkd->bqk"}> : () -> ()
    %cst_30 = arith.constant dense<0.000000e+00> : vector<2x16x16xf32>
    %105 = tpu.matmul %103, %104, %cst_30 {dimension_numbers = #tpu.dot_dimension_numbers<[2], [2], [1], [1], [0, 0, 0, 1, 1, 1], [0], [0]>} : vector<2x16x8xbf16>, vector<2x16x8xbf16>, vector<2x16x16xf32> -> vector<2x16x16xf32>
    "tpu.trace_stop"() : () -> ()
    %cst_31 = arith.constant dense<0xFF800000> : vector<2x16xf32>
    %106 = vector.multi_reduction <maximumf>, %105, %cst_31 [2] : vector<2x16x16xf32> to vector<2x16xf32>
    %107 = vector.shape_cast %106 : vector<2x16xf32> to vector<2x16x1xf32>
    %108 = vector.broadcast %107 : vector<2x16x1xf32> to vector<2x16x16xf32>
    %109 = arith.subf %105, %108 : vector<2x16x16xf32>
    %110 = math.exp %109 : vector<2x16x16xf32>
    %cst_32 = arith.constant dense<0.000000e+00> : vector<2x16xf32>
    %111 = vector.multi_reduction <add>, %110, %cst_32 [2] : vector<2x16x16xf32> to vector<2x16xf32>
    %112 = vector.shape_cast %111 : vector<2x16xf32> to vector<2x16x1xf32>
    %113 = tpu.reciprocal %112 {approx = true} : vector<2x16x1xf32> -> vector<2x16x1xf32>
    %114 = vector.broadcast %113 : vector<2x16x1xf32> to vector<2x16x16xf32>
    %115 = arith.mulf %110, %114 : vector<2x16x16xf32>
    %116 = arith.truncf %115 : vector<2x16x16xf32> to vector<2x16x16xbf16>
    %117 = arith.truncf %102 : vector<2x16x8xf32> to vector<2x16x8xbf16>
    "tpu.trace_start"() <{level = 10 : i32, message = "bqk,bkd->bqd"}> : () -> ()
    %cst_33 = arith.constant dense<0.000000e+00> : vector<2x16x8xf32>
    %118 = tpu.matmul %116, %117, %cst_33 {dimension_numbers = #tpu.dot_dimension_numbers<[2], [1], [1], [2], [0, 0, 0, 1, 1, 2], [0], [0]>} : vector<2x16x16xbf16>, vector<2x16x8xbf16>, vector<2x16x8xf32> -> vector<2x16x8xf32>
    "tpu.trace_stop"() : () -> ()
    %119 = tpu.concatenate %52, %74, %96, %118 in 2 : vector<2x16x8xf32>, vector<2x16x8xf32>, vector<2x16x8xf32>, vector<2x16x8xf32> -> vector<2x16x32xf32>
    %120 = vector.shape_cast %119 : vector<2x16x32xf32> to vector<32x32xf32>
    %121 = arith.truncf %120 : vector<32x32xf32> to vector<32x32xbf16>
    %c0_34 = arith.constant 0 : index
    %c0_35 = arith.constant 0 : index
    %c0_36 = arith.constant 0 : index
    %122 = vector.load %arg6[%c0_34, %c0_35, %c0_36] : memref<4x32x32xbf16, #tpu.memory_space<vmem>>, vector<1x32x32xbf16>
    %123 = vector.shape_cast %122 : vector<1x32x32xbf16> to vector<32x32xbf16>
    %cst_37 = arith.constant dense<0.000000e+00> : vector<32x32xf32>
    %124 = tpu.matmul %121, %123, %cst_37 {dimension_numbers = #tpu.dot_dimension_numbers<[1], [0], [0], [1], [0, 0, 1, 1], [], []>} : vector<32x32xbf16>, vector<32x32xbf16>, vector<32x32xf32> -> vector<32x32xf32>
    %125 = arith.addf %8, %124 : vector<32x32xf32>
    %126 = vector.broadcast %18 : vector<1x32xf32> to vector<32x32xf32>
    %127 = arith.addf %125, %126 : vector<32x32xf32>
    %cst_38 = arith.constant dense<0.000000e+00> : vector<32xf32>
    %128 = vector.multi_reduction <add>, %127, %cst_38 [1] : vector<32x32xf32> to vector<32xf32>
    %129 = vector.shape_cast %128 : vector<32xf32> to vector<32x1xf32>
    %cst_39 = arith.constant 3.200000e+01 : f32
    %130 = vector.broadcast %cst_39 : f32 to vector<32x1xf32>
    %131 = arith.divf %129, %130 : vector<32x1xf32>
    %132 = vector.broadcast %131 : vector<32x1xf32> to vector<32x32xf32>
    %133 = arith.subf %127, %132 : vector<32x32xf32>
    %134 = arith.mulf %133, %133 : vector<32x32xf32>
    %cst_40 = arith.constant dense<0.000000e+00> : vector<32xf32>
    %135 = vector.multi_reduction <add>, %134, %cst_40 [1] : vector<32x32xf32> to vector<32xf32>
    %136 = vector.shape_cast %135 : vector<32xf32> to vector<32x1xf32>
    %cst_41 = arith.constant 3.200000e+01 : f32
    %137 = vector.broadcast %cst_41 : f32 to vector<32x1xf32>
    %138 = arith.divf %136, %137 : vector<32x1xf32>
    %139 = vector.broadcast %131 : vector<32x1xf32> to vector<32x32xf32>
    %140 = arith.subf %127, %139 : vector<32x32xf32>
    %cst_42 = arith.constant 9.99999974E-6 : f32
    %141 = vector.broadcast %cst_42 : f32 to vector<32x1xf32>
    %142 = arith.addf %138, %141 : vector<32x1xf32>
    %143 = math.rsqrt %142 : vector<32x1xf32>
    %144 = vector.broadcast %143 : vector<32x1xf32> to vector<32x32xf32>
    %145 = arith.mulf %140, %144 : vector<32x32xf32>
    %146 = vector.broadcast %21 : vector<1x32xf32> to vector<32x32xf32>
    %147 = arith.mulf %145, %146 : vector<32x32xf32>
    %148 = vector.broadcast %22 : vector<1x32xf32> to vector<32x32xf32>
    %149 = arith.addf %147, %148 : vector<32x32xf32>
    %150 = arith.truncf %149 : vector<32x32xf32> to vector<32x32xbf16>
    %c0_43 = arith.constant 0 : index
    %c0_44 = arith.constant 0 : index
    %c0_45 = arith.constant 0 : index
    %151 = vector.load %arg7[%c0_43, %c0_44, %c0_45] : memref<4x32x64xbf16, #tpu.memory_space<vmem>>, vector<1x32x64xbf16>
    %152 = vector.shape_cast %151 : vector<1x32x64xbf16> to vector<32x64xbf16>
    %cst_46 = arith.constant dense<0.000000e+00> : vector<32x64xf32>
    %153 = tpu.matmul %150, %152, %cst_46 {dimension_numbers = #tpu.dot_dimension_numbers<[1], [0], [0], [1], [0, 0, 1, 1], [], []>} : vector<32x32xbf16>, vector<32x64xbf16>, vector<32x64xf32> -> vector<32x64xf32>
    %154 = vector.broadcast %19 : vector<1x64xf32> to vector<32x64xf32>
    %155 = arith.addf %153, %154 : vector<32x64xf32>
    %cst_47 = arith.constant 0.000000e+00 : f32
    %156 = vector.broadcast %cst_47 : f32 to vector<32x64xf32>
    %157 = arith.maximumf %155, %156 : vector<32x64xf32>
    %158 = arith.truncf %157 : vector<32x64xf32> to vector<32x64xbf16>
    %c0_48 = arith.constant 0 : index
    %c0_49 = arith.constant 0 : index
    %c0_50 = arith.constant 0 : index
    %159 = vector.load %arg8[%c0_48, %c0_49, %c0_50] : memref<4x64x32xbf16, #tpu.memory_space<vmem>>, vector<1x64x32xbf16>
    %160 = vector.shape_cast %159 : vector<1x64x32xbf16> to vector<64x32xbf16>
    %cst_51 = arith.constant dense<0.000000e+00> : vector<32x32xf32>
    %161 = tpu.matmul %158, %160, %cst_51 {dimension_numbers = #tpu.dot_dimension_numbers<[1], [0], [0], [1], [0, 0, 1, 1], [], []>} : vector<32x64xbf16>, vector<64x32xbf16>, vector<32x32xf32> -> vector<32x32xf32>
    %162 = vector.broadcast %20 : vector<1x32xf32> to vector<32x32xf32>
    %163 = arith.addf %161, %162 : vector<32x32xf32>
    %164 = arith.addf %149, %163 : vector<32x32xf32>
    %cst_52 = arith.constant dense<0.000000e+00> : vector<32xf32>
    %165 = vector.multi_reduction <add>, %164, %cst_52 [1] : vector<32x32xf32> to vector<32xf32>
    %166 = vector.shape_cast %165 : vector<32xf32> to vector<32x1xf32>
    %cst_53 = arith.constant 3.200000e+01 : f32
    %167 = vector.broadcast %cst_53 : f32 to vector<32x1xf32>
    %168 = arith.divf %166, %167 : vector<32x1xf32>
    %169 = vector.broadcast %168 : vector<32x1xf32> to vector<32x32xf32>
    %170 = arith.subf %164, %169 : vector<32x32xf32>
    %171 = arith.mulf %170, %170 : vector<32x32xf32>
    %cst_54 = arith.constant dense<0.000000e+00> : vector<32xf32>
    %172 = vector.multi_reduction <add>, %171, %cst_54 [1] : vector<32x32xf32> to vector<32xf32>
    %173 = vector.shape_cast %172 : vector<32xf32> to vector<32x1xf32>
    %cst_55 = arith.constant 3.200000e+01 : f32
    %174 = vector.broadcast %cst_55 : f32 to vector<32x1xf32>
    %175 = arith.divf %173, %174 : vector<32x1xf32>
    %176 = vector.broadcast %168 : vector<32x1xf32> to vector<32x32xf32>
    %177 = arith.subf %164, %176 : vector<32x32xf32>
    %cst_56 = arith.constant 9.99999974E-6 : f32
    %178 = vector.broadcast %cst_56 : f32 to vector<32x1xf32>
    %179 = arith.addf %175, %178 : vector<32x1xf32>
    %180 = math.rsqrt %179 : vector<32x1xf32>
    %181 = vector.broadcast %180 : vector<32x1xf32> to vector<32x32xf32>
    %182 = arith.mulf %177, %181 : vector<32x32xf32>
    %183 = vector.broadcast %23 : vector<1x32xf32> to vector<32x32xf32>
    %184 = arith.mulf %182, %183 : vector<32x32xf32>
    %185 = vector.broadcast %24 : vector<1x32xf32> to vector<32x32xf32>
    %186 = arith.addf %184, %185 : vector<32x32xf32>
    %c1 = arith.constant 1 : index
    %c0_57 = arith.constant 0 : index
    %c0_58 = arith.constant 0 : index
    %187 = vector.load %arg9[%c1, %c0_57, %c0_58] : memref<4x8x96xf32, #tpu.memory_space<vmem>>, vector<1x8x96xf32>
    %188 = vector.shape_cast %187 : vector<1x8x96xf32> to vector<8x96xf32>
    %189 = vector.extract_strided_slice %188 {offsets = [0, 0], sizes = [1, 96], strides = [1, 1]} : vector<8x96xf32> to vector<1x96xf32>
    %190 = vector.extract_strided_slice %188 {offsets = [1, 0], sizes = [1, 32], strides = [1, 1]} : vector<8x96xf32> to vector<1x32xf32>
    %191 = vector.extract_strided_slice %188 {offsets = [2, 0], sizes = [1, 64], strides = [1, 1]} : vector<8x96xf32> to vector<1x64xf32>
    %192 = vector.extract_strided_slice %188 {offsets = [3, 0], sizes = [1, 32], strides = [1, 1]} : vector<8x96xf32> to vector<1x32xf32>
    %193 = vector.extract_strided_slice %188 {offsets = [4, 0], sizes = [1, 32], strides = [1, 1]} : vector<8x96xf32> to vector<1x32xf32>
    %194 = vector.extract_strided_slice %188 {offsets = [5, 0], sizes = [1, 32], strides = [1, 1]} : vector<8x96xf32> to vector<1x32xf32>
    %195 = vector.extract_strided_slice %188 {offsets = [6, 0], sizes = [1, 32], strides = [1, 1]} : vector<8x96xf32> to vector<1x32xf32>
    %196 = vector.extract_strided_slice %188 {offsets = [7, 0], sizes = [1, 32], strides = [1, 1]} : vector<8x96xf32> to vector<1x32xf32>
    %197 = arith.truncf %186 : vector<32x32xf32> to vector<32x32xbf16>
    %c1_59 = arith.constant 1 : index
    %c0_60 = arith.constant 0 : index
    %c0_61 = arith.constant 0 : index
    %198 = vector.load %arg5[%c1_59, %c0_60, %c0_61] : memref<4x32x96xbf16, #tpu.memory_space<vmem>>, vector<1x32x96xbf16>
    %199 = vector.shape_cast %198 : vector<1x32x96xbf16> to vector<32x96xbf16>
    %cst_62 = arith.constant dense<0.000000e+00> : vector<32x96xf32>
    %200 = tpu.matmul %197, %199, %cst_62 {dimension_numbers = #tpu.dot_dimension_numbers<[1], [0], [0], [1], [0, 0, 1, 1], [], []>} : vector<32x32xbf16>, vector<32x96xbf16>, vector<32x96xf32> -> vector<32x96xf32>
    %201 = vector.broadcast %189 : vector<1x96xf32> to vector<32x96xf32>
    %202 = arith.addf %200, %201 : vector<32x96xf32>
    %203 = vector.extract_strided_slice %202 {offsets = [0, 0], sizes = [32, 8], strides = [1, 1]} : vector<32x96xf32> to vector<32x8xf32>
    %204 = vector.shape_cast %203 : vector<32x8xf32> to vector<2x16x8xf32>
    %205 = vector.extract_strided_slice %202 {offsets = [0, 32], sizes = [32, 8], strides = [1, 1]} : vector<32x96xf32> to vector<32x8xf32>
    %206 = vector.shape_cast %205 : vector<32x8xf32> to vector<2x16x8xf32>
    %207 = vector.extract_strided_slice %202 {offsets = [0, 64], sizes = [32, 8], strides = [1, 1]} : vector<32x96xf32> to vector<32x8xf32>
    %208 = vector.shape_cast %207 : vector<32x8xf32> to vector<2x16x8xf32>
    %209 = arith.truncf %204 : vector<2x16x8xf32> to vector<2x16x8xbf16>
    %210 = arith.truncf %206 : vector<2x16x8xf32> to vector<2x16x8xbf16>
    "tpu.trace_start"() <{level = 10 : i32, message = "bqd,bkd->bqk"}> : () -> ()
    %cst_63 = arith.constant dense<0.000000e+00> : vector<2x16x16xf32>
    %211 = tpu.matmul %209, %210, %cst_63 {dimension_numbers = #tpu.dot_dimension_numbers<[2], [2], [1], [1], [0, 0, 0, 1, 1, 1], [0], [0]>} : vector<2x16x8xbf16>, vector<2x16x8xbf16>, vector<2x16x16xf32> -> vector<2x16x16xf32>
    "tpu.trace_stop"() : () -> ()
    %cst_64 = arith.constant dense<0xFF800000> : vector<2x16xf32>
    %212 = vector.multi_reduction <maximumf>, %211, %cst_64 [2] : vector<2x16x16xf32> to vector<2x16xf32>
    %213 = vector.shape_cast %212 : vector<2x16xf32> to vector<2x16x1xf32>
    %214 = vector.broadcast %213 : vector<2x16x1xf32> to vector<2x16x16xf32>
    %215 = arith.subf %211, %214 : vector<2x16x16xf32>
    %216 = math.exp %215 : vector<2x16x16xf32>
    %cst_65 = arith.constant dense<0.000000e+00> : vector<2x16xf32>
    %217 = vector.multi_reduction <add>, %216, %cst_65 [2] : vector<2x16x16xf32> to vector<2x16xf32>
    %218 = vector.shape_cast %217 : vector<2x16xf32> to vector<2x16x1xf32>
    %219 = tpu.reciprocal %218 {approx = true} : vector<2x16x1xf32> -> vector<2x16x1xf32>
    %220 = vector.broadcast %219 : vector<2x16x1xf32> to vector<2x16x16xf32>
    %221 = arith.mulf %216, %220 : vector<2x16x16xf32>
    %222 = arith.truncf %221 : vector<2x16x16xf32> to vector<2x16x16xbf16>
    %223 = arith.truncf %208 : vector<2x16x8xf32> to vector<2x16x8xbf16>
    "tpu.trace_start"() <{level = 10 : i32, message = "bqk,bkd->bqd"}> : () -> ()
    %cst_66 = arith.constant dense<0.000000e+00> : vector<2x16x8xf32>
    %224 = tpu.matmul %222, %223, %cst_66 {dimension_numbers = #tpu.dot_dimension_numbers<[2], [1], [1], [2], [0, 0, 0, 1, 1, 2], [0], [0]>} : vector<2x16x16xbf16>, vector<2x16x8xbf16>, vector<2x16x8xf32> -> vector<2x16x8xf32>
    "tpu.trace_stop"() : () -> ()
    %225 = vector.extract_strided_slice %202 {offsets = [0, 8], sizes = [32, 8], strides = [1, 1]} : vector<32x96xf32> to vector<32x8xf32>
    %226 = vector.shape_cast %225 : vector<32x8xf32> to vector<2x16x8xf32>
    %227 = vector.extract_strided_slice %202 {offsets = [0, 40], sizes = [32, 8], strides = [1, 1]} : vector<32x96xf32> to vector<32x8xf32>
    %228 = vector.shape_cast %227 : vector<32x8xf32> to vector<2x16x8xf32>
    %229 = vector.extract_strided_slice %202 {offsets = [0, 72], sizes = [32, 8], strides = [1, 1]} : vector<32x96xf32> to vector<32x8xf32>
    %230 = vector.shape_cast %229 : vector<32x8xf32> to vector<2x16x8xf32>
    %231 = arith.truncf %226 : vector<2x16x8xf32> to vector<2x16x8xbf16>
    %232 = arith.truncf %228 : vector<2x16x8xf32> to vector<2x16x8xbf16>
    "tpu.trace_start"() <{level = 10 : i32, message = "bqd,bkd->bqk"}> : () -> ()
    %cst_67 = arith.constant dense<0.000000e+00> : vector<2x16x16xf32>
    %233 = tpu.matmul %231, %232, %cst_67 {dimension_numbers = #tpu.dot_dimension_numbers<[2], [2], [1], [1], [0, 0, 0, 1, 1, 1], [0], [0]>} : vector<2x16x8xbf16>, vector<2x16x8xbf16>, vector<2x16x16xf32> -> vector<2x16x16xf32>
    "tpu.trace_stop"() : () -> ()
    %cst_68 = arith.constant dense<0xFF800000> : vector<2x16xf32>
    %234 = vector.multi_reduction <maximumf>, %233, %cst_68 [2] : vector<2x16x16xf32> to vector<2x16xf32>
    %235 = vector.shape_cast %234 : vector<2x16xf32> to vector<2x16x1xf32>
    %236 = vector.broadcast %235 : vector<2x16x1xf32> to vector<2x16x16xf32>
    %237 = arith.subf %233, %236 : vector<2x16x16xf32>
    %238 = math.exp %237 : vector<2x16x16xf32>
    %cst_69 = arith.constant dense<0.000000e+00> : vector<2x16xf32>
    %239 = vector.multi_reduction <add>, %238, %cst_69 [2] : vector<2x16x16xf32> to vector<2x16xf32>
    %240 = vector.shape_cast %239 : vector<2x16xf32> to vector<2x16x1xf32>
    %241 = tpu.reciprocal %240 {approx = true} : vector<2x16x1xf32> -> vector<2x16x1xf32>
    %242 = vector.broadcast %241 : vector<2x16x1xf32> to vector<2x16x16xf32>
    %243 = arith.mulf %238, %242 : vector<2x16x16xf32>
    %244 = arith.truncf %243 : vector<2x16x16xf32> to vector<2x16x16xbf16>
    %245 = arith.truncf %230 : vector<2x16x8xf32> to vector<2x16x8xbf16>
    "tpu.trace_start"() <{level = 10 : i32, message = "bqk,bkd->bqd"}> : () -> ()
    %cst_70 = arith.constant dense<0.000000e+00> : vector<2x16x8xf32>
    %246 = tpu.matmul %244, %245, %cst_70 {dimension_numbers = #tpu.dot_dimension_numbers<[2], [1], [1], [2], [0, 0, 0, 1, 1, 2], [0], [0]>} : vector<2x16x16xbf16>, vector<2x16x8xbf16>, vector<2x16x8xf32> -> vector<2x16x8xf32>
    "tpu.trace_stop"() : () -> ()
    %247 = vector.extract_strided_slice %202 {offsets = [0, 16], sizes = [32, 8], strides = [1, 1]} : vector<32x96xf32> to vector<32x8xf32>
    %248 = vector.shape_cast %247 : vector<32x8xf32> to vector<2x16x8xf32>
    %249 = vector.extract_strided_slice %202 {offsets = [0, 48], sizes = [32, 8], strides = [1, 1]} : vector<32x96xf32> to vector<32x8xf32>
    %250 = vector.shape_cast %249 : vector<32x8xf32> to vector<2x16x8xf32>
    %251 = vector.extract_strided_slice %202 {offsets = [0, 80], sizes = [32, 8], strides = [1, 1]} : vector<32x96xf32> to vector<32x8xf32>
    %252 = vector.shape_cast %251 : vector<32x8xf32> to vector<2x16x8xf32>
    %253 = arith.truncf %248 : vector<2x16x8xf32> to vector<2x16x8xbf16>
    %254 = arith.truncf %250 : vector<2x16x8xf32> to vector<2x16x8xbf16>
    "tpu.trace_start"() <{level = 10 : i32, message = "bqd,bkd->bqk"}> : () -> ()
    %cst_71 = arith.constant dense<0.000000e+00> : vector<2x16x16xf32>
    %255 = tpu.matmul %253, %254, %cst_71 {dimension_numbers = #tpu.dot_dimension_numbers<[2], [2], [1], [1], [0, 0, 0, 1, 1, 1], [0], [0]>} : vector<2x16x8xbf16>, vector<2x16x8xbf16>, vector<2x16x16xf32> -> vector<2x16x16xf32>
    "tpu.trace_stop"() : () -> ()
    %cst_72 = arith.constant dense<0xFF800000> : vector<2x16xf32>
    %256 = vector.multi_reduction <maximumf>, %255, %cst_72 [2] : vector<2x16x16xf32> to vector<2x16xf32>
    %257 = vector.shape_cast %256 : vector<2x16xf32> to vector<2x16x1xf32>
    %258 = vector.broadcast %257 : vector<2x16x1xf32> to vector<2x16x16xf32>
    %259 = arith.subf %255, %258 : vector<2x16x16xf32>
    %260 = math.exp %259 : vector<2x16x16xf32>
    %cst_73 = arith.constant dense<0.000000e+00> : vector<2x16xf32>
    %261 = vector.multi_reduction <add>, %260, %cst_73 [2] : vector<2x16x16xf32> to vector<2x16xf32>
    %262 = vector.shape_cast %261 : vector<2x16xf32> to vector<2x16x1xf32>
    %263 = tpu.reciprocal %262 {approx = true} : vector<2x16x1xf32> -> vector<2x16x1xf32>
    %264 = vector.broadcast %263 : vector<2x16x1xf32> to vector<2x16x16xf32>
    %265 = arith.mulf %260, %264 : vector<2x16x16xf32>
    %266 = arith.truncf %265 : vector<2x16x16xf32> to vector<2x16x16xbf16>
    %267 = arith.truncf %252 : vector<2x16x8xf32> to vector<2x16x8xbf16>
    "tpu.trace_start"() <{level = 10 : i32, message = "bqk,bkd->bqd"}> : () -> ()
    %cst_74 = arith.constant dense<0.000000e+00> : vector<2x16x8xf32>
    %268 = tpu.matmul %266, %267, %cst_74 {dimension_numbers = #tpu.dot_dimension_numbers<[2], [1], [1], [2], [0, 0, 0, 1, 1, 2], [0], [0]>} : vector<2x16x16xbf16>, vector<2x16x8xbf16>, vector<2x16x8xf32> -> vector<2x16x8xf32>
    "tpu.trace_stop"() : () -> ()
    %269 = vector.extract_strided_slice %202 {offsets = [0, 24], sizes = [32, 8], strides = [1, 1]} : vector<32x96xf32> to vector<32x8xf32>
    %270 = vector.shape_cast %269 : vector<32x8xf32> to vector<2x16x8xf32>
    %271 = vector.extract_strided_slice %202 {offsets = [0, 56], sizes = [32, 8], strides = [1, 1]} : vector<32x96xf32> to vector<32x8xf32>
    %272 = vector.shape_cast %271 : vector<32x8xf32> to vector<2x16x8xf32>
    %273 = vector.extract_strided_slice %202 {offsets = [0, 88], sizes = [32, 8], strides = [1, 1]} : vector<32x96xf32> to vector<32x8xf32>
    %274 = vector.shape_cast %273 : vector<32x8xf32> to vector<2x16x8xf32>
    %275 = arith.truncf %270 : vector<2x16x8xf32> to vector<2x16x8xbf16>
    %276 = arith.truncf %272 : vector<2x16x8xf32> to vector<2x16x8xbf16>
    "tpu.trace_start"() <{level = 10 : i32, message = "bqd,bkd->bqk"}> : () -> ()
    %cst_75 = arith.constant dense<0.000000e+00> : vector<2x16x16xf32>
    %277 = tpu.matmul %275, %276, %cst_75 {dimension_numbers = #tpu.dot_dimension_numbers<[2], [2], [1], [1], [0, 0, 0, 1, 1, 1], [0], [0]>} : vector<2x16x8xbf16>, vector<2x16x8xbf16>, vector<2x16x16xf32> -> vector<2x16x16xf32>
    "tpu.trace_stop"() : () -> ()
    %cst_76 = arith.constant dense<0xFF800000> : vector<2x16xf32>
    %278 = vector.multi_reduction <maximumf>, %277, %cst_76 [2] : vector<2x16x16xf32> to vector<2x16xf32>
    %279 = vector.shape_cast %278 : vector<2x16xf32> to vector<2x16x1xf32>
    %280 = vector.broadcast %279 : vector<2x16x1xf32> to vector<2x16x16xf32>
    %281 = arith.subf %277, %280 : vector<2x16x16xf32>
    %282 = math.exp %281 : vector<2x16x16xf32>
    %cst_77 = arith.constant dense<0.000000e+00> : vector<2x16xf32>
    %283 = vector.multi_reduction <add>, %282, %cst_77 [2] : vector<2x16x16xf32> to vector<2x16xf32>
    %284 = vector.shape_cast %283 : vector<2x16xf32> to vector<2x16x1xf32>
    %285 = tpu.reciprocal %284 {approx = true} : vector<2x16x1xf32> -> vector<2x16x1xf32>
    %286 = vector.broadcast %285 : vector<2x16x1xf32> to vector<2x16x16xf32>
    %287 = arith.mulf %282, %286 : vector<2x16x16xf32>
    %288 = arith.truncf %287 : vector<2x16x16xf32> to vector<2x16x16xbf16>
    %289 = arith.truncf %274 : vector<2x16x8xf32> to vector<2x16x8xbf16>
    "tpu.trace_start"() <{level = 10 : i32, message = "bqk,bkd->bqd"}> : () -> ()
    %cst_78 = arith.constant dense<0.000000e+00> : vector<2x16x8xf32>
    %290 = tpu.matmul %288, %289, %cst_78 {dimension_numbers = #tpu.dot_dimension_numbers<[2], [1], [1], [2], [0, 0, 0, 1, 1, 2], [0], [0]>} : vector<2x16x16xbf16>, vector<2x16x8xbf16>, vector<2x16x8xf32> -> vector<2x16x8xf32>
    "tpu.trace_stop"() : () -> ()
    %291 = tpu.concatenate %224, %246, %268, %290 in 2 : vector<2x16x8xf32>, vector<2x16x8xf32>, vector<2x16x8xf32>, vector<2x16x8xf32> -> vector<2x16x32xf32>
    %292 = vector.shape_cast %291 : vector<2x16x32xf32> to vector<32x32xf32>
    %293 = arith.truncf %292 : vector<32x32xf32> to vector<32x32xbf16>
    %c1_79 = arith.constant 1 : index
    %c0_80 = arith.constant 0 : index
    %c0_81 = arith.constant 0 : index
    %294 = vector.load %arg6[%c1_79, %c0_80, %c0_81] : memref<4x32x32xbf16, #tpu.memory_space<vmem>>, vector<1x32x32xbf16>
    %295 = vector.shape_cast %294 : vector<1x32x32xbf16> to vector<32x32xbf16>
    %cst_82 = arith.constant dense<0.000000e+00> : vector<32x32xf32>
    %296 = tpu.matmul %293, %295, %cst_82 {dimension_numbers = #tpu.dot_dimension_numbers<[1], [0], [0], [1], [0, 0, 1, 1], [], []>} : vector<32x32xbf16>, vector<32x32xbf16>, vector<32x32xf32> -> vector<32x32xf32>
    %297 = arith.addf %186, %296 : vector<32x32xf32>
    %298 = vector.broadcast %190 : vector<1x32xf32> to vector<32x32xf32>
    %299 = arith.addf %297, %298 : vector<32x32xf32>
    %cst_83 = arith.constant dense<0.000000e+00> : vector<32xf32>
    %300 = vector.multi_reduction <add>, %299, %cst_83 [1] : vector<32x32xf32> to vector<32xf32>
    %301 = vector.shape_cast %300 : vector<32xf32> to vector<32x1xf32>
    %cst_84 = arith.constant 3.200000e+01 : f32
    %302 = vector.broadcast %cst_84 : f32 to vector<32x1xf32>
    %303 = arith.divf %301, %302 : vector<32x1xf32>
    %304 = vector.broadcast %303 : vector<32x1xf32> to vector<32x32xf32>
    %305 = arith.subf %299, %304 : vector<32x32xf32>
    %306 = arith.mulf %305, %305 : vector<32x32xf32>
    %cst_85 = arith.constant dense<0.000000e+00> : vector<32xf32>
    %307 = vector.multi_reduction <add>, %306, %cst_85 [1] : vector<32x32xf32> to vector<32xf32>
    %308 = vector.shape_cast %307 : vector<32xf32> to vector<32x1xf32>
    %cst_86 = arith.constant 3.200000e+01 : f32
    %309 = vector.broadcast %cst_86 : f32 to vector<32x1xf32>
    %310 = arith.divf %308, %309 : vector<32x1xf32>
    %311 = vector.broadcast %303 : vector<32x1xf32> to vector<32x32xf32>
    %312 = arith.subf %299, %311 : vector<32x32xf32>
    %cst_87 = arith.constant 9.99999974E-6 : f32
    %313 = vector.broadcast %cst_87 : f32 to vector<32x1xf32>
    %314 = arith.addf %310, %313 : vector<32x1xf32>
    %315 = math.rsqrt %314 : vector<32x1xf32>
    %316 = vector.broadcast %315 : vector<32x1xf32> to vector<32x32xf32>
    %317 = arith.mulf %312, %316 : vector<32x32xf32>
    %318 = vector.broadcast %193 : vector<1x32xf32> to vector<32x32xf32>
    %319 = arith.mulf %317, %318 : vector<32x32xf32>
    %320 = vector.broadcast %194 : vector<1x32xf32> to vector<32x32xf32>
    %321 = arith.addf %319, %320 : vector<32x32xf32>
    %322 = arith.truncf %321 : vector<32x32xf32> to vector<32x32xbf16>
    %c1_88 = arith.constant 1 : index
    %c0_89 = arith.constant 0 : index
    %c0_90 = arith.constant 0 : index
    %323 = vector.load %arg7[%c1_88, %c0_89, %c0_90] : memref<4x32x64xbf16, #tpu.memory_space<vmem>>, vector<1x32x64xbf16>
    %324 = vector.shape_cast %323 : vector<1x32x64xbf16> to vector<32x64xbf16>
    %cst_91 = arith.constant dense<0.000000e+00> : vector<32x64xf32>
    %325 = tpu.matmul %322, %324, %cst_91 {dimension_numbers = #tpu.dot_dimension_numbers<[1], [0], [0], [1], [0, 0, 1, 1], [], []>} : vector<32x32xbf16>, vector<32x64xbf16>, vector<32x64xf32> -> vector<32x64xf32>
    %326 = vector.broadcast %191 : vector<1x64xf32> to vector<32x64xf32>
    %327 = arith.addf %325, %326 : vector<32x64xf32>
    %cst_92 = arith.constant 0.000000e+00 : f32
    %328 = vector.broadcast %cst_92 : f32 to vector<32x64xf32>
    %329 = arith.maximumf %327, %328 : vector<32x64xf32>
    %330 = arith.truncf %329 : vector<32x64xf32> to vector<32x64xbf16>
    %c1_93 = arith.constant 1 : index
    %c0_94 = arith.constant 0 : index
    %c0_95 = arith.constant 0 : index
    %331 = vector.load %arg8[%c1_93, %c0_94, %c0_95] : memref<4x64x32xbf16, #tpu.memory_space<vmem>>, vector<1x64x32xbf16>
    %332 = vector.shape_cast %331 : vector<1x64x32xbf16> to vector<64x32xbf16>
    %cst_96 = arith.constant dense<0.000000e+00> : vector<32x32xf32>
    %333 = tpu.matmul %330, %332, %cst_96 {dimension_numbers = #tpu.dot_dimension_numbers<[1], [0], [0], [1], [0, 0, 1, 1], [], []>} : vector<32x64xbf16>, vector<64x32xbf16>, vector<32x32xf32> -> vector<32x32xf32>
    %334 = vector.broadcast %192 : vector<1x32xf32> to vector<32x32xf32>
    %335 = arith.addf %333, %334 : vector<32x32xf32>
    %336 = arith.addf %321, %335 : vector<32x32xf32>
    %cst_97 = arith.constant dense<0.000000e+00> : vector<32xf32>
    %337 = vector.multi_reduction <add>, %336, %cst_97 [1] : vector<32x32xf32> to vector<32xf32>
    %338 = vector.shape_cast %337 : vector<32xf32> to vector<32x1xf32>
    %cst_98 = arith.constant 3.200000e+01 : f32
    %339 = vector.broadcast %cst_98 : f32 to vector<32x1xf32>
    %340 = arith.divf %338, %339 : vector<32x1xf32>
    %341 = vector.broadcast %340 : vector<32x1xf32> to vector<32x32xf32>
    %342 = arith.subf %336, %341 : vector<32x32xf32>
    %343 = arith.mulf %342, %342 : vector<32x32xf32>
    %cst_99 = arith.constant dense<0.000000e+00> : vector<32xf32>
    %344 = vector.multi_reduction <add>, %343, %cst_99 [1] : vector<32x32xf32> to vector<32xf32>
    %345 = vector.shape_cast %344 : vector<32xf32> to vector<32x1xf32>
    %cst_100 = arith.constant 3.200000e+01 : f32
    %346 = vector.broadcast %cst_100 : f32 to vector<32x1xf32>
    %347 = arith.divf %345, %346 : vector<32x1xf32>
    %348 = vector.broadcast %340 : vector<32x1xf32> to vector<32x32xf32>
    %349 = arith.subf %336, %348 : vector<32x32xf32>
    %cst_101 = arith.constant 9.99999974E-6 : f32
    %350 = vector.broadcast %cst_101 : f32 to vector<32x1xf32>
    %351 = arith.addf %347, %350 : vector<32x1xf32>
    %352 = math.rsqrt %351 : vector<32x1xf32>
    %353 = vector.broadcast %352 : vector<32x1xf32> to vector<32x32xf32>
    %354 = arith.mulf %349, %353 : vector<32x32xf32>
    %355 = vector.broadcast %195 : vector<1x32xf32> to vector<32x32xf32>
    %356 = arith.mulf %354, %355 : vector<32x32xf32>
    %357 = vector.broadcast %196 : vector<1x32xf32> to vector<32x32xf32>
    %358 = arith.addf %356, %357 : vector<32x32xf32>
    %c2 = arith.constant 2 : index
    %c0_102 = arith.constant 0 : index
    %c0_103 = arith.constant 0 : index
    %359 = vector.load %arg9[%c2, %c0_102, %c0_103] : memref<4x8x96xf32, #tpu.memory_space<vmem>>, vector<1x8x96xf32>
    %360 = vector.shape_cast %359 : vector<1x8x96xf32> to vector<8x96xf32>
    %361 = vector.extract_strided_slice %360 {offsets = [0, 0], sizes = [1, 96], strides = [1, 1]} : vector<8x96xf32> to vector<1x96xf32>
    %362 = vector.extract_strided_slice %360 {offsets = [1, 0], sizes = [1, 32], strides = [1, 1]} : vector<8x96xf32> to vector<1x32xf32>
    %363 = vector.extract_strided_slice %360 {offsets = [2, 0], sizes = [1, 64], strides = [1, 1]} : vector<8x96xf32> to vector<1x64xf32>
    %364 = vector.extract_strided_slice %360 {offsets = [3, 0], sizes = [1, 32], strides = [1, 1]} : vector<8x96xf32> to vector<1x32xf32>
    %365 = vector.extract_strided_slice %360 {offsets = [4, 0], sizes = [1, 32], strides = [1, 1]} : vector<8x96xf32> to vector<1x32xf32>
    %366 = vector.extract_strided_slice %360 {offsets = [5, 0], sizes = [1, 32], strides = [1, 1]} : vector<8x96xf32> to vector<1x32xf32>
    %367 = vector.extract_strided_slice %360 {offsets = [6, 0], sizes = [1, 32], strides = [1, 1]} : vector<8x96xf32> to vector<1x32xf32>
    %368 = vector.extract_strided_slice %360 {offsets = [7, 0], sizes = [1, 32], strides = [1, 1]} : vector<8x96xf32> to vector<1x32xf32>
    %369 = arith.truncf %14 : vector<16x32xf32> to vector<16x32xbf16>
    %c2_104 = arith.constant 2 : index
    %c0_105 = arith.constant 0 : index
    %c0_106 = arith.constant 0 : index
    %370 = vector.load %arg5[%c2_104, %c0_105, %c0_106] : memref<4x32x96xbf16, #tpu.memory_space<vmem>>, vector<1x32x96xbf16>
    %371 = vector.shape_cast %370 : vector<1x32x96xbf16> to vector<32x96xbf16>
    %cst_107 = arith.constant dense<0.000000e+00> : vector<16x96xf32>
    %372 = tpu.matmul %369, %371, %cst_107 {dimension_numbers = #tpu.dot_dimension_numbers<[1], [0], [0], [1], [0, 0, 1, 1], [], []>} : vector<16x32xbf16>, vector<32x96xbf16>, vector<16x96xf32> -> vector<16x96xf32>
    %373 = vector.broadcast %361 : vector<1x96xf32> to vector<16x96xf32>
    %374 = arith.addf %372, %373 : vector<16x96xf32>
    %375 = vector.extract_strided_slice %374 {offsets = [0, 0], sizes = [16, 8], strides = [1, 1]} : vector<16x96xf32> to vector<16x8xf32>
    %376 = vector.shape_cast %375 : vector<16x8xf32> to vector<2x8x8xf32>
    %377 = vector.extract_strided_slice %374 {offsets = [0, 32], sizes = [16, 8], strides = [1, 1]} : vector<16x96xf32> to vector<16x8xf32>
    %378 = vector.shape_cast %377 : vector<16x8xf32> to vector<2x8x8xf32>
    %379 = vector.extract_strided_slice %374 {offsets = [0, 64], sizes = [16, 8], strides = [1, 1]} : vector<16x96xf32> to vector<16x8xf32>
    %380 = vector.shape_cast %379 : vector<16x8xf32> to vector<2x8x8xf32>
    %381 = arith.truncf %376 : vector<2x8x8xf32> to vector<2x8x8xbf16>
    %382 = arith.truncf %378 : vector<2x8x8xf32> to vector<2x8x8xbf16>
    "tpu.trace_start"() <{level = 10 : i32, message = "bqd,bkd->bqk"}> : () -> ()
    %cst_108 = arith.constant dense<0.000000e+00> : vector<2x8x8xf32>
    %383 = tpu.matmul %381, %382, %cst_108 {dimension_numbers = #tpu.dot_dimension_numbers<[2], [2], [1], [1], [0, 0, 0, 1, 1, 1], [0], [0]>} : vector<2x8x8xbf16>, vector<2x8x8xbf16>, vector<2x8x8xf32> -> vector<2x8x8xf32>
    "tpu.trace_stop"() : () -> ()
    %cst_109 = arith.constant dense<0xFF800000> : vector<2x8xf32>
    %384 = vector.multi_reduction <maximumf>, %383, %cst_109 [2] : vector<2x8x8xf32> to vector<2x8xf32>
    %385 = vector.shape_cast %384 : vector<2x8xf32> to vector<2x8x1xf32>
    %386 = vector.broadcast %385 : vector<2x8x1xf32> to vector<2x8x8xf32>
    %387 = arith.subf %383, %386 : vector<2x8x8xf32>
    %388 = math.exp %387 : vector<2x8x8xf32>
    %cst_110 = arith.constant dense<0.000000e+00> : vector<2x8xf32>
    %389 = vector.multi_reduction <add>, %388, %cst_110 [2] : vector<2x8x8xf32> to vector<2x8xf32>
    %390 = vector.shape_cast %389 : vector<2x8xf32> to vector<2x8x1xf32>
    %391 = tpu.reciprocal %390 {approx = true} : vector<2x8x1xf32> -> vector<2x8x1xf32>
    %392 = vector.broadcast %391 : vector<2x8x1xf32> to vector<2x8x8xf32>
    %393 = arith.mulf %388, %392 : vector<2x8x8xf32>
    %394 = arith.truncf %393 : vector<2x8x8xf32> to vector<2x8x8xbf16>
    %395 = arith.truncf %380 : vector<2x8x8xf32> to vector<2x8x8xbf16>
    "tpu.trace_start"() <{level = 10 : i32, message = "bqk,bkd->bqd"}> : () -> ()
    %cst_111 = arith.constant dense<0.000000e+00> : vector<2x8x8xf32>
    %396 = tpu.matmul %394, %395, %cst_111 {dimension_numbers = #tpu.dot_dimension_numbers<[2], [1], [1], [2], [0, 0, 0, 1, 1, 2], [0], [0]>} : vector<2x8x8xbf16>, vector<2x8x8xbf16>, vector<2x8x8xf32> -> vector<2x8x8xf32>
    "tpu.trace_stop"() : () -> ()
    %397 = vector.extract_strided_slice %374 {offsets = [0, 8], sizes = [16, 8], strides = [1, 1]} : vector<16x96xf32> to vector<16x8xf32>
    %398 = vector.shape_cast %397 : vector<16x8xf32> to vector<2x8x8xf32>
    %399 = vector.extract_strided_slice %374 {offsets = [0, 40], sizes = [16, 8], strides = [1, 1]} : vector<16x96xf32> to vector<16x8xf32>
    %400 = vector.shape_cast %399 : vector<16x8xf32> to vector<2x8x8xf32>
    %401 = vector.extract_strided_slice %374 {offsets = [0, 72], sizes = [16, 8], strides = [1, 1]} : vector<16x96xf32> to vector<16x8xf32>
    %402 = vector.shape_cast %401 : vector<16x8xf32> to vector<2x8x8xf32>
    %403 = arith.truncf %398 : vector<2x8x8xf32> to vector<2x8x8xbf16>
    %404 = arith.truncf %400 : vector<2x8x8xf32> to vector<2x8x8xbf16>
    "tpu.trace_start"() <{level = 10 : i32, message = "bqd,bkd->bqk"}> : () -> ()
    %cst_112 = arith.constant dense<0.000000e+00> : vector<2x8x8xf32>
    %405 = tpu.matmul %403, %404, %cst_112 {dimension_numbers = #tpu.dot_dimension_numbers<[2], [2], [1], [1], [0, 0, 0, 1, 1, 1], [0], [0]>} : vector<2x8x8xbf16>, vector<2x8x8xbf16>, vector<2x8x8xf32> -> vector<2x8x8xf32>
    "tpu.trace_stop"() : () -> ()
    %cst_113 = arith.constant dense<0xFF800000> : vector<2x8xf32>
    %406 = vector.multi_reduction <maximumf>, %405, %cst_113 [2] : vector<2x8x8xf32> to vector<2x8xf32>
    %407 = vector.shape_cast %406 : vector<2x8xf32> to vector<2x8x1xf32>
    %408 = vector.broadcast %407 : vector<2x8x1xf32> to vector<2x8x8xf32>
    %409 = arith.subf %405, %408 : vector<2x8x8xf32>
    %410 = math.exp %409 : vector<2x8x8xf32>
    %cst_114 = arith.constant dense<0.000000e+00> : vector<2x8xf32>
    %411 = vector.multi_reduction <add>, %410, %cst_114 [2] : vector<2x8x8xf32> to vector<2x8xf32>
    %412 = vector.shape_cast %411 : vector<2x8xf32> to vector<2x8x1xf32>
    %413 = tpu.reciprocal %412 {approx = true} : vector<2x8x1xf32> -> vector<2x8x1xf32>
    %414 = vector.broadcast %413 : vector<2x8x1xf32> to vector<2x8x8xf32>
    %415 = arith.mulf %410, %414 : vector<2x8x8xf32>
    %416 = arith.truncf %415 : vector<2x8x8xf32> to vector<2x8x8xbf16>
    %417 = arith.truncf %402 : vector<2x8x8xf32> to vector<2x8x8xbf16>
    "tpu.trace_start"() <{level = 10 : i32, message = "bqk,bkd->bqd"}> : () -> ()
    %cst_115 = arith.constant dense<0.000000e+00> : vector<2x8x8xf32>
    %418 = tpu.matmul %416, %417, %cst_115 {dimension_numbers = #tpu.dot_dimension_numbers<[2], [1], [1], [2], [0, 0, 0, 1, 1, 2], [0], [0]>} : vector<2x8x8xbf16>, vector<2x8x8xbf16>, vector<2x8x8xf32> -> vector<2x8x8xf32>
    "tpu.trace_stop"() : () -> ()
    %419 = vector.extract_strided_slice %374 {offsets = [0, 16], sizes = [16, 8], strides = [1, 1]} : vector<16x96xf32> to vector<16x8xf32>
    %420 = vector.shape_cast %419 : vector<16x8xf32> to vector<2x8x8xf32>
    %421 = vector.extract_strided_slice %374 {offsets = [0, 48], sizes = [16, 8], strides = [1, 1]} : vector<16x96xf32> to vector<16x8xf32>
    %422 = vector.shape_cast %421 : vector<16x8xf32> to vector<2x8x8xf32>
    %423 = vector.extract_strided_slice %374 {offsets = [0, 80], sizes = [16, 8], strides = [1, 1]} : vector<16x96xf32> to vector<16x8xf32>
    %424 = vector.shape_cast %423 : vector<16x8xf32> to vector<2x8x8xf32>
    %425 = arith.truncf %420 : vector<2x8x8xf32> to vector<2x8x8xbf16>
    %426 = arith.truncf %422 : vector<2x8x8xf32> to vector<2x8x8xbf16>
    "tpu.trace_start"() <{level = 10 : i32, message = "bqd,bkd->bqk"}> : () -> ()
    %cst_116 = arith.constant dense<0.000000e+00> : vector<2x8x8xf32>
    %427 = tpu.matmul %425, %426, %cst_116 {dimension_numbers = #tpu.dot_dimension_numbers<[2], [2], [1], [1], [0, 0, 0, 1, 1, 1], [0], [0]>} : vector<2x8x8xbf16>, vector<2x8x8xbf16>, vector<2x8x8xf32> -> vector<2x8x8xf32>
    "tpu.trace_stop"() : () -> ()
    %cst_117 = arith.constant dense<0xFF800000> : vector<2x8xf32>
    %428 = vector.multi_reduction <maximumf>, %427, %cst_117 [2] : vector<2x8x8xf32> to vector<2x8xf32>
    %429 = vector.shape_cast %428 : vector<2x8xf32> to vector<2x8x1xf32>
    %430 = vector.broadcast %429 : vector<2x8x1xf32> to vector<2x8x8xf32>
    %431 = arith.subf %427, %430 : vector<2x8x8xf32>
    %432 = math.exp %431 : vector<2x8x8xf32>
    %cst_118 = arith.constant dense<0.000000e+00> : vector<2x8xf32>
    %433 = vector.multi_reduction <add>, %432, %cst_118 [2] : vector<2x8x8xf32> to vector<2x8xf32>
    %434 = vector.shape_cast %433 : vector<2x8xf32> to vector<2x8x1xf32>
    %435 = tpu.reciprocal %434 {approx = true} : vector<2x8x1xf32> -> vector<2x8x1xf32>
    %436 = vector.broadcast %435 : vector<2x8x1xf32> to vector<2x8x8xf32>
    %437 = arith.mulf %432, %436 : vector<2x8x8xf32>
    %438 = arith.truncf %437 : vector<2x8x8xf32> to vector<2x8x8xbf16>
    %439 = arith.truncf %424 : vector<2x8x8xf32> to vector<2x8x8xbf16>
    "tpu.trace_start"() <{level = 10 : i32, message = "bqk,bkd->bqd"}> : () -> ()
    %cst_119 = arith.constant dense<0.000000e+00> : vector<2x8x8xf32>
    %440 = tpu.matmul %438, %439, %cst_119 {dimension_numbers = #tpu.dot_dimension_numbers<[2], [1], [1], [2], [0, 0, 0, 1, 1, 2], [0], [0]>} : vector<2x8x8xbf16>, vector<2x8x8xbf16>, vector<2x8x8xf32> -> vector<2x8x8xf32>
    "tpu.trace_stop"() : () -> ()
    %441 = vector.extract_strided_slice %374 {offsets = [0, 24], sizes = [16, 8], strides = [1, 1]} : vector<16x96xf32> to vector<16x8xf32>
    %442 = vector.shape_cast %441 : vector<16x8xf32> to vector<2x8x8xf32>
    %443 = vector.extract_strided_slice %374 {offsets = [0, 56], sizes = [16, 8], strides = [1, 1]} : vector<16x96xf32> to vector<16x8xf32>
    %444 = vector.shape_cast %443 : vector<16x8xf32> to vector<2x8x8xf32>
    %445 = vector.extract_strided_slice %374 {offsets = [0, 88], sizes = [16, 8], strides = [1, 1]} : vector<16x96xf32> to vector<16x8xf32>
    %446 = vector.shape_cast %445 : vector<16x8xf32> to vector<2x8x8xf32>
    %447 = arith.truncf %442 : vector<2x8x8xf32> to vector<2x8x8xbf16>
    %448 = arith.truncf %444 : vector<2x8x8xf32> to vector<2x8x8xbf16>
    "tpu.trace_start"() <{level = 10 : i32, message = "bqd,bkd->bqk"}> : () -> ()
    %cst_120 = arith.constant dense<0.000000e+00> : vector<2x8x8xf32>
    %449 = tpu.matmul %447, %448, %cst_120 {dimension_numbers = #tpu.dot_dimension_numbers<[2], [2], [1], [1], [0, 0, 0, 1, 1, 1], [0], [0]>} : vector<2x8x8xbf16>, vector<2x8x8xbf16>, vector<2x8x8xf32> -> vector<2x8x8xf32>
    "tpu.trace_stop"() : () -> ()
    %cst_121 = arith.constant dense<0xFF800000> : vector<2x8xf32>
    %450 = vector.multi_reduction <maximumf>, %449, %cst_121 [2] : vector<2x8x8xf32> to vector<2x8xf32>
    %451 = vector.shape_cast %450 : vector<2x8xf32> to vector<2x8x1xf32>
    %452 = vector.broadcast %451 : vector<2x8x1xf32> to vector<2x8x8xf32>
    %453 = arith.subf %449, %452 : vector<2x8x8xf32>
    %454 = math.exp %453 : vector<2x8x8xf32>
    %cst_122 = arith.constant dense<0.000000e+00> : vector<2x8xf32>
    %455 = vector.multi_reduction <add>, %454, %cst_122 [2] : vector<2x8x8xf32> to vector<2x8xf32>
    %456 = vector.shape_cast %455 : vector<2x8xf32> to vector<2x8x1xf32>
    %457 = tpu.reciprocal %456 {approx = true} : vector<2x8x1xf32> -> vector<2x8x1xf32>
    %458 = vector.broadcast %457 : vector<2x8x1xf32> to vector<2x8x8xf32>
    %459 = arith.mulf %454, %458 : vector<2x8x8xf32>
    %460 = arith.truncf %459 : vector<2x8x8xf32> to vector<2x8x8xbf16>
    %461 = arith.truncf %446 : vector<2x8x8xf32> to vector<2x8x8xbf16>
    "tpu.trace_start"() <{level = 10 : i32, message = "bqk,bkd->bqd"}> : () -> ()
    %cst_123 = arith.constant dense<0.000000e+00> : vector<2x8x8xf32>
    %462 = tpu.matmul %460, %461, %cst_123 {dimension_numbers = #tpu.dot_dimension_numbers<[2], [1], [1], [2], [0, 0, 0, 1, 1, 2], [0], [0]>} : vector<2x8x8xbf16>, vector<2x8x8xbf16>, vector<2x8x8xf32> -> vector<2x8x8xf32>
    "tpu.trace_stop"() : () -> ()
    %463 = tpu.concatenate %396, %418, %440, %462 in 2 : vector<2x8x8xf32>, vector<2x8x8xf32>, vector<2x8x8xf32>, vector<2x8x8xf32> -> vector<2x8x32xf32>
    %464 = vector.shape_cast %463 : vector<2x8x32xf32> to vector<16x32xf32>
    %465 = arith.truncf %464 : vector<16x32xf32> to vector<16x32xbf16>
    %c2_124 = arith.constant 2 : index
    %c0_125 = arith.constant 0 : index
    %c0_126 = arith.constant 0 : index
    %466 = vector.load %arg6[%c2_124, %c0_125, %c0_126] : memref<4x32x32xbf16, #tpu.memory_space<vmem>>, vector<1x32x32xbf16>
    %467 = vector.shape_cast %466 : vector<1x32x32xbf16> to vector<32x32xbf16>
    %cst_127 = arith.constant dense<0.000000e+00> : vector<16x32xf32>
    %468 = tpu.matmul %465, %467, %cst_127 {dimension_numbers = #tpu.dot_dimension_numbers<[1], [0], [0], [1], [0, 0, 1, 1], [], []>} : vector<16x32xbf16>, vector<32x32xbf16>, vector<16x32xf32> -> vector<16x32xf32>
    %469 = arith.addf %14, %468 : vector<16x32xf32>
    %470 = vector.broadcast %362 : vector<1x32xf32> to vector<16x32xf32>
    %471 = arith.addf %469, %470 : vector<16x32xf32>
    %cst_128 = arith.constant dense<0.000000e+00> : vector<16xf32>
    %472 = vector.multi_reduction <add>, %471, %cst_128 [1] : vector<16x32xf32> to vector<16xf32>
    %473 = vector.shape_cast %472 : vector<16xf32> to vector<16x1xf32>
    %cst_129 = arith.constant 3.200000e+01 : f32
    %474 = vector.broadcast %cst_129 : f32 to vector<16x1xf32>
    %475 = arith.divf %473, %474 : vector<16x1xf32>
    %476 = vector.broadcast %475 : vector<16x1xf32> to vector<16x32xf32>
    %477 = arith.subf %471, %476 : vector<16x32xf32>
    %478 = arith.mulf %477, %477 : vector<16x32xf32>
    %cst_130 = arith.constant dense<0.000000e+00> : vector<16xf32>
    %479 = vector.multi_reduction <add>, %478, %cst_130 [1] : vector<16x32xf32> to vector<16xf32>
    %480 = vector.shape_cast %479 : vector<16xf32> to vector<16x1xf32>
    %cst_131 = arith.constant 3.200000e+01 : f32
    %481 = vector.broadcast %cst_131 : f32 to vector<16x1xf32>
    %482 = arith.divf %480, %481 : vector<16x1xf32>
    %483 = vector.broadcast %475 : vector<16x1xf32> to vector<16x32xf32>
    %484 = arith.subf %471, %483 : vector<16x32xf32>
    %cst_132 = arith.constant 9.99999974E-6 : f32
    %485 = vector.broadcast %cst_132 : f32 to vector<16x1xf32>
    %486 = arith.addf %482, %485 : vector<16x1xf32>
    %487 = math.rsqrt %486 : vector<16x1xf32>
    %488 = vector.broadcast %487 : vector<16x1xf32> to vector<16x32xf32>
    %489 = arith.mulf %484, %488 : vector<16x32xf32>
    %490 = vector.broadcast %365 : vector<1x32xf32> to vector<16x32xf32>
    %491 = arith.mulf %489, %490 : vector<16x32xf32>
    %492 = vector.broadcast %366 : vector<1x32xf32> to vector<16x32xf32>
    %493 = arith.addf %491, %492 : vector<16x32xf32>
    %494 = arith.truncf %493 : vector<16x32xf32> to vector<16x32xbf16>
    %c2_133 = arith.constant 2 : index
    %c0_134 = arith.constant 0 : index
    %c0_135 = arith.constant 0 : index
    %495 = vector.load %arg7[%c2_133, %c0_134, %c0_135] : memref<4x32x64xbf16, #tpu.memory_space<vmem>>, vector<1x32x64xbf16>
    %496 = vector.shape_cast %495 : vector<1x32x64xbf16> to vector<32x64xbf16>
    %cst_136 = arith.constant dense<0.000000e+00> : vector<16x64xf32>
    %497 = tpu.matmul %494, %496, %cst_136 {dimension_numbers = #tpu.dot_dimension_numbers<[1], [0], [0], [1], [0, 0, 1, 1], [], []>} : vector<16x32xbf16>, vector<32x64xbf16>, vector<16x64xf32> -> vector<16x64xf32>
    %498 = vector.broadcast %363 : vector<1x64xf32> to vector<16x64xf32>
    %499 = arith.addf %497, %498 : vector<16x64xf32>
    %cst_137 = arith.constant 0.000000e+00 : f32
    %500 = vector.broadcast %cst_137 : f32 to vector<16x64xf32>
    %501 = arith.maximumf %499, %500 : vector<16x64xf32>
    %502 = arith.truncf %501 : vector<16x64xf32> to vector<16x64xbf16>
    %c2_138 = arith.constant 2 : index
    %c0_139 = arith.constant 0 : index
    %c0_140 = arith.constant 0 : index
    %503 = vector.load %arg8[%c2_138, %c0_139, %c0_140] : memref<4x64x32xbf16, #tpu.memory_space<vmem>>, vector<1x64x32xbf16>
    %504 = vector.shape_cast %503 : vector<1x64x32xbf16> to vector<64x32xbf16>
    %cst_141 = arith.constant dense<0.000000e+00> : vector<16x32xf32>
    %505 = tpu.matmul %502, %504, %cst_141 {dimension_numbers = #tpu.dot_dimension_numbers<[1], [0], [0], [1], [0, 0, 1, 1], [], []>} : vector<16x64xbf16>, vector<64x32xbf16>, vector<16x32xf32> -> vector<16x32xf32>
    %506 = vector.broadcast %364 : vector<1x32xf32> to vector<16x32xf32>
    %507 = arith.addf %505, %506 : vector<16x32xf32>
    %508 = arith.addf %493, %507 : vector<16x32xf32>
    %cst_142 = arith.constant dense<0.000000e+00> : vector<16xf32>
    %509 = vector.multi_reduction <add>, %508, %cst_142 [1] : vector<16x32xf32> to vector<16xf32>
    %510 = vector.shape_cast %509 : vector<16xf32> to vector<16x1xf32>
    %cst_143 = arith.constant 3.200000e+01 : f32
    %511 = vector.broadcast %cst_143 : f32 to vector<16x1xf32>
    %512 = arith.divf %510, %511 : vector<16x1xf32>
    %513 = vector.broadcast %512 : vector<16x1xf32> to vector<16x32xf32>
    %514 = arith.subf %508, %513 : vector<16x32xf32>
    %515 = arith.mulf %514, %514 : vector<16x32xf32>
    %cst_144 = arith.constant dense<0.000000e+00> : vector<16xf32>
    %516 = vector.multi_reduction <add>, %515, %cst_144 [1] : vector<16x32xf32> to vector<16xf32>
    %517 = vector.shape_cast %516 : vector<16xf32> to vector<16x1xf32>
    %cst_145 = arith.constant 3.200000e+01 : f32
    %518 = vector.broadcast %cst_145 : f32 to vector<16x1xf32>
    %519 = arith.divf %517, %518 : vector<16x1xf32>
    %520 = vector.broadcast %512 : vector<16x1xf32> to vector<16x32xf32>
    %521 = arith.subf %508, %520 : vector<16x32xf32>
    %cst_146 = arith.constant 9.99999974E-6 : f32
    %522 = vector.broadcast %cst_146 : f32 to vector<16x1xf32>
    %523 = arith.addf %519, %522 : vector<16x1xf32>
    %524 = math.rsqrt %523 : vector<16x1xf32>
    %525 = vector.broadcast %524 : vector<16x1xf32> to vector<16x32xf32>
    %526 = arith.mulf %521, %525 : vector<16x32xf32>
    %527 = vector.broadcast %367 : vector<1x32xf32> to vector<16x32xf32>
    %528 = arith.mulf %526, %527 : vector<16x32xf32>
    %529 = vector.broadcast %368 : vector<1x32xf32> to vector<16x32xf32>
    %530 = arith.addf %528, %529 : vector<16x32xf32>
    %c3 = arith.constant 3 : index
    %c0_147 = arith.constant 0 : index
    %c0_148 = arith.constant 0 : index
    %531 = vector.load %arg9[%c3, %c0_147, %c0_148] : memref<4x8x96xf32, #tpu.memory_space<vmem>>, vector<1x8x96xf32>
    %532 = vector.shape_cast %531 : vector<1x8x96xf32> to vector<8x96xf32>
    %533 = vector.extract_strided_slice %532 {offsets = [0, 0], sizes = [1, 96], strides = [1, 1]} : vector<8x96xf32> to vector<1x96xf32>
    %534 = vector.extract_strided_slice %532 {offsets = [1, 0], sizes = [1, 32], strides = [1, 1]} : vector<8x96xf32> to vector<1x32xf32>
    %535 = vector.extract_strided_slice %532 {offsets = [2, 0], sizes = [1, 64], strides = [1, 1]} : vector<8x96xf32> to vector<1x64xf32>
    %536 = vector.extract_strided_slice %532 {offsets = [3, 0], sizes = [1, 32], strides = [1, 1]} : vector<8x96xf32> to vector<1x32xf32>
    %537 = vector.extract_strided_slice %532 {offsets = [4, 0], sizes = [1, 32], strides = [1, 1]} : vector<8x96xf32> to vector<1x32xf32>
    %538 = vector.extract_strided_slice %532 {offsets = [5, 0], sizes = [1, 32], strides = [1, 1]} : vector<8x96xf32> to vector<1x32xf32>
    %539 = vector.extract_strided_slice %532 {offsets = [6, 0], sizes = [1, 32], strides = [1, 1]} : vector<8x96xf32> to vector<1x32xf32>
    %540 = vector.extract_strided_slice %532 {offsets = [7, 0], sizes = [1, 32], strides = [1, 1]} : vector<8x96xf32> to vector<1x32xf32>
    %541 = arith.truncf %530 : vector<16x32xf32> to vector<16x32xbf16>
    %c3_149 = arith.constant 3 : index
    %c0_150 = arith.constant 0 : index
    %c0_151 = arith.constant 0 : index
    %542 = vector.load %arg5[%c3_149, %c0_150, %c0_151] : memref<4x32x96xbf16, #tpu.memory_space<vmem>>, vector<1x32x96xbf16>
    %543 = vector.shape_cast %542 : vector<1x32x96xbf16> to vector<32x96xbf16>
    %cst_152 = arith.constant dense<0.000000e+00> : vector<16x96xf32>
    %544 = tpu.matmul %541, %543, %cst_152 {dimension_numbers = #tpu.dot_dimension_numbers<[1], [0], [0], [1], [0, 0, 1, 1], [], []>} : vector<16x32xbf16>, vector<32x96xbf16>, vector<16x96xf32> -> vector<16x96xf32>
    %545 = vector.broadcast %533 : vector<1x96xf32> to vector<16x96xf32>
    %546 = arith.addf %544, %545 : vector<16x96xf32>
    %547 = vector.extract_strided_slice %546 {offsets = [0, 0], sizes = [16, 8], strides = [1, 1]} : vector<16x96xf32> to vector<16x8xf32>
    %548 = vector.shape_cast %547 : vector<16x8xf32> to vector<2x8x8xf32>
    %549 = vector.extract_strided_slice %546 {offsets = [0, 32], sizes = [16, 8], strides = [1, 1]} : vector<16x96xf32> to vector<16x8xf32>
    %550 = vector.shape_cast %549 : vector<16x8xf32> to vector<2x8x8xf32>
    %551 = vector.extract_strided_slice %546 {offsets = [0, 64], sizes = [16, 8], strides = [1, 1]} : vector<16x96xf32> to vector<16x8xf32>
    %552 = vector.shape_cast %551 : vector<16x8xf32> to vector<2x8x8xf32>
    %553 = arith.truncf %548 : vector<2x8x8xf32> to vector<2x8x8xbf16>
    %554 = arith.truncf %550 : vector<2x8x8xf32> to vector<2x8x8xbf16>
    "tpu.trace_start"() <{level = 10 : i32, message = "bqd,bkd->bqk"}> : () -> ()
    %cst_153 = arith.constant dense<0.000000e+00> : vector<2x8x8xf32>
    %555 = tpu.matmul %553, %554, %cst_153 {dimension_numbers = #tpu.dot_dimension_numbers<[2], [2], [1], [1], [0, 0, 0, 1, 1, 1], [0], [0]>} : vector<2x8x8xbf16>, vector<2x8x8xbf16>, vector<2x8x8xf32> -> vector<2x8x8xf32>
    "tpu.trace_stop"() : () -> ()
    %cst_154 = arith.constant dense<0xFF800000> : vector<2x8xf32>
    %556 = vector.multi_reduction <maximumf>, %555, %cst_154 [2] : vector<2x8x8xf32> to vector<2x8xf32>
    %557 = vector.shape_cast %556 : vector<2x8xf32> to vector<2x8x1xf32>
    %558 = vector.broadcast %557 : vector<2x8x1xf32> to vector<2x8x8xf32>
    %559 = arith.subf %555, %558 : vector<2x8x8xf32>
    %560 = math.exp %559 : vector<2x8x8xf32>
    %cst_155 = arith.constant dense<0.000000e+00> : vector<2x8xf32>
    %561 = vector.multi_reduction <add>, %560, %cst_155 [2] : vector<2x8x8xf32> to vector<2x8xf32>
    %562 = vector.shape_cast %561 : vector<2x8xf32> to vector<2x8x1xf32>
    %563 = tpu.reciprocal %562 {approx = true} : vector<2x8x1xf32> -> vector<2x8x1xf32>
    %564 = vector.broadcast %563 : vector<2x8x1xf32> to vector<2x8x8xf32>
    %565 = arith.mulf %560, %564 : vector<2x8x8xf32>
    %566 = arith.truncf %565 : vector<2x8x8xf32> to vector<2x8x8xbf16>
    %567 = arith.truncf %552 : vector<2x8x8xf32> to vector<2x8x8xbf16>
    "tpu.trace_start"() <{level = 10 : i32, message = "bqk,bkd->bqd"}> : () -> ()
    %cst_156 = arith.constant dense<0.000000e+00> : vector<2x8x8xf32>
    %568 = tpu.matmul %566, %567, %cst_156 {dimension_numbers = #tpu.dot_dimension_numbers<[2], [1], [1], [2], [0, 0, 0, 1, 1, 2], [0], [0]>} : vector<2x8x8xbf16>, vector<2x8x8xbf16>, vector<2x8x8xf32> -> vector<2x8x8xf32>
    "tpu.trace_stop"() : () -> ()
    %569 = vector.extract_strided_slice %546 {offsets = [0, 8], sizes = [16, 8], strides = [1, 1]} : vector<16x96xf32> to vector<16x8xf32>
    %570 = vector.shape_cast %569 : vector<16x8xf32> to vector<2x8x8xf32>
    %571 = vector.extract_strided_slice %546 {offsets = [0, 40], sizes = [16, 8], strides = [1, 1]} : vector<16x96xf32> to vector<16x8xf32>
    %572 = vector.shape_cast %571 : vector<16x8xf32> to vector<2x8x8xf32>
    %573 = vector.extract_strided_slice %546 {offsets = [0, 72], sizes = [16, 8], strides = [1, 1]} : vector<16x96xf32> to vector<16x8xf32>
    %574 = vector.shape_cast %573 : vector<16x8xf32> to vector<2x8x8xf32>
    %575 = arith.truncf %570 : vector<2x8x8xf32> to vector<2x8x8xbf16>
    %576 = arith.truncf %572 : vector<2x8x8xf32> to vector<2x8x8xbf16>
    "tpu.trace_start"() <{level = 10 : i32, message = "bqd,bkd->bqk"}> : () -> ()
    %cst_157 = arith.constant dense<0.000000e+00> : vector<2x8x8xf32>
    %577 = tpu.matmul %575, %576, %cst_157 {dimension_numbers = #tpu.dot_dimension_numbers<[2], [2], [1], [1], [0, 0, 0, 1, 1, 1], [0], [0]>} : vector<2x8x8xbf16>, vector<2x8x8xbf16>, vector<2x8x8xf32> -> vector<2x8x8xf32>
    "tpu.trace_stop"() : () -> ()
    %cst_158 = arith.constant dense<0xFF800000> : vector<2x8xf32>
    %578 = vector.multi_reduction <maximumf>, %577, %cst_158 [2] : vector<2x8x8xf32> to vector<2x8xf32>
    %579 = vector.shape_cast %578 : vector<2x8xf32> to vector<2x8x1xf32>
    %580 = vector.broadcast %579 : vector<2x8x1xf32> to vector<2x8x8xf32>
    %581 = arith.subf %577, %580 : vector<2x8x8xf32>
    %582 = math.exp %581 : vector<2x8x8xf32>
    %cst_159 = arith.constant dense<0.000000e+00> : vector<2x8xf32>
    %583 = vector.multi_reduction <add>, %582, %cst_159 [2] : vector<2x8x8xf32> to vector<2x8xf32>
    %584 = vector.shape_cast %583 : vector<2x8xf32> to vector<2x8x1xf32>
    %585 = tpu.reciprocal %584 {approx = true} : vector<2x8x1xf32> -> vector<2x8x1xf32>
    %586 = vector.broadcast %585 : vector<2x8x1xf32> to vector<2x8x8xf32>
    %587 = arith.mulf %582, %586 : vector<2x8x8xf32>
    %588 = arith.truncf %587 : vector<2x8x8xf32> to vector<2x8x8xbf16>
    %589 = arith.truncf %574 : vector<2x8x8xf32> to vector<2x8x8xbf16>
    "tpu.trace_start"() <{level = 10 : i32, message = "bqk,bkd->bqd"}> : () -> ()
    %cst_160 = arith.constant dense<0.000000e+00> : vector<2x8x8xf32>
    %590 = tpu.matmul %588, %589, %cst_160 {dimension_numbers = #tpu.dot_dimension_numbers<[2], [1], [1], [2], [0, 0, 0, 1, 1, 2], [0], [0]>} : vector<2x8x8xbf16>, vector<2x8x8xbf16>, vector<2x8x8xf32> -> vector<2x8x8xf32>
    "tpu.trace_stop"() : () -> ()
    %591 = vector.extract_strided_slice %546 {offsets = [0, 16], sizes = [16, 8], strides = [1, 1]} : vector<16x96xf32> to vector<16x8xf32>
    %592 = vector.shape_cast %591 : vector<16x8xf32> to vector<2x8x8xf32>
    %593 = vector.extract_strided_slice %546 {offsets = [0, 48], sizes = [16, 8], strides = [1, 1]} : vector<16x96xf32> to vector<16x8xf32>
    %594 = vector.shape_cast %593 : vector<16x8xf32> to vector<2x8x8xf32>
    %595 = vector.extract_strided_slice %546 {offsets = [0, 80], sizes = [16, 8], strides = [1, 1]} : vector<16x96xf32> to vector<16x8xf32>
    %596 = vector.shape_cast %595 : vector<16x8xf32> to vector<2x8x8xf32>
    %597 = arith.truncf %592 : vector<2x8x8xf32> to vector<2x8x8xbf16>
    %598 = arith.truncf %594 : vector<2x8x8xf32> to vector<2x8x8xbf16>
    "tpu.trace_start"() <{level = 10 : i32, message = "bqd,bkd->bqk"}> : () -> ()
    %cst_161 = arith.constant dense<0.000000e+00> : vector<2x8x8xf32>
    %599 = tpu.matmul %597, %598, %cst_161 {dimension_numbers = #tpu.dot_dimension_numbers<[2], [2], [1], [1], [0, 0, 0, 1, 1, 1], [0], [0]>} : vector<2x8x8xbf16>, vector<2x8x8xbf16>, vector<2x8x8xf32> -> vector<2x8x8xf32>
    "tpu.trace_stop"() : () -> ()
    %cst_162 = arith.constant dense<0xFF800000> : vector<2x8xf32>
    %600 = vector.multi_reduction <maximumf>, %599, %cst_162 [2] : vector<2x8x8xf32> to vector<2x8xf32>
    %601 = vector.shape_cast %600 : vector<2x8xf32> to vector<2x8x1xf32>
    %602 = vector.broadcast %601 : vector<2x8x1xf32> to vector<2x8x8xf32>
    %603 = arith.subf %599, %602 : vector<2x8x8xf32>
    %604 = math.exp %603 : vector<2x8x8xf32>
    %cst_163 = arith.constant dense<0.000000e+00> : vector<2x8xf32>
    %605 = vector.multi_reduction <add>, %604, %cst_163 [2] : vector<2x8x8xf32> to vector<2x8xf32>
    %606 = vector.shape_cast %605 : vector<2x8xf32> to vector<2x8x1xf32>
    %607 = tpu.reciprocal %606 {approx = true} : vector<2x8x1xf32> -> vector<2x8x1xf32>
    %608 = vector.broadcast %607 : vector<2x8x1xf32> to vector<2x8x8xf32>
    %609 = arith.mulf %604, %608 : vector<2x8x8xf32>
    %610 = arith.truncf %609 : vector<2x8x8xf32> to vector<2x8x8xbf16>
    %611 = arith.truncf %596 : vector<2x8x8xf32> to vector<2x8x8xbf16>
    "tpu.trace_start"() <{level = 10 : i32, message = "bqk,bkd->bqd"}> : () -> ()
    %cst_164 = arith.constant dense<0.000000e+00> : vector<2x8x8xf32>
    %612 = tpu.matmul %610, %611, %cst_164 {dimension_numbers = #tpu.dot_dimension_numbers<[2], [1], [1], [2], [0, 0, 0, 1, 1, 2], [0], [0]>} : vector<2x8x8xbf16>, vector<2x8x8xbf16>, vector<2x8x8xf32> -> vector<2x8x8xf32>
    "tpu.trace_stop"() : () -> ()
    %613 = vector.extract_strided_slice %546 {offsets = [0, 24], sizes = [16, 8], strides = [1, 1]} : vector<16x96xf32> to vector<16x8xf32>
    %614 = vector.shape_cast %613 : vector<16x8xf32> to vector<2x8x8xf32>
    %615 = vector.extract_strided_slice %546 {offsets = [0, 56], sizes = [16, 8], strides = [1, 1]} : vector<16x96xf32> to vector<16x8xf32>
    %616 = vector.shape_cast %615 : vector<16x8xf32> to vector<2x8x8xf32>
    %617 = vector.extract_strided_slice %546 {offsets = [0, 88], sizes = [16, 8], strides = [1, 1]} : vector<16x96xf32> to vector<16x8xf32>
    %618 = vector.shape_cast %617 : vector<16x8xf32> to vector<2x8x8xf32>
    %619 = arith.truncf %614 : vector<2x8x8xf32> to vector<2x8x8xbf16>
    %620 = arith.truncf %616 : vector<2x8x8xf32> to vector<2x8x8xbf16>
    "tpu.trace_start"() <{level = 10 : i32, message = "bqd,bkd->bqk"}> : () -> ()
    %cst_165 = arith.constant dense<0.000000e+00> : vector<2x8x8xf32>
    %621 = tpu.matmul %619, %620, %cst_165 {dimension_numbers = #tpu.dot_dimension_numbers<[2], [2], [1], [1], [0, 0, 0, 1, 1, 1], [0], [0]>} : vector<2x8x8xbf16>, vector<2x8x8xbf16>, vector<2x8x8xf32> -> vector<2x8x8xf32>
    "tpu.trace_stop"() : () -> ()
    %cst_166 = arith.constant dense<0xFF800000> : vector<2x8xf32>
    %622 = vector.multi_reduction <maximumf>, %621, %cst_166 [2] : vector<2x8x8xf32> to vector<2x8xf32>
    %623 = vector.shape_cast %622 : vector<2x8xf32> to vector<2x8x1xf32>
    %624 = vector.broadcast %623 : vector<2x8x1xf32> to vector<2x8x8xf32>
    %625 = arith.subf %621, %624 : vector<2x8x8xf32>
    %626 = math.exp %625 : vector<2x8x8xf32>
    %cst_167 = arith.constant dense<0.000000e+00> : vector<2x8xf32>
    %627 = vector.multi_reduction <add>, %626, %cst_167 [2] : vector<2x8x8xf32> to vector<2x8xf32>
    %628 = vector.shape_cast %627 : vector<2x8xf32> to vector<2x8x1xf32>
    %629 = tpu.reciprocal %628 {approx = true} : vector<2x8x1xf32> -> vector<2x8x1xf32>
    %630 = vector.broadcast %629 : vector<2x8x1xf32> to vector<2x8x8xf32>
    %631 = arith.mulf %626, %630 : vector<2x8x8xf32>
    %632 = arith.truncf %631 : vector<2x8x8xf32> to vector<2x8x8xbf16>
    %633 = arith.truncf %618 : vector<2x8x8xf32> to vector<2x8x8xbf16>
    "tpu.trace_start"() <{level = 10 : i32, message = "bqk,bkd->bqd"}> : () -> ()
    %cst_168 = arith.constant dense<0.000000e+00> : vector<2x8x8xf32>
    %634 = tpu.matmul %632, %633, %cst_168 {dimension_numbers = #tpu.dot_dimension_numbers<[2], [1], [1], [2], [0, 0, 0, 1, 1, 2], [0], [0]>} : vector<2x8x8xbf16>, vector<2x8x8xbf16>, vector<2x8x8xf32> -> vector<2x8x8xf32>
    "tpu.trace_stop"() : () -> ()
    %635 = tpu.concatenate %568, %590, %612, %634 in 2 : vector<2x8x8xf32>, vector<2x8x8xf32>, vector<2x8x8xf32>, vector<2x8x8xf32> -> vector<2x8x32xf32>
    %636 = vector.shape_cast %635 : vector<2x8x32xf32> to vector<16x32xf32>
    %637 = arith.truncf %636 : vector<16x32xf32> to vector<16x32xbf16>
    %c3_169 = arith.constant 3 : index
    %c0_170 = arith.constant 0 : index
    %c0_171 = arith.constant 0 : index
    %638 = vector.load %arg6[%c3_169, %c0_170, %c0_171] : memref<4x32x32xbf16, #tpu.memory_space<vmem>>, vector<1x32x32xbf16>
    %639 = vector.shape_cast %638 : vector<1x32x32xbf16> to vector<32x32xbf16>
    %cst_172 = arith.constant dense<0.000000e+00> : vector<16x32xf32>
    %640 = tpu.matmul %637, %639, %cst_172 {dimension_numbers = #tpu.dot_dimension_numbers<[1], [0], [0], [1], [0, 0, 1, 1], [], []>} : vector<16x32xbf16>, vector<32x32xbf16>, vector<16x32xf32> -> vector<16x32xf32>
    %641 = arith.addf %530, %640 : vector<16x32xf32>
    %642 = vector.broadcast %534 : vector<1x32xf32> to vector<16x32xf32>
    %643 = arith.addf %641, %642 : vector<16x32xf32>
    %cst_173 = arith.constant dense<0.000000e+00> : vector<16xf32>
    %644 = vector.multi_reduction <add>, %643, %cst_173 [1] : vector<16x32xf32> to vector<16xf32>
    %645 = vector.shape_cast %644 : vector<16xf32> to vector<16x1xf32>
    %cst_174 = arith.constant 3.200000e+01 : f32
    %646 = vector.broadcast %cst_174 : f32 to vector<16x1xf32>
    %647 = arith.divf %645, %646 : vector<16x1xf32>
    %648 = vector.broadcast %647 : vector<16x1xf32> to vector<16x32xf32>
    %649 = arith.subf %643, %648 : vector<16x32xf32>
    %650 = arith.mulf %649, %649 : vector<16x32xf32>
    %cst_175 = arith.constant dense<0.000000e+00> : vector<16xf32>
    %651 = vector.multi_reduction <add>, %650, %cst_175 [1] : vector<16x32xf32> to vector<16xf32>
    %652 = vector.shape_cast %651 : vector<16xf32> to vector<16x1xf32>
    %cst_176 = arith.constant 3.200000e+01 : f32
    %653 = vector.broadcast %cst_176 : f32 to vector<16x1xf32>
    %654 = arith.divf %652, %653 : vector<16x1xf32>
    %655 = vector.broadcast %647 : vector<16x1xf32> to vector<16x32xf32>
    %656 = arith.subf %643, %655 : vector<16x32xf32>
    %cst_177 = arith.constant 9.99999974E-6 : f32
    %657 = vector.broadcast %cst_177 : f32 to vector<16x1xf32>
    %658 = arith.addf %654, %657 : vector<16x1xf32>
    %659 = math.rsqrt %658 : vector<16x1xf32>
    %660 = vector.broadcast %659 : vector<16x1xf32> to vector<16x32xf32>
    %661 = arith.mulf %656, %660 : vector<16x32xf32>
    %662 = vector.broadcast %537 : vector<1x32xf32> to vector<16x32xf32>
    %663 = arith.mulf %661, %662 : vector<16x32xf32>
    %664 = vector.broadcast %538 : vector<1x32xf32> to vector<16x32xf32>
    %665 = arith.addf %663, %664 : vector<16x32xf32>
    %666 = arith.truncf %665 : vector<16x32xf32> to vector<16x32xbf16>
    %c3_178 = arith.constant 3 : index
    %c0_179 = arith.constant 0 : index
    %c0_180 = arith.constant 0 : index
    %667 = vector.load %arg7[%c3_178, %c0_179, %c0_180] : memref<4x32x64xbf16, #tpu.memory_space<vmem>>, vector<1x32x64xbf16>
    %668 = vector.shape_cast %667 : vector<1x32x64xbf16> to vector<32x64xbf16>
    %cst_181 = arith.constant dense<0.000000e+00> : vector<16x64xf32>
    %669 = tpu.matmul %666, %668, %cst_181 {dimension_numbers = #tpu.dot_dimension_numbers<[1], [0], [0], [1], [0, 0, 1, 1], [], []>} : vector<16x32xbf16>, vector<32x64xbf16>, vector<16x64xf32> -> vector<16x64xf32>
    %670 = vector.broadcast %535 : vector<1x64xf32> to vector<16x64xf32>
    %671 = arith.addf %669, %670 : vector<16x64xf32>
    %cst_182 = arith.constant 0.000000e+00 : f32
    %672 = vector.broadcast %cst_182 : f32 to vector<16x64xf32>
    %673 = arith.maximumf %671, %672 : vector<16x64xf32>
    %674 = arith.truncf %673 : vector<16x64xf32> to vector<16x64xbf16>
    %c3_183 = arith.constant 3 : index
    %c0_184 = arith.constant 0 : index
    %c0_185 = arith.constant 0 : index
    %675 = vector.load %arg8[%c3_183, %c0_184, %c0_185] : memref<4x64x32xbf16, #tpu.memory_space<vmem>>, vector<1x64x32xbf16>
    %676 = vector.shape_cast %675 : vector<1x64x32xbf16> to vector<64x32xbf16>
    %cst_186 = arith.constant dense<0.000000e+00> : vector<16x32xf32>
    %677 = tpu.matmul %674, %676, %cst_186 {dimension_numbers = #tpu.dot_dimension_numbers<[1], [0], [0], [1], [0, 0, 1, 1], [], []>} : vector<16x64xbf16>, vector<64x32xbf16>, vector<16x32xf32> -> vector<16x32xf32>
    %678 = vector.broadcast %536 : vector<1x32xf32> to vector<16x32xf32>
    %679 = arith.addf %677, %678 : vector<16x32xf32>
    %680 = arith.addf %665, %679 : vector<16x32xf32>
    %cst_187 = arith.constant dense<0.000000e+00> : vector<16xf32>
    %681 = vector.multi_reduction <add>, %680, %cst_187 [1] : vector<16x32xf32> to vector<16xf32>
    %682 = vector.shape_cast %681 : vector<16xf32> to vector<16x1xf32>
    %cst_188 = arith.constant 3.200000e+01 : f32
    %683 = vector.broadcast %cst_188 : f32 to vector<16x1xf32>
    %684 = arith.divf %682, %683 : vector<16x1xf32>
    %685 = vector.broadcast %684 : vector<16x1xf32> to vector<16x32xf32>
    %686 = arith.subf %680, %685 : vector<16x32xf32>
    %687 = arith.mulf %686, %686 : vector<16x32xf32>
    %cst_189 = arith.constant dense<0.000000e+00> : vector<16xf32>
    %688 = vector.multi_reduction <add>, %687, %cst_189 [1] : vector<16x32xf32> to vector<16xf32>
    %689 = vector.shape_cast %688 : vector<16xf32> to vector<16x1xf32>
    %cst_190 = arith.constant 3.200000e+01 : f32
    %690 = vector.broadcast %cst_190 : f32 to vector<16x1xf32>
    %691 = arith.divf %689, %690 : vector<16x1xf32>
    %692 = vector.broadcast %684 : vector<16x1xf32> to vector<16x32xf32>
    %693 = arith.subf %680, %692 : vector<16x32xf32>
    %cst_191 = arith.constant 9.99999974E-6 : f32
    %694 = vector.broadcast %cst_191 : f32 to vector<16x1xf32>
    %695 = arith.addf %691, %694 : vector<16x1xf32>
    %696 = math.rsqrt %695 : vector<16x1xf32>
    %697 = vector.broadcast %696 : vector<16x1xf32> to vector<16x32xf32>
    %698 = arith.mulf %693, %697 : vector<16x32xf32>
    %699 = vector.broadcast %539 : vector<1x32xf32> to vector<16x32xf32>
    %700 = arith.mulf %698, %699 : vector<16x32xf32>
    %701 = vector.broadcast %540 : vector<1x32xf32> to vector<16x32xf32>
    %702 = arith.addf %700, %701 : vector<16x32xf32>
    %c0_192 = arith.constant 0 : index
    %c0_193 = arith.constant 0 : index
    %703 = vector.load %arg10[%c0_192, %c0_193] : memref<768x6xbf16, #tpu.memory_space<vmem>>, vector<768x6xbf16>
    %704 = vector.extract_strided_slice %358 {offsets = [0, 0], sizes = [1, 32], strides = [1, 1]} : vector<32x32xf32> to vector<1x32xf32>
    %705 = vector.extract_strided_slice %358 {offsets = [1, 0], sizes = [1, 32], strides = [1, 1]} : vector<32x32xf32> to vector<1x32xf32>
    %706 = vector.extract_strided_slice %358 {offsets = [2, 0], sizes = [1, 32], strides = [1, 1]} : vector<32x32xf32> to vector<1x32xf32>
    %707 = vector.extract_strided_slice %358 {offsets = [3, 0], sizes = [1, 32], strides = [1, 1]} : vector<32x32xf32> to vector<1x32xf32>
    %708 = vector.extract_strided_slice %358 {offsets = [4, 0], sizes = [1, 32], strides = [1, 1]} : vector<32x32xf32> to vector<1x32xf32>
    %709 = vector.extract_strided_slice %358 {offsets = [5, 0], sizes = [1, 32], strides = [1, 1]} : vector<32x32xf32> to vector<1x32xf32>
    %710 = vector.extract_strided_slice %358 {offsets = [6, 0], sizes = [1, 32], strides = [1, 1]} : vector<32x32xf32> to vector<1x32xf32>
    %711 = vector.extract_strided_slice %358 {offsets = [7, 0], sizes = [1, 32], strides = [1, 1]} : vector<32x32xf32> to vector<1x32xf32>
    %712 = vector.extract_strided_slice %358 {offsets = [8, 0], sizes = [1, 32], strides = [1, 1]} : vector<32x32xf32> to vector<1x32xf32>
    %713 = vector.extract_strided_slice %358 {offsets = [9, 0], sizes = [1, 32], strides = [1, 1]} : vector<32x32xf32> to vector<1x32xf32>
    %714 = vector.extract_strided_slice %358 {offsets = [10, 0], sizes = [1, 32], strides = [1, 1]} : vector<32x32xf32> to vector<1x32xf32>
    %715 = vector.extract_strided_slice %358 {offsets = [11, 0], sizes = [1, 32], strides = [1, 1]} : vector<32x32xf32> to vector<1x32xf32>
    %716 = vector.extract_strided_slice %358 {offsets = [12, 0], sizes = [1, 32], strides = [1, 1]} : vector<32x32xf32> to vector<1x32xf32>
    %717 = vector.extract_strided_slice %358 {offsets = [13, 0], sizes = [1, 32], strides = [1, 1]} : vector<32x32xf32> to vector<1x32xf32>
    %718 = vector.extract_strided_slice %358 {offsets = [14, 0], sizes = [1, 32], strides = [1, 1]} : vector<32x32xf32> to vector<1x32xf32>
    %719 = vector.extract_strided_slice %358 {offsets = [15, 0], sizes = [1, 32], strides = [1, 1]} : vector<32x32xf32> to vector<1x32xf32>
    %720 = tpu.concatenate %704, %705, %706, %707, %708, %709, %710, %711, %712, %713, %714, %715, %716, %717, %718, %719 in 1 : vector<1x32xf32>, vector<1x32xf32>, vector<1x32xf32>, vector<1x32xf32>, vector<1x32xf32>, vector<1x32xf32>, vector<1x32xf32>, vector<1x32xf32>, vector<1x32xf32>, vector<1x32xf32>, vector<1x32xf32>, vector<1x32xf32>, vector<1x32xf32>, vector<1x32xf32>, vector<1x32xf32>, vector<1x32xf32> -> vector<1x512xf32>
    %721 = vector.extract_strided_slice %358 {offsets = [16, 0], sizes = [1, 32], strides = [1, 1]} : vector<32x32xf32> to vector<1x32xf32>
    %722 = vector.extract_strided_slice %358 {offsets = [17, 0], sizes = [1, 32], strides = [1, 1]} : vector<32x32xf32> to vector<1x32xf32>
    %723 = vector.extract_strided_slice %358 {offsets = [18, 0], sizes = [1, 32], strides = [1, 1]} : vector<32x32xf32> to vector<1x32xf32>
    %724 = vector.extract_strided_slice %358 {offsets = [19, 0], sizes = [1, 32], strides = [1, 1]} : vector<32x32xf32> to vector<1x32xf32>
    %725 = vector.extract_strided_slice %358 {offsets = [20, 0], sizes = [1, 32], strides = [1, 1]} : vector<32x32xf32> to vector<1x32xf32>
    %726 = vector.extract_strided_slice %358 {offsets = [21, 0], sizes = [1, 32], strides = [1, 1]} : vector<32x32xf32> to vector<1x32xf32>
    %727 = vector.extract_strided_slice %358 {offsets = [22, 0], sizes = [1, 32], strides = [1, 1]} : vector<32x32xf32> to vector<1x32xf32>
    %728 = vector.extract_strided_slice %358 {offsets = [23, 0], sizes = [1, 32], strides = [1, 1]} : vector<32x32xf32> to vector<1x32xf32>
    %729 = vector.extract_strided_slice %358 {offsets = [24, 0], sizes = [1, 32], strides = [1, 1]} : vector<32x32xf32> to vector<1x32xf32>
    %730 = vector.extract_strided_slice %358 {offsets = [25, 0], sizes = [1, 32], strides = [1, 1]} : vector<32x32xf32> to vector<1x32xf32>
    %731 = vector.extract_strided_slice %358 {offsets = [26, 0], sizes = [1, 32], strides = [1, 1]} : vector<32x32xf32> to vector<1x32xf32>
    %732 = vector.extract_strided_slice %358 {offsets = [27, 0], sizes = [1, 32], strides = [1, 1]} : vector<32x32xf32> to vector<1x32xf32>
    %733 = vector.extract_strided_slice %358 {offsets = [28, 0], sizes = [1, 32], strides = [1, 1]} : vector<32x32xf32> to vector<1x32xf32>
    %734 = vector.extract_strided_slice %358 {offsets = [29, 0], sizes = [1, 32], strides = [1, 1]} : vector<32x32xf32> to vector<1x32xf32>
    %735 = vector.extract_strided_slice %358 {offsets = [30, 0], sizes = [1, 32], strides = [1, 1]} : vector<32x32xf32> to vector<1x32xf32>
    %736 = vector.extract_strided_slice %358 {offsets = [31, 0], sizes = [1, 32], strides = [1, 1]} : vector<32x32xf32> to vector<1x32xf32>
    %737 = tpu.concatenate %721, %722, %723, %724, %725, %726, %727, %728, %729, %730, %731, %732, %733, %734, %735, %736 in 1 : vector<1x32xf32>, vector<1x32xf32>, vector<1x32xf32>, vector<1x32xf32>, vector<1x32xf32>, vector<1x32xf32>, vector<1x32xf32>, vector<1x32xf32>, vector<1x32xf32>, vector<1x32xf32>, vector<1x32xf32>, vector<1x32xf32>, vector<1x32xf32>, vector<1x32xf32>, vector<1x32xf32>, vector<1x32xf32> -> vector<1x512xf32>
    %738 = tpu.concatenate %720, %737 in 0 : vector<1x512xf32>, vector<1x512xf32> -> vector<2x512xf32>
    %739 = arith.truncf %738 : vector<2x512xf32> to vector<2x512xbf16>
    %740 = vector.extract_strided_slice %703 {offsets = [0, 0], sizes = [512, 6], strides = [1, 1]} : vector<768x6xbf16> to vector<512x6xbf16>
    %cst_194 = arith.constant dense<0.000000e+00> : vector<2x6xf32>
    %741 = tpu.matmul %739, %740, %cst_194 {dimension_numbers = #tpu.dot_dimension_numbers<[1], [0], [0], [1], [0, 0, 1, 1], [], []>} : vector<2x512xbf16>, vector<512x6xbf16>, vector<2x6xf32> -> vector<2x6xf32>
    %742 = vector.extract_strided_slice %702 {offsets = [0, 0], sizes = [1, 32], strides = [1, 1]} : vector<16x32xf32> to vector<1x32xf32>
    %743 = vector.extract_strided_slice %702 {offsets = [1, 0], sizes = [1, 32], strides = [1, 1]} : vector<16x32xf32> to vector<1x32xf32>
    %744 = vector.extract_strided_slice %702 {offsets = [2, 0], sizes = [1, 32], strides = [1, 1]} : vector<16x32xf32> to vector<1x32xf32>
    %745 = vector.extract_strided_slice %702 {offsets = [3, 0], sizes = [1, 32], strides = [1, 1]} : vector<16x32xf32> to vector<1x32xf32>
    %746 = vector.extract_strided_slice %702 {offsets = [4, 0], sizes = [1, 32], strides = [1, 1]} : vector<16x32xf32> to vector<1x32xf32>
    %747 = vector.extract_strided_slice %702 {offsets = [5, 0], sizes = [1, 32], strides = [1, 1]} : vector<16x32xf32> to vector<1x32xf32>
    %748 = vector.extract_strided_slice %702 {offsets = [6, 0], sizes = [1, 32], strides = [1, 1]} : vector<16x32xf32> to vector<1x32xf32>
    %749 = vector.extract_strided_slice %702 {offsets = [7, 0], sizes = [1, 32], strides = [1, 1]} : vector<16x32xf32> to vector<1x32xf32>
    %750 = tpu.concatenate %742, %743, %744, %745, %746, %747, %748, %749 in 1 : vector<1x32xf32>, vector<1x32xf32>, vector<1x32xf32>, vector<1x32xf32>, vector<1x32xf32>, vector<1x32xf32>, vector<1x32xf32>, vector<1x32xf32> -> vector<1x256xf32>
    %751 = vector.extract_strided_slice %702 {offsets = [8, 0], sizes = [1, 32], strides = [1, 1]} : vector<16x32xf32> to vector<1x32xf32>
    %752 = vector.extract_strided_slice %702 {offsets = [9, 0], sizes = [1, 32], strides = [1, 1]} : vector<16x32xf32> to vector<1x32xf32>
    %753 = vector.extract_strided_slice %702 {offsets = [10, 0], sizes = [1, 32], strides = [1, 1]} : vector<16x32xf32> to vector<1x32xf32>
    %754 = vector.extract_strided_slice %702 {offsets = [11, 0], sizes = [1, 32], strides = [1, 1]} : vector<16x32xf32> to vector<1x32xf32>
    %755 = vector.extract_strided_slice %702 {offsets = [12, 0], sizes = [1, 32], strides = [1, 1]} : vector<16x32xf32> to vector<1x32xf32>
    %756 = vector.extract_strided_slice %702 {offsets = [13, 0], sizes = [1, 32], strides = [1, 1]} : vector<16x32xf32> to vector<1x32xf32>
    %757 = vector.extract_strided_slice %702 {offsets = [14, 0], sizes = [1, 32], strides = [1, 1]} : vector<16x32xf32> to vector<1x32xf32>
    %758 = vector.extract_strided_slice %702 {offsets = [15, 0], sizes = [1, 32], strides = [1, 1]} : vector<16x32xf32> to vector<1x32xf32>
    %759 = tpu.concatenate %751, %752, %753, %754, %755, %756, %757, %758 in 1 : vector<1x32xf32>, vector<1x32xf32>, vector<1x32xf32>, vector<1x32xf32>, vector<1x32xf32>, vector<1x32xf32>, vector<1x32xf32>, vector<1x32xf32> -> vector<1x256xf32>
    %760 = tpu.concatenate %750, %759 in 0 : vector<1x256xf32>, vector<1x256xf32> -> vector<2x256xf32>
    %761 = arith.truncf %760 : vector<2x256xf32> to vector<2x256xbf16>
    %762 = vector.extract_strided_slice %703 {offsets = [512, 0], sizes = [256, 6], strides = [1, 1]} : vector<768x6xbf16> to vector<256x6xbf16>
    %cst_195 = arith.constant dense<0.000000e+00> : vector<2x6xf32>
    %763 = tpu.matmul %761, %762, %cst_195 {dimension_numbers = #tpu.dot_dimension_numbers<[1], [0], [0], [1], [0, 0, 1, 1], [], []>} : vector<2x256xbf16>, vector<256x6xbf16>, vector<2x6xf32> -> vector<2x6xf32>
    %c0_196 = arith.constant 0 : index
    %c0_197 = arith.constant 0 : index
    %764 = vector.load %arg11[%c0_196, %c0_197] : memref<1x6xf32, #tpu.memory_space<vmem>>, vector<1x6xf32>
    %765 = vector.extract_strided_slice %741 {offsets = [0, 0], sizes = [2, 2], strides = [1, 1]} : vector<2x6xf32> to vector<2x2xf32>
    %766 = vector.extract_strided_slice %763 {offsets = [0, 0], sizes = [2, 2], strides = [1, 1]} : vector<2x6xf32> to vector<2x2xf32>
    %767 = arith.addf %765, %766 : vector<2x2xf32>
    %768 = vector.extract_strided_slice %764 {offsets = [0, 0], sizes = [1, 2], strides = [1, 1]} : vector<1x6xf32> to vector<1x2xf32>
    %769 = vector.broadcast %768 : vector<1x2xf32> to vector<2x2xf32>
    %770 = arith.addf %767, %769 : vector<2x2xf32>
    %cst_198 = arith.constant dense<0xFF800000> : vector<2xf32>
    %771 = vector.multi_reduction <maximumf>, %770, %cst_198 [1] : vector<2x2xf32> to vector<2xf32>
    %772 = vector.shape_cast %771 : vector<2xf32> to vector<2x1xf32>
    %773 = vector.broadcast %772 : vector<2x1xf32> to vector<2x2xf32>
    %774 = arith.subf %770, %773 : vector<2x2xf32>
    %775 = math.exp %774 : vector<2x2xf32>
    %cst_199 = arith.constant dense<0.000000e+00> : vector<2xf32>
    %776 = vector.multi_reduction <add>, %775, %cst_199 [1] : vector<2x2xf32> to vector<2xf32>
    %777 = vector.shape_cast %776 : vector<2xf32> to vector<2x1xf32>
    %778 = vector.broadcast %777 : vector<2x1xf32> to vector<2x2xf32>
    %779 = arith.divf %775, %778 : vector<2x2xf32>
    %780 = vector.extract_strided_slice %779 {offsets = [0, 0], sizes = [2, 1], strides = [1, 1]} : vector<2x2xf32> to vector<2x1xf32>
    %781 = vector.extract_strided_slice %741 {offsets = [0, 2], sizes = [2, 4], strides = [1, 1]} : vector<2x6xf32> to vector<2x4xf32>
    %782 = vector.broadcast %780 : vector<2x1xf32> to vector<2x4xf32>
    %783 = arith.mulf %782, %781 : vector<2x4xf32>
    %784 = vector.extract_strided_slice %779 {offsets = [0, 1], sizes = [2, 1], strides = [1, 1]} : vector<2x2xf32> to vector<2x1xf32>
    %785 = vector.extract_strided_slice %763 {offsets = [0, 2], sizes = [2, 4], strides = [1, 1]} : vector<2x6xf32> to vector<2x4xf32>
    %786 = vector.broadcast %784 : vector<2x1xf32> to vector<2x4xf32>
    %787 = arith.mulf %786, %785 : vector<2x4xf32>
    %788 = arith.addf %783, %787 : vector<2x4xf32>
    %789 = vector.extract_strided_slice %764 {offsets = [0, 2], sizes = [1, 4], strides = [1, 1]} : vector<1x6xf32> to vector<1x4xf32>
    %790 = vector.broadcast %789 : vector<1x4xf32> to vector<2x4xf32>
    %791 = arith.addf %788, %790 : vector<2x4xf32>
    %c0_200 = arith.constant 0 : index
    %c0_201 = arith.constant 0 : index
    %792 = vector.load %arg12[%c0_200, %c0_201] : memref<2x4xf32, #tpu.memory_space<vmem>>, vector<2x4xf32>
    tpu.vector_store %arg12[%c0_200, %c0_201], %791 {strides = array<i32>} : memref<2x4xf32, #tpu.memory_space<vmem>>, vector<2x4xf32>,
    return
  }
}

</mosaic_0001>

<bundles_post_ra>
// kernel: _forward.1
= control target key start
LH: loop header
LB: loop body
LE: loop exit
PB: predicated region body
PF: predicated region fallthrough
CT: control target
= control target key end

     0   :  { %vm65_vm0 = vcmask 1043456   ;;  %vm58_vm1 = vcmask 64512   ;;  %s9786_s0 = inlined_call_operand.vmem [shape: bf16[32,8], index: 0, kind: input, shape index: {}]   ;;  %s9787_s1 = inlined_call_operand.vmem [shape: bf16[16,16], index: 1, kind: input, shape index: {}]   ;;  %s9788_s2 = inlined_call_operand.vmem [shape: bf16[8,32], index: 2, kind: input, shape index: {}]   ;;  %s9789_s3 = inlined_call_operand.vmem [shape: bf16[16,32], index: 3, kind: input, shape index: {}]   ;;  %s9790_s4 = inlined_call_operand.vmem [shape: f32[17,32], index: 4, kind: input, shape index: {}]   ;;  %s9791_s5 = inlined_call_operand.vmem [shape: bf16[4,32,96], index: 5, kind: input, shape index: {}]   ;;  %s9792_s6 = inlined_call_operand.vmem [shape: bf16[4,32,32], index: 6, kind: input, shape index: {}]   ;;  %s9793_s7 = inlined_call_operand.vmem [shape: bf16[4,32,64], index: 7, kind: input, shape index: {}]   ;;  %s9794_s8 = inlined_call_operand.vmem [shape: bf16[4,64,32], index: 8, kind: input, shape index: {}]   ;;  %s9795_s9 = inlined_call_operand.vmem [shape: f32[4,8,96], index: 9, kind: input, shape index: {}]   ;;  %s9796_s10 = inlined_call_operand.vmem [shape: bf16[768,6], index: 10, kind: input, shape index: {}]   ;;  %s9797_s11 = inlined_call_operand.vmem [shape: f32[1,6], index: 11, kind: input, shape index: {}]   ;;  %s9798_s12 = inlined_call_operand.hbm [shape: f32[2,4], index: 12, kind: output, shape index: {}]  }
   0x1   :  { %v47_v0 = vld [vmem:[%s9788_s2] sm:$0xf]  ;;  %v7805_v3 = vld [vmem:[%s9786_s0 + $0x8] sm:$0xff]  }
   0x2   :  { %v7804_v1 = vld [vmem:[%s9786_s0] sm:$0xff]   ;;  %7599 = vmatprep.subr.msk.bf16.mxu0 %vm65_vm0, %v47_v0  ;;  %v67_v2 = vsel %vm65_vm0, %v47_v0, 0 }
   0x3   :  { %7060 = vmatpush3.bf16.msra.mxu0 %v67_v2  ;;  %7061 = vmatprep.mubr.msk.bf16.mxu0 %vm58_vm1, %v7804_v1 }
   0x6   :  { %7062 = vmatmul.mubr.msk.bf16.vlgmr.msra.gmra.mxu0 %vm58_vm1, %v7805_v3 }
   0x7   :  { %17 = vsyncpa [#allocation3], 0  ;;  %v7806_v4 = vld [vmem:[%s9791_s5 + $0x8] sm:$0xff]   ;;  %v7807_v5 = vld [vmem:[%s9791_s5] sm:$0xff]   ;;  %vm212_vm2 = vcmask 261120   ;;  %v196_v18 = vlaneseq  ;;  %v8166_v20 = vmov 0.0  }
   0x8   :  { %7071 = vmatprep.subr.bf16.mxu0 %v7806_v4  ;;  %v119_v8 = vld [vmem:[%s9790_s4 + $0x8] sm:$0xff]  ;;  %v118_v10 = vld [vmem:[%s9790_s4] sm:$0xff]  ;;  %7065 = vmatprep.subr.bf16.mxu1 %v8166_v20  ;;  %vm8167_vm3 = vmmov 0   ;;  %s8168_s17 = smov 96   ;;  %vm144_vm4 = vcmask 130048   ;;  %s8169_s22 = smov 64  }
   0x9   :  { %7072 = vmatpush3.bf16.msra.mxu0 %v7806_v4  ;;  %v8291_v19 = vshrl.u32 %v196_v18, 7  ;;  %v8301_v23 = vld [vmem:[%s9795_s9] sm:$0xff]  ;;  %7067 = vmatprep.mubr.msk.bf16.mxu1 %vm8167_vm3, %v8166_v20  ;;  %s8172_s23 = smov 56   ;;  %s8173_s24 = smov 80   ;;  %vm1292_vm5 = vcmask 195584   ;;  %vm1570_vm6 = vcmask 523264  }
   0xa   :  { %7073 = vmatprep.subr.bf16.mxu0 %v7807_v5  ;;  %v7808_v50 = vld [vmem:[%s9789_s3] sm:$0xff]   ;;  %s8170_s3 = smov 88   ;;  %s8174_s25 = smov 112   ;;  %vm5912_vm7 = vcmask 785408   ;;  %vm6001_vm8 = vcmask 1040384   ;;  %vm6503_vm9 = vcmask 9216  }
   0xb   :  { %v8296_v22 = vsub.s32 0, %v8291_v19  ;;  %7066 = vmatpush3.bf16.msra.mxu1 %v7808_v50  ;;  %v7809_v51 = vld [vmem:[%s9787_s1] sm:$0xff]   ;;  %s8171_s1 = smov 120   ;;  %s8175_s26 = smov 48   ;;  %vm6532_vm10 = vcmask 25600  }
   0xc   :  { %7091 = vmatprep.subr.bf16.mxu1 %v8166_v20  ;;  %s8176_s2 = smov 72   ;;  %s8177_s27 = smov 104  }
   0xd   :  { %7074 = vmatpush3.bf16.msra.mxu0 %v7807_v5  ;;  %v199_v26 = vrot.slane %v8301_v23, %v8296_v22  ;;  %s8178_s28 = smov 40   ;;  %s8179_s29 = smov 8  }
   0xe   :  { %7079 = vmatprep.subr.bf16.mxu0 %v8166_v20  ;;  %7068 = vmatmul.mubr.msk.bf16.vlgmr.msra.gmra.mxu1 %vm144_vm4, %v7809_v51  ;;  %s8180_s30 = smov 16   ;;  %s8181_s16 = smov 24  }
   0xf   :  { %7093 = vmatprep.mubr.msk.bf16.mxu1 %vm8167_vm3, %v8166_v20  ;;  %s8182_s19 = smov 32   ;;  %s8186_s18 = smov [#allocation2]  }
  0xc6   :  { %v7063_v6 = vpop.f32.mrf.mxu0 }
  0xc7   :  { %v8283_v15 = vadd.f32 %v7063_v6, %v118_v10 }
  0xc8   :  { %v103_v7 = vpop.f32.mrf.mxu0 }
  0xc9   :  { %v8279_v13 = vadd.f32 %v118_v10, %v103_v7 }
  0xca   :  { %v7064_v9 = vpop.f32.mrf.mxu0 }
  0xcb   :  { %v8277_v11 = vadd.f32 %v7064_v9, %v119_v8 }
  0xcc   :  { %v106_v12 = vpop.f32.mrf.mxu0 }
  0xcd   :  { %v8281_v14 = vadd.f32 %v119_v8, %v106_v12  ;;  %v191_v17 = vpack.c.bf16 %v8277_v11, %v8283_v15 }
  0xce   :  { %v8361_v10 = vpop.f32.mrf.mxu1 }
  0xcf   :  { %v190_v16 = vpack.c.bf16 %v8281_v14, %v8279_v13 }
  0xd0   :  { %v7069_v12 = vpop.f32.mrf.mxu1 }
  0xd1   :  { %7075 = vmatprep.mubr.msk.bf16.mxu0 %vm212_vm2, %v190_v16 }
  0xd2   :  { %7076 = vmatmul.mubr.msk.bf16.vlgmr.msra.gmra.mxu0 %vm212_vm2, %v191_v17  ;;  %v8363_v16 = vpop.f32.mrf.mxu1 }
  0xd3   :  { %7081 = vmatprep.mubr.msk.bf16.mxu0 %vm8167_vm3, %v8166_v20 }
  0xd4   :  { %v7070_v17 = vpop.f32.mrf.mxu1 }
 0x192   :  { %v7077_v21 = vpop.f32.mrf.mxu0 }
 0x193   :  { %v262_v32 = vadd.f32 %v7077_v21, %v199_v26 }
 0x194   :  { %v253_v24 = vpop.f32.mrf.mxu0 }
 0x195   :  { %v254_v28 = vadd.f32 %v253_v24, %v199_v26 }
 0x196   :  { %v7078_v25 = vpop.f32.mrf.mxu0 }
 0x197   :  { %v265_v30 = vadd.f32 %v7078_v25, %v199_v26 }
 0x198   :  { %v256_v27 = vpop.f32.mrf.mxu0 }
 0x199   :  { %v257_v29 = vadd.f32 %v256_v27, %v199_v26  ;;  %v8313_v33 = vpack.c.bf16 %v265_v30, %v262_v32 }
 0x19b   :  { %v8309_v31 = vpack.c.bf16 %v257_v29, %v254_v28 }
 0x19d   :  { %271 = vrot.lane.b32.xlu0 %v8309_v31, %s8168_s17 }
 0x1a1   :  { %321 = vrot.lane.b32.xlu0 %v8313_v33, %s8168_s17 }
 0x20f   :  { %v272_v34 = vpop.permute.xlu0 %271 }
 0x210   :  { %v277_v35 = vsel %vm58_vm1, %v272_v34, 0 }
 0x211   :  { %7080 = vmatpush3.bf16.xpose.msra.mxu0 %v277_v35 }
 0x212   :  { %7085 = vmatprep.subr.bf16.mxu0 %v8166_v20 }
 0x213   :  { %v322_v36 = vpop.permute.xlu0 %321 }
 0x214   :  { %v327_v37 = vsel %vm58_vm1, %v322_v36, 0 }
 0x218   :  { %7082 = vmatmul.mubr.msk.bf16.vlgmr.msra.gmra.mxu0 %vm58_vm1, %v8309_v31 }
 0x219   :  { %7086 = vmatpush3.bf16.xpose.msra.mxu0 %v327_v37  ;;  %7087 = vmatprep.mubr.msk.bf16.mxu0 %vm8167_vm3, %v8166_v20 }
 0x21a   :  { %7097 = vmatprep.subr.bf16.mxu0 %v8166_v20 }
 0x220   :  { %7088 = vmatmul.mubr.msk.bf16.vlgmr.msra.gmra.mxu0 %vm58_vm1, %v8313_v33 }
 0x221   :  { %7099 = vmatprep.mubr.msk.bf16.mxu0 %vm8167_vm3, %v8166_v20 }
 0x2d8   :  { %v313_v38 = vpop.f32.mrf.mxu0 }
 0x2d9   :  { %v370_v39 = vsel %vm144_vm4, %v313_v38, -inf }
 0x2da   :  { %371 = vmax.xlane.f32.xlu1 %v370_v39  ;;  %v7083_v40 = vpop.f32.mrf.mxu0 }
 0x2dc   :  { %v316_v41 = vpop.f32.mrf.mxu0 }
 0x2dd   :  { %v373_v42 = vsel %vm144_vm4, %v316_v41, -inf }
 0x2de   :  { %374 = vmax.xlane.f32.xlu1 %v373_v42  ;;  %v7084_v43 = vpop.f32.mrf.mxu0 }
 0x2e0   :  { %v363_v44 = vpop.f32.mrf.mxu0 }
 0x2e1   :  { %v376_v45 = vsel %vm144_vm4, %v363_v44, -inf }
 0x2e2   :  { %377 = vmax.xlane.f32.xlu0 %v376_v45  ;;  %v7089_v46 = vpop.f32.mrf.mxu0 }
 0x2e4   :  { %v366_v47 = vpop.f32.mrf.mxu0 }
 0x2e5   :  { %v379_v48 = vsel %vm144_vm4, %v366_v47, -inf }
 0x2e6   :  { %380 = vmax.xlane.f32.xlu1 %v379_v48  ;;  %v7090_v49 = vpop.f32.mrf.mxu0 }
 0x2f7   :  { %416 = vrot.lane.b32.xlu1 %v8309_v31, %s8169_s22 }
 0x2f8   :  { %463 = vrot.lane.b32.xlu0 %v8313_v33, %s8169_s22 }
 0x2fb   :  { %512 = vrot.lane.b32.xlu1 %v8309_v31, %s8170_s3 }
 0x2ff   :  { %563 = vrot.lane.b32.xlu1 %v8313_v33, %s8170_s3 }
 0x363   :  { %v372_v52 = vpop.xlane.xlu1 %371 }
 0x364   :  { %v382_v53 = vsub.f32 %v313_v38, %v372_v52 }
 0x366   :  { %v386_v54 = vmul.f32 1.442695, %v382_v53 }
 0x367   :  { %v375_v55 = vpop.xlane.xlu1 %374 }
 0x368   :  { %7896 = vpow2.f32 %v386_v54  ;;  %v383_v56 = vsub.f32 %v316_v41, %v375_v55 }
 0x36a   :  { %v388_v57 = vmul.f32 1.442695, %v383_v56 }
 0x36b   :  { %v378_v58 = vpop.xlane.xlu0 %377 }
 0x36c   :  { %7898 = vpow2.f32 %v388_v57  ;;  %v384_v59 = vsub.f32 %v363_v44, %v378_v58 }
 0x36e   :  { %v390_v60 = vmul.f32 1.442695, %v384_v59 }
 0x36f   :  { %v464_v61 = vpop.permute.xlu0 %463  ;;  %v381_v62 = vpop.xlane.xlu1 %380 }
 0x370   :  { %7900 = vpow2.f32 %v390_v60  ;;  %v385_v63 = vsub.f32 %v366_v47, %v381_v62  ;;  %7098 = vmatpush3.bf16.msra.mxu0 %v464_v61 }
 0x371   :  { %7109 = vmatprep.subr.bf16.mxu0 %v8166_v20 }
 0x372   :  { %v392_v0 = vmul.f32 1.442695, %v385_v63 }
 0x373   :  { %v417_v1 = vpop.permute.xlu1 %416 }
 0x374   :  { %7902 = vpow2.f32 %v392_v0  ;;  %7092 = vmatpush3.bf16.msra.mxu1 %v417_v1 }
 0x375   :  { %v7897_v2 = vpop.eup %7896  ;;  %7103 = vmatprep.subr.bf16.mxu1 %v8166_v20 }
 0x376   :  { %v394_v3 = vsel %vm144_vm4, %v7897_v2, 0.0 }
 0x377   :  { %395 = vadd.xlane.f32.xlu1 %v394_v3  ;;  %v513_v18 = vpop.permute.xlu1 %512 }
 0x378   :  { %v518_v35 = vsel %vm58_vm1, %v513_v18, 0 }
 0x379   :  { %v7899_v4 = vpop.eup %7898 }
 0x37a   :  { %v397_v5 = vsel %vm144_vm4, %v7899_v4, 0.0 }
 0x37b   :  { %398 = vadd.xlane.f32.xlu1 %v397_v5  ;;  %v564_v21 = vpop.permute.xlu1 %563 }
 0x37c   :  { %v569_v42 = vsel %vm58_vm1, %v564_v21, 0 }
 0x37d   :  { %v7901_v6 = vpop.eup %7900 }
 0x37e   :  { %v400_v7 = vsel %vm144_vm4, %v7901_v6, 0.0 }
 0x37f   :  { %401 = vadd.xlane.f32.xlu1 %v400_v7 }
 0x381   :  { %v7903_v8 = vpop.eup %7902 }
 0x382   :  { %v403_v9 = vsel %vm144_vm4, %v7903_v8, 0.0 }
 0x383   :  { %404 = vadd.xlane.f32.xlu1 %v403_v9 }
 0x394   :  { %510 = vrot.lane.b32.xlu1 %v8309_v31, %s8171_s1 }
 0x398   :  { %561 = vrot.lane.b32.xlu1 %v8313_v33, %s8171_s1 }
 0x400   :  { %v396_v24 = vpop.xlane.xlu1 %395 }
 0x401   :  { %7904 = vrcp.f32 %v396_v24 }
 0x404   :  { %v399_v25 = vpop.xlane.xlu1 %398 }
 0x405   :  { %7906 = vrcp.f32 %v399_v25 }
 0x408   :  { %v402_v26 = vpop.xlane.xlu1 %401 }
 0x409   :  { %7908 = vrcp.f32 %v402_v26 }
 0x40c   :  { %v405_v27 = vpop.xlane.xlu1 %404 }
 0x40d   :  { %7910 = vrcp.f32 %v405_v27 }
 0x40e   :  { %v7905_v28 = vpop.eup %7904 }
 0x40f   :  { %v410_v30 = vmul.f32 %v7905_v28, %v7897_v2 }
 0x410   :  { %v511_v41 = vpop.permute.xlu1 %510 }
 0x412   :  { %v7907_v29 = vpop.eup %7906 }
 0x413   :  { %v411_v32 = vmul.f32 %v7907_v29, %v7899_v4 }
 0x414   :  { %v562_v43 = vpop.permute.xlu1 %561 }
 0x415   :  { %v414_v34 = vpack.c.bf16 %v411_v32, %v410_v30 }
 0x416   :  { %v7909_v36 = vpop.eup %7908 }
 0x417   :  { %7094 = vmatmul.mubr.msk.bf16.vlgmr.msra.gmra.mxu1 %vm144_vm4, %v414_v34  ;;  %v412_v38 = vmul.f32 %v7909_v36, %v7901_v6 }
 0x418   :  { %7104 = vmatpush3.bf16.xpose.msra.mxu1 %v518_v35  ;;  %7105 = vmatprep.mubr.msk.bf16.mxu1 %vm8167_vm3, %v8166_v20 }
 0x419   :  { %7115 = vmatprep.subr.bf16.mxu1 %v8166_v20 }
 0x41a   :  { %v7911_v37 = vpop.eup %7910 }
 0x41b   :  { %v413_v39 = vmul.f32 %v7911_v37, %v7903_v8 }
 0x41d   :  { %v415_v40 = vpack.c.bf16 %v413_v39, %v412_v38 }
 0x41f   :  { %7100 = vmatmul.mubr.msk.bf16.vlgmr.msra.gmra.mxu0 %vm144_vm4, %v415_v40  ;;  %7106 = vmatmul.mubr.msk.bf16.vlgmr.msra.gmra.mxu1 %vm58_vm1, %v511_v41 }
 0x420   :  { %7110 = vmatpush3.bf16.xpose.msra.mxu0 %v569_v42  ;;  %7111 = vmatprep.mubr.msk.bf16.mxu0 %vm8167_vm3, %v8166_v20 }
 0x421   :  { %7121 = vmatprep.subr.bf16.mxu0 %v8166_v20  ;;  %7117 = vmatprep.mubr.msk.bf16.mxu1 %vm8167_vm3, %v8166_v20 }
 0x427   :  { %7112 = vmatmul.mubr.msk.bf16.vlgmr.msra.gmra.mxu0 %vm58_vm1, %v562_v43 }
 0x428   :  { %7123 = vmatprep.mubr.msk.bf16.mxu0 %vm8167_vm3, %v8166_v20 }
 0x4d7   :  { %v8381_v44 = vpop.f32.mrf.mxu1 }
 0x4d9   :  { %v7095_v45 = vpop.f32.mrf.mxu1 }
 0x4db   :  { %v8383_v46 = vpop.f32.mrf.mxu1 }
 0x4dd   :  { %v7096_v47 = vpop.f32.mrf.mxu1 }
 0x4df   :  { %v8385_v48 = vpop.f32.mrf.mxu0  ;;  %v554_v49 = vpop.f32.mrf.mxu1 }
 0x4e0   :  { %v612_v50 = vsel %vm144_vm4, %v554_v49, -inf }
 0x4e1   :  { %613 = vmax.xlane.f32.xlu0 %v612_v50  ;;  %v7101_v51 = vpop.f32.mrf.mxu0  ;;  %v7107_v52 = vpop.f32.mrf.mxu1 }
 0x4e3   :  { %v8388_v53 = vpop.f32.mrf.mxu0  ;;  %v557_v54 = vpop.f32.mrf.mxu1 }
 0x4e4   :  { %v615_v55 = vsel %vm144_vm4, %v557_v54, -inf }
 0x4e5   :  { %616 = vmax.xlane.f32.xlu1 %v615_v55  ;;  %v7102_v56 = vpop.f32.mrf.mxu0  ;;  %v7108_v57 = vpop.f32.mrf.mxu1 }
 0x4e7   :  { %v605_v58 = vpop.f32.mrf.mxu0 }
 0x4e8   :  { %v618_v59 = vsel %vm144_vm4, %v605_v58, -inf }
 0x4e9   :  { %619 = vmax.xlane.f32.xlu0 %v618_v59  ;;  %v7113_v60 = vpop.f32.mrf.mxu0 }
 0x4eb   :  { %v608_v61 = vpop.f32.mrf.mxu0 }
 0x4ec   :  { %v621_v62 = vsel %vm144_vm4, %v608_v61, -inf }
 0x4ed   :  { %622 = vmax.xlane.f32.xlu0 %v621_v62  ;;  %v7114_v63 = vpop.f32.mrf.mxu0 }
 0x4f6   :  { %658 = vrot.lane.b32.xlu1 %v8309_v31, %s8172_s23 }
 0x56a   :  { %v614_v0 = vpop.xlane.xlu0 %613 }
 0x56b   :  { %v624_v1 = vsub.f32 %v554_v49, %v614_v0 }
 0x56d   :  { %v628_v2 = vmul.f32 1.442695, %v624_v1 }
 0x56e   :  { %v617_v3 = vpop.xlane.xlu1 %616 }
 0x56f   :  { %7912 = vpow2.f32 %v628_v2  ;;  %v625_v4 = vsub.f32 %v557_v54, %v617_v3 }
 0x571   :  { %v630_v5 = vmul.f32 1.442695, %v625_v4 }
 0x572   :  { %v659_v6 = vpop.permute.xlu1 %658  ;;  %v620_v7 = vpop.xlane.xlu0 %619 }
 0x573   :  { %7914 = vpow2.f32 %v630_v5  ;;  %v626_v8 = vsub.f32 %v605_v58, %v620_v7  ;;  %7116 = vmatpush3.bf16.msra.mxu1 %v659_v6 }
 0x574   :  { %7127 = vmatprep.subr.bf16.mxu1 %v8166_v20 }
 0x575   :  { %v632_v9 = vmul.f32 1.442695, %v626_v8 }
 0x576   :  { %v623_v12 = vpop.xlane.xlu0 %622 }
 0x577   :  { %7916 = vpow2.f32 %v632_v9  ;;  %v627_v17 = vsub.f32 %v608_v61, %v623_v12 }
 0x579   :  { %v634_v18 = vmul.f32 1.442695, %v627_v17 }
 0x57b   :  { %7918 = vpow2.f32 %v634_v18 }
 0x57c   :  { %v7913_v21 = vpop.eup %7912 }
 0x57d   :  { %v636_v24 = vsel %vm144_vm4, %v7913_v21, 0.0 }
 0x57e   :  { %637 = vadd.xlane.f32.xlu1 %v636_v24 }
 0x580   :  { %v7915_v25 = vpop.eup %7914 }
 0x581   :  { %v639_v26 = vsel %vm144_vm4, %v7915_v25, 0.0 }
 0x582   :  { %640 = vadd.xlane.f32.xlu0 %v639_v26 }
 0x584   :  { %v7917_v27 = vpop.eup %7916 }
 0x585   :  { %v642_v28 = vsel %vm144_vm4, %v7917_v27, 0.0 }
 0x586   :  { %643 = vadd.xlane.f32.xlu1 %v642_v28 }
 0x588   :  { %v7919_v29 = vpop.eup %7918 }
 0x589   :  { %v645_v30 = vsel %vm144_vm4, %v7919_v29, 0.0 }
 0x58a   :  { %646 = vadd.xlane.f32.xlu0 %v645_v30 }
 0x597   :  { %754 = vrot.lane.b32.xlu1 %v8309_v31, %s8173_s24 }
 0x59b   :  { %805 = vrot.lane.b32.xlu1 %v8313_v33, %s8173_s24 }
 0x59f   :  { %803 = vrot.lane.b32.xlu1 %v8313_v33, %s8174_s25 }
 0x5a0   :  { %705 = vrot.lane.b32.xlu0 %v8313_v33, %s8172_s23 }
 0x5a4   :  { %752 = vrot.lane.b32.xlu0 %v8309_v31, %s8174_s25 }
 0x607   :  { %v638_v32 = vpop.xlane.xlu1 %637 }
 0x608   :  { %7920 = vrcp.f32 %v638_v32 }
 0x60b   :  { %v641_v34 = vpop.xlane.xlu0 %640 }
 0x60c   :  { %7922 = vrcp.f32 %v641_v34 }
 0x60f   :  { %v644_v35 = vpop.xlane.xlu1 %643 }
 0x610   :  { %7924 = vrcp.f32 %v644_v35 }
 0x613   :  { %v647_v36 = vpop.xlane.xlu0 %646  ;;  %v755_v42 = vpop.permute.xlu1 %754 }
 0x614   :  { %7926 = vrcp.f32 %v647_v36  ;;  %v760_v45 = vsel %vm58_vm1, %v755_v42, 0 }
 0x615   :  { %v7921_v37 = vpop.eup %7920 }
 0x616   :  { %v652_v40 = vmul.f32 %v7921_v37, %v7913_v21 }
 0x617   :  { %v706_v38 = vpop.permute.xlu0 %705  ;;  %v806_v52 = vpop.permute.xlu1 %805 }
 0x618   :  { %7122 = vmatpush3.bf16.msra.mxu0 %v706_v38  ;;  %v811_v56 = vsel %vm58_vm1, %v806_v52, 0 }
 0x619   :  { %v7923_v39 = vpop.eup %7922  ;;  %7133 = vmatprep.subr.bf16.mxu0 %v8166_v20 }
 0x61a   :  { %v653_v41 = vmul.f32 %v7923_v39, %v7915_v25 }
 0x61b   :  { %v753_v55 = vpop.permute.xlu0 %752  ;;  %v804_v57 = vpop.permute.xlu1 %803 }
 0x61c   :  { %v656_v43 = vpack.c.bf16 %v653_v41, %v652_v40 }
 0x61d   :  { %v7925_v47 = vpop.eup %7924 }
 0x61e   :  { %7118 = vmatmul.mubr.msk.bf16.vlgmr.msra.gmra.mxu1 %vm144_vm4, %v656_v43  ;;  %v654_v50 = vmul.f32 %v7925_v47, %v7917_v27 }
 0x61f   :  { %7128 = vmatpush3.bf16.xpose.msra.mxu1 %v760_v45  ;;  %7129 = vmatprep.mubr.msk.bf16.mxu1 %vm8167_vm3, %v8166_v20 }
 0x620   :  { %7139 = vmatprep.subr.bf16.mxu1 %v8166_v20 }
 0x621   :  { %v7927_v49 = vpop.eup %7926 }
 0x622   :  { %v655_v51 = vmul.f32 %v7927_v49, %v7919_v29 }
 0x624   :  { %v657_v54 = vpack.c.bf16 %v655_v51, %v654_v50 }
 0x626   :  { %7124 = vmatmul.mubr.msk.bf16.vlgmr.msra.gmra.mxu0 %vm144_vm4, %v657_v54  ;;  %7130 = vmatmul.mubr.msk.bf16.vlgmr.msra.gmra.mxu1 %vm58_vm1, %v753_v55 }
 0x627   :  { %7134 = vmatpush3.bf16.xpose.msra.mxu0 %v811_v56  ;;  %7135 = vmatprep.mubr.msk.bf16.mxu0 %vm8167_vm3, %v8166_v20 }
 0x628   :  { %7145 = vmatprep.subr.bf16.mxu0 %v8166_v20  ;;  %7141 = vmatprep.mubr.msk.bf16.mxu1 %vm8167_vm3, %v8166_v20 }
 0x62e   :  { %7136 = vmatmul.mubr.msk.bf16.vlgmr.msra.gmra.mxu0 %vm58_vm1, %v804_v57 }
 0x62f   :  { %7147 = vmatprep.mubr.msk.bf16.mxu0 %vm8167_vm3, %v8166_v20 }
 0x6de   :  { %v8427_v58 = vpop.f32.mrf.mxu1 }
 0x6e0   :  { %v7119_v59 = vpop.f32.mrf.mxu1 }
 0x6e2   :  { %v8429_v60 = vpop.f32.mrf.mxu1 }
 0x6e3   :  { %v7621_v61 = vpack.i.bf16 %v8429_v60, %v8427_v58 }
 0x6e4   :  { %v7120_v62 = vpop.f32.mrf.mxu1 }
 0x6e6   :  { %v8433_v63 = vpop.f32.mrf.mxu0  ;;  %v796_v0 = vpop.f32.mrf.mxu1 }
 0x6e7   :  { %v854_v1 = vsel %vm144_vm4, %v796_v0, -inf }
 0x6e8   :  { %855 = vmax.xlane.f32.xlu0 %v854_v1  ;;  %v7125_v2 = vpop.f32.mrf.mxu0  ;;  %v7131_v3 = vpop.f32.mrf.mxu1 }
 0x6ea   :  { %v8436_v4 = vpop.f32.mrf.mxu0  ;;  %v799_v5 = vpop.f32.mrf.mxu1 }
 0x6eb   :  { %v7626_v6 = vpack.i.bf16 %v8436_v4, %v8433_v63  ;;  %v857_v7 = vsel %vm144_vm4, %v799_v5, -inf }
 0x6ec   :  { %858 = vmax.xlane.f32.xlu1 %v857_v7  ;;  %v7126_v8 = vpop.f32.mrf.mxu0  ;;  %v7132_v9 = vpop.f32.mrf.mxu1 }
 0x6ee   :  { %v847_v12 = vpop.f32.mrf.mxu0 }
 0x6ef   :  { %v860_v17 = vsel %vm144_vm4, %v847_v12, -inf }
 0x6f0   :  { %861 = vmax.xlane.f32.xlu0 %v860_v17  ;;  %v7137_v18 = vpop.f32.mrf.mxu0 }
 0x6f2   :  { %v850_v21 = vpop.f32.mrf.mxu0 }
 0x6f3   :  { %v863_v24 = vsel %vm144_vm4, %v850_v21, -inf }
 0x6f4   :  { %864 = vmax.xlane.f32.xlu0 %v863_v24  ;;  %v7138_v25 = vpop.f32.mrf.mxu0 }
 0x6fd   :  { %900 = vrot.lane.b32.xlu1 %v8309_v31, %s8175_s26 }
 0x771   :  { %v856_v26 = vpop.xlane.xlu0 %855 }
 0x772   :  { %v866_v27 = vsub.f32 %v796_v0, %v856_v26 }
 0x774   :  { %v870_v28 = vmul.f32 1.442695, %v866_v27 }
 0x775   :  { %v859_v29 = vpop.xlane.xlu1 %858 }
 0x776   :  { %7928 = vpow2.f32 %v870_v28  ;;  %v867_v30 = vsub.f32 %v799_v5, %v859_v29 }
 0x778   :  { %v872_v32 = vmul.f32 1.442695, %v867_v30 }
 0x779   :  { %v901_v34 = vpop.permute.xlu1 %900  ;;  %v862_v35 = vpop.xlane.xlu0 %861 }
 0x77a   :  { %7930 = vpow2.f32 %v872_v32  ;;  %v868_v36 = vsub.f32 %v847_v12, %v862_v35  ;;  %7140 = vmatpush3.bf16.msra.mxu1 %v901_v34 }
 0x77b   :  { %7151 = vmatprep.subr.bf16.mxu1 %v8166_v20 }
 0x77c   :  { %v874_v37 = vmul.f32 1.442695, %v868_v36 }
 0x77d   :  { %v865_v38 = vpop.xlane.xlu0 %864 }
 0x77e   :  { %7932 = vpow2.f32 %v874_v37  ;;  %v869_v39 = vsub.f32 %v850_v21, %v865_v38 }
 0x780   :  { %v876_v40 = vmul.f32 1.442695, %v869_v39 }
 0x782   :  { %7934 = vpow2.f32 %v876_v40 }
 0x783   :  { %v7929_v41 = vpop.eup %7928 }
 0x784   :  { %v878_v42 = vsel %vm144_vm4, %v7929_v41, 0.0 }
 0x785   :  { %879 = vadd.xlane.f32.xlu1 %v878_v42 }
 0x787   :  { %v7931_v43 = vpop.eup %7930 }
 0x788   :  { %v881_v45 = vsel %vm144_vm4, %v7931_v43, 0.0 }
 0x789   :  { %882 = vadd.xlane.f32.xlu0 %v881_v45 }
 0x78b   :  { %v7933_v47 = vpop.eup %7932 }
 0x78c   :  { %v884_v49 = vsel %vm144_vm4, %v7933_v47, 0.0 }
 0x78d   :  { %885 = vadd.xlane.f32.xlu1 %v884_v49 }
 0x78f   :  { %v7935_v50 = vpop.eup %7934 }
 0x790   :  { %v887_v51 = vsel %vm144_vm4, %v7935_v50, 0.0 }
 0x791   :  { %888 = vadd.xlane.f32.xlu0 %v887_v51 }
 0x79e   :  { %996 = vrot.lane.b32.xlu1 %v8309_v31, %s8176_s2 }
 0x7a2   :  { %1047 = vrot.lane.b32.xlu1 %v8313_v33, %s8176_s2 }
 0x7a6   :  { %1045 = vrot.lane.b32.xlu1 %v8313_v33, %s8177_s27 }
 0x7a7   :  { %947 = vrot.lane.b32.xlu0 %v8313_v33, %s8175_s26 }
 0x7ab   :  { %994 = vrot.lane.b32.xlu0 %v8309_v31, %s8177_s27 }
 0x80e   :  { %v880_v52 = vpop.xlane.xlu1 %879 }
 0x80f   :  { %7936 = vrcp.f32 %v880_v52 }
 0x812   :  { %v883_v54 = vpop.xlane.xlu0 %882 }
 0x813   :  { %7938 = vrcp.f32 %v883_v54 }
 0x816   :  { %v886_v55 = vpop.xlane.xlu1 %885 }
 0x817   :  { %7940 = vrcp.f32 %v886_v55 }
 0x81a   :  { %v889_v56 = vpop.xlane.xlu0 %888  ;;  %v997_v2 = vpop.permute.xlu1 %996 }
 0x81b   :  { %7942 = vrcp.f32 %v889_v56  ;;  %v1002_v5 = vsel %vm58_vm1, %v997_v2, 0 }
 0x81c   :  { %v7937_v57 = vpop.eup %7936 }
 0x81d   :  { %v894_v0 = vmul.f32 %v7937_v57, %v7929_v41 }
 0x81e   :  { %v948_v59 = vpop.permute.xlu0 %947  ;;  %v1048_v17 = vpop.permute.xlu1 %1047 }
 0x81f   :  { %7146 = vmatpush3.bf16.msra.mxu0 %v948_v59  ;;  %v1053_v24 = vsel %vm58_vm1, %v1048_v17, 0 }
 0x820   :  { %v7939_v62 = vpop.eup %7938  ;;  %7157 = vmatprep.subr.bf16.mxu0 %v8166_v20 }
 0x821   :  { %v895_v1 = vmul.f32 %v7939_v62, %v7931_v43 }
 0x822   :  { %v995_v21 = vpop.permute.xlu0 %994  ;;  %v1046_v25 = vpop.permute.xlu1 %1045 }
 0x823   :  { %v898_v3 = vpack.c.bf16 %v895_v1, %v894_v0 }
 0x824   :  { %v7941_v7 = vpop.eup %7940 }
 0x825   :  { %7142 = vmatmul.mubr.msk.bf16.vlgmr.msra.gmra.mxu1 %vm144_vm4, %v898_v3  ;;  %v896_v9 = vmul.f32 %v7941_v7, %v7933_v47 }
 0x826   :  { %7152 = vmatpush3.bf16.xpose.msra.mxu1 %v1002_v5  ;;  %7153 = vmatprep.mubr.msk.bf16.mxu1 %vm8167_vm3, %v8166_v20 }
 0x827   :  { %7163 = vmatprep.subr.bf16.mxu1 %v8166_v20 }
 0x828   :  { %v7943_v8 = vpop.eup %7942 }
 0x829   :  { %v897_v12 = vmul.f32 %v7943_v8, %v7935_v50 }
 0x82b   :  { %v899_v18 = vpack.c.bf16 %v897_v12, %v896_v9 }
 0x82d   :  { %7148 = vmatmul.mubr.msk.bf16.vlgmr.msra.gmra.mxu0 %vm144_vm4, %v899_v18  ;;  %7154 = vmatmul.mubr.msk.bf16.vlgmr.msra.gmra.mxu1 %vm58_vm1, %v995_v21 }
 0x82e   :  { %7158 = vmatpush3.bf16.xpose.msra.mxu0 %v1053_v24  ;;  %7159 = vmatprep.mubr.msk.bf16.mxu0 %vm8167_vm3, %v8166_v20 }
 0x82f   :  { %7169 = vmatprep.subr.bf16.mxu0 %v8166_v20  ;;  %7165 = vmatprep.mubr.msk.bf16.mxu1 %vm8167_vm3, %v8166_v20 }
 0x835   :  { %7160 = vmatmul.mubr.msk.bf16.vlgmr.msra.gmra.mxu0 %vm58_vm1, %v1046_v25 }
 0x836   :  { %7171 = vmatprep.mubr.msk.bf16.mxu0 %vm8167_vm3, %v8166_v20 }
 0x8e5   :  { %v940_v26 = vpop.f32.mrf.mxu1 }
 0x8e7   :  { %v7143_v27 = vpop.f32.mrf.mxu1 }
 0x8e9   :  { %v943_v28 = vpop.f32.mrf.mxu1 }
 0x8ea   :  { %v7631_v29 = vpack.i.bf16 %v943_v28, %v940_v26 }
 0x8eb   :  { %v7144_v30 = vpop.f32.mrf.mxu1 }
 0x8ed   :  { %v987_v32 = vpop.f32.mrf.mxu0  ;;  %v1038_v34 = vpop.f32.mrf.mxu1 }
 0x8ee   :  { %v1096_v35 = vsel %vm144_vm4, %v1038_v34, -inf }
 0x8ef   :  { %1097 = vmax.xlane.f32.xlu0 %v1096_v35  ;;  %v7149_v36 = vpop.f32.mrf.mxu0  ;;  %v7155_v37 = vpop.f32.mrf.mxu1 }
 0x8f0   :  { %v7810_v36 = vld [vmem:[%s9792_s6 + $0x8] sm:$0xff]  }
 0x8f1   :  { %v990_v38 = vpop.f32.mrf.mxu0  ;;  %v1041_v39 = vpop.f32.mrf.mxu1 }
 0x8f2   :  { %v7636_v40 = vpack.i.bf16 %v990_v38, %v987_v32  ;;  %v1099_v41 = vsel %vm144_vm4, %v1041_v39, -inf  ;;  %v7811_v38 = vld [vmem:[%s9792_s6] sm:$0xff]  }
 0x8f3   :  { %1100 = vmax.xlane.f32.xlu1 %v1099_v41  ;;  %v7150_v42 = vpop.f32.mrf.mxu0  ;;  %v7156_v43 = vpop.f32.mrf.mxu1 }
 0x8f5   :  { %v1089_v45 = vpop.f32.mrf.mxu0 }
 0x8f6   :  { %v1102_v47 = vsel %vm144_vm4, %v1089_v45, -inf }
 0x8f7   :  { %1103 = vmax.xlane.f32.xlu0 %v1102_v47  ;;  %v7161_v49 = vpop.f32.mrf.mxu0 }
 0x8f9   :  { %v1092_v50 = vpop.f32.mrf.mxu0 }
 0x8fa   :  { %v1105_v51 = vsel %vm144_vm4, %v1092_v50, -inf }
 0x8fb   :  { %1106 = vmax.xlane.f32.xlu0 %v1105_v51  ;;  %v7162_v52 = vpop.f32.mrf.mxu0 }
 0x978   :  { %v1098_v54 = vpop.xlane.xlu0 %1097 }
 0x979   :  { %v1108_v55 = vsub.f32 %v1038_v34, %v1098_v54 }
 0x97b   :  { %v1112_v56 = vmul.f32 1.442695, %v1108_v55 }
 0x97c   :  { %v1101_v57 = vpop.xlane.xlu1 %1100 }
 0x97d   :  { %7944 = vpow2.f32 %v1112_v56  ;;  %v1109_v59 = vsub.f32 %v1041_v39, %v1101_v57 }
 0x97f   :  { %v1114_v62 = vmul.f32 1.442695, %v1109_v59 }
 0x980   :  { %v1104_v0 = vpop.xlane.xlu0 %1103 }
 0x981   :  { %7946 = vpow2.f32 %v1114_v62  ;;  %v1110_v1 = vsub.f32 %v1089_v45, %v1104_v0 }
 0x983   :  { %v1116_v2 = vmul.f32 1.442695, %v1110_v1 }
 0x984   :  { %v1107_v3 = vpop.xlane.xlu0 %1106 }
 0x985   :  { %7948 = vpow2.f32 %v1116_v2  ;;  %v1111_v5 = vsub.f32 %v1092_v50, %v1107_v3 }
 0x987   :  { %v1118_v7 = vmul.f32 1.442695, %v1111_v5 }
 0x989   :  { %7950 = vpow2.f32 %v1118_v7 }
 0x98a   :  { %v7945_v8 = vpop.eup %7944 }
 0x98b   :  { %v1120_v9 = vsel %vm144_vm4, %v7945_v8, 0.0 }
 0x98c   :  { %1121 = vadd.xlane.f32.xlu1 %v1120_v9 }
 0x98e   :  { %v7947_v12 = vpop.eup %7946 }
 0x98f   :  { %v1123_v17 = vsel %vm144_vm4, %v7947_v12, 0.0 }
 0x990   :  { %1124 = vadd.xlane.f32.xlu0 %v1123_v17 }
 0x992   :  { %v7949_v18 = vpop.eup %7948 }
 0x993   :  { %v1126_v21 = vsel %vm144_vm4, %v7949_v18, 0.0 }
 0x994   :  { %1127 = vadd.xlane.f32.xlu1 %v1126_v21 }
 0x996   :  { %v7951_v24 = vpop.eup %7950 }
 0x997   :  { %v1129_v25 = vsel %vm144_vm4, %v7951_v24, 0.0 }
 0x998   :  { %1130 = vadd.xlane.f32.xlu0 %v1129_v25 }
 0x9a5   :  { %1142 = vrot.lane.b32.xlu1 %v8309_v31, %s8178_s28 }
 0x9a9   :  { %7622 = vrot.lane.b32.xlu1 %v7621_v61, %s8179_s29 }
 0x9ad   :  { %7627 = vrot.lane.b32.xlu1 %v7626_v6, %s8179_s29 }
 0x9ae   :  { %1189 = vrot.lane.b32.xlu0 %v8313_v33, %s8178_s28 }
 0x9b1   :  { %7637 = vrot.lane.b32.xlu1 %v7636_v40, %s8180_s30 }
 0x9b2   :  { %7632 = vrot.lane.b32.xlu0 %v7631_v29, %s8180_s30 }
 0xa15   :  { %v1122_v31 = vpop.xlane.xlu1 %1121 }
 0xa16   :  { %7952 = vrcp.f32 %v1122_v31 }
 0xa19   :  { %v1125_v26 = vpop.xlane.xlu0 %1124 }
 0xa1a   :  { %7954 = vrcp.f32 %v1125_v26 }
 0xa1d   :  { %v1128_v27 = vpop.xlane.xlu1 %1127 }
 0xa1e   :  { %7956 = vrcp.f32 %v1128_v27 }
 0xa21   :  { %v1143_v58 = vpop.permute.xlu1 %1142  ;;  %v1131_v60 = vpop.xlane.xlu0 %1130 }
 0xa22   :  { %7958 = vrcp.f32 %v1131_v60  ;;  %7164 = vmatpush3.bf16.msra.mxu1 %v1143_v58 }
 0xa23   :  { %v7953_v63 = vpop.eup %7952  ;;  %7175 = vmatprep.subr.bf16.mxu1 %v7810_v36 }
 0xa24   :  { %v1136_v6 = vmul.f32 %v7953_v63, %v7945_v8 }
 0xa25   :  { %v1190_v61 = vpop.permute.xlu0 %1189  ;;  %v7623_v51 = vpop.permute.xlu1 %7622 }
 0xa26   :  { %7170 = vmatpush3.bf16.msra.mxu0 %v1190_v61  ;;  %v7625_v55 = vunpack.i.h.bf16 %v7623_v51  ;;  %v7624_v56 = vunpack.i.l.bf16 %v7623_v51 }
 0xa27   :  { %v7955_v4 = vpop.eup %7954 }
 0xa28   :  { %v1137_v33 = vmul.f32 %v7955_v4, %v7947_v12  ;;  %v1285_v0 = vsel %vm58_vm1, %v8383_v46, %v7625_v55  ;;  %v1284_v1 = vsel %vm58_vm1, %v8381_v44, %v7624_v56 }
 0xa29   :  { %v7633_v52 = vpop.permute.xlu0 %7632  ;;  %v7628_v54 = vpop.permute.xlu1 %7627 }
 0xa2a   :  { %v1140_v28 = vpack.c.bf16 %v1137_v33, %v1136_v6  ;;  %v7635_v57 = vunpack.i.h.bf16 %v7633_v52  ;;  %v7634_v59 = vunpack.i.l.bf16 %v7633_v52  ;;  %v7630_v17 = vunpack.i.h.bf16 %v7628_v54 }
 0xa2b   :  { %v7957_v30 = vpop.eup %7956  ;;  %v8528_v33 = vsub.s32 1, %v8291_v19 }
 0xa2c   :  { %7166 = vmatmul.mubr.msk.bf16.vlgmr.msra.gmra.mxu1 %vm144_vm4, %v1140_v28  ;;  %v1138_v32 = vmul.f32 %v7957_v30, %v7949_v18  ;;  %v1289_v5 = vsel %vm144_vm4, %v1285_v0, %v7635_v57  ;;  %v1288_v7 = vsel %vm144_vm4, %v1284_v1, %v7634_v59  ;;  %v7629_v18 = vunpack.i.l.bf16 %v7628_v54 }
 0xa2d   :  { %7176 = vmatpush3.bf16.msra.mxu1 %v7810_v36  ;;  %v7638_v8 = vpop.permute.xlu1 %7637  ;;  %v1287_v44 = vsel %vm58_vm1, %v8388_v53, %v7630_v17  ;;  %v1377_v30 = vrot.slane %v8301_v23, %v8528_v33 }
 0xa2e   :  { %7177 = vmatprep.subr.bf16.mxu1 %v7811_v38  ;;  %v7639_v25 = vunpack.i.l.bf16 %v7638_v8  ;;  %v1286_v31 = vsel %vm58_vm1, %v8385_v48, %v7629_v18 }
 0xa2f   :  { %v7959_v29 = vpop.eup %7958 }
 0xa30   :  { %v1139_v34 = vmul.f32 %v7959_v29, %v7951_v24  ;;  %v7640_v24 = vunpack.i.h.bf16 %v7638_v8  ;;  %v1290_v58 = vsel %vm144_vm4, %v1286_v31, %v7639_v25 }
 0xa31   :  { %7178 = vmatpush3.bf16.msra.mxu1 %v7811_v38 }
 0xa32   :  { %v1141_v35 = vpack.c.bf16 %v1139_v34, %v1138_v32  ;;  %v1291_v60 = vsel %vm144_vm4, %v1287_v44, %v7640_v24 }
 0xa34   :  { %7172 = vmatmul.mubr.msk.bf16.vlgmr.msra.gmra.mxu0 %vm144_vm4, %v1141_v35 }
 0xaec   :  { %v1182_v37 = vpop.f32.mrf.mxu1 }
 0xaee   :  { %v7167_v39 = vpop.f32.mrf.mxu1 }
 0xaf0   :  { %v1185_v40 = vpop.f32.mrf.mxu1 }
 0xaf1   :  { %v7641_v41 = vpack.i.bf16 %v1185_v40, %v1182_v37 }
 0xaf2   :  { %v7168_v42 = vpop.f32.mrf.mxu1 }
 0xaf3   :  { %7642 = vrot.lane.b32.xlu0 %v7641_v41, %s8181_s16 }
 0xaf4   :  { %v1229_v43 = vpop.f32.mrf.mxu0 }
 0xaf6   :  { %v7173_v45 = vpop.f32.mrf.mxu0 }
 0xaf8   :  { %v1232_v47 = vpop.f32.mrf.mxu0 }
 0xaf9   :  { %v7646_v49 = vpack.i.bf16 %v1232_v47, %v1229_v43 }
 0xafa   :  { %v7174_v50 = vpop.f32.mrf.mxu0 }
 0xafb   :  { %7647 = vrot.lane.b32.xlu1 %v7646_v49, %s8181_s16 }
 0xb65   :  { %v7643_v62 = vpop.permute.xlu0 %7642 }
 0xb66   :  { %v7645_v2 = vunpack.i.h.bf16 %v7643_v62  ;;  %v7644_v3 = vunpack.i.l.bf16 %v7643_v62 }
 0xb68   :  { %v1293_v9 = vsel %vm1292_vm5, %v1288_v7, %v7644_v3  ;;  %v1294_v12 = vsel %vm1292_vm5, %v1289_v5, %v7645_v2  ;;  %v7812_v3 = vld [vmem:[%s9793_s7 + $0x8] sm:$0xff]   ;;  %v7813_v5 = vld [vmem:[%s9793_s7] sm:$0xff]   ;;  %v7814_v7 = vld [vmem:[%s9794_s8 + $0x18] sm:$0xff]  }
 0xb69   :  { %v1297_v21 = vpack.c.bf16 %v1294_v12, %v1293_v9  ;;  %7183 = vmatprep.subr.bf16.mxu0 %v7812_v3  ;;  %7191 = vmatprep.subr.bf16.mxu1 %v7814_v7 }
 0xb6a   :  { %7184 = vmatpush3.bf16.msra.mxu0 %v7812_v3 }
 0xb6b   :  { %7179 = vmatprep.mubr.msk.bf16.mxu1 %vm212_vm2, %v1297_v21  ;;  %7185 = vmatprep.subr.bf16.mxu0 %v7813_v5 }
 0xb6d   :  { %v7648_v46 = vpop.permute.xlu1 %7647 }
 0xb6e   :  { %v7650_v26 = vunpack.i.h.bf16 %v7648_v46  ;;  %v7649_v27 = vunpack.i.l.bf16 %v7648_v46  ;;  %7186 = vmatpush3.bf16.msra.mxu0 %v7813_v5 }
 0xb70   :  { %v1296_v61 = vsel %vm1292_vm5, %v1291_v60, %v7650_v26  ;;  %v1295_v63 = vsel %vm1292_vm5, %v1290_v58, %v7649_v27  ;;  %v8554_v27 = vsub.s32 4, %v8291_v19 }
 0xb71   :  { %v1298_v4 = vpack.c.bf16 %v1296_v61, %v1295_v63  ;;  %v8559_v61 = vld [vmem:[%s9795_s9] sm:$0xff] }
 0xb72   :  { %v1438_v63 = vrot.slane %v8559_v61, %v8554_v27 }
 0xb73   :  { %7180 = vmatmul.mubr.msk.bf16.vlgmr.msra.gmra.mxu1 %vm212_vm2, %v1298_v4  ;;  %v8564_v4 = vsub.s32 5, %v8291_v19 }
 0xb74   :  { %7192 = vmatpush3.bf16.msra.mxu1 %v7814_v7 }
 0xc33   :  { %v7181_v53 = vpop.f32.mrf.mxu1 }
 0xc34   :  { %v1372_v48 = vadd.f32 %v7181_v53, %v8283_v15 }
 0xc35   :  { %v1355_v6 = vpop.f32.mrf.mxu1 }
 0xc36   :  { %v1370_v28 = vadd.f32 %v1355_v6, %v8279_v13  ;;  %v1380_v38 = vadd.f32 %v1377_v30, %v1372_v48 }
 0xc37   :  { %v7182_v29 = vpop.f32.mrf.mxu1 }
 0xc38   :  { %v1378_v32 = vadd.f32 %v1377_v30, %v1370_v28  ;;  %v1373_v35 = vadd.f32 %v7182_v29, %v8277_v11  ;;  %v1388_v40 = vsel %vm212_vm2, %v1380_v38, 0.0 }
 0xc39   :  { %v1358_v34 = vpop.f32.mrf.mxu1 }
 0xc3a   :  { %v1371_v36 = vadd.f32 %v1358_v34, %v8281_v14  ;;  %v1382_v37 = vsel %vm212_vm2, %v1378_v32, 0.0  ;;  %v1381_v13 = vadd.f32 %v1377_v30, %v1373_v35 }
 0xc3b   :  { %1383 = vadd.xlane.f32.xlu0 %v1382_v37 }
 0xc3c   :  { %v1379_v39 = vadd.f32 %v1377_v30, %v1371_v36  ;;  %v1391_v23 = vsel %vm212_vm2, %v1381_v13, 0.0  ;;  %v1446_v30 = vrot.slane %v8559_v61, %v8564_v4 }
 0xc3e   :  { %v1385_v15 = vsel %vm212_vm2, %v1379_v39, 0.0 }
 0xc3f   :  { %1389 = vadd.xlane.f32.xlu0 %v1388_v40  ;;  %1386 = vadd.xlane.f32.xlu1 %v1385_v15 }
 0xc43   :  { %1392 = vadd.xlane.f32.xlu0 %v1391_v23 }
 0xcc4   :  { %v1384_v41 = vpop.xlane.xlu0 %1383 }
 0xcc5   :  { %v1395_v42 = vmul.f32 0.03125, %v1384_v41  ;;  %v7815_v41 = vld [vmem:[%s9794_s8 + $0x10] sm:$0xff]  }
 0xcc6   :  { %7193 = vmatprep.subr.bf16.mxu1 %v7815_v41 }
 0xcc7   :  { %v1399_v11 = vsub.f32 %v1378_v32, %v1395_v42  ;;  %7194 = vmatpush3.bf16.msra.mxu1 %v7815_v41  ;;  %v7816_v42 = vld [vmem:[%s9794_s8 + $0x8] sm:$0xff]  }
 0xcc8   :  { %v1390_v43 = vpop.xlane.xlu0 %1389  ;;  %v1387_v14 = vpop.xlane.xlu1 %1386  ;;  %7195 = vmatprep.subr.bf16.mxu1 %v7816_v42 }
 0xcc9   :  { %v1397_v45 = vmul.f32 0.03125, %v1390_v43  ;;  %v1396_v47 = vmul.f32 0.03125, %v1387_v14  ;;  %v1403_v49 = vmul.f32 %v1399_v11, %v1399_v11  ;;  %v8581_v43 = vsub.s32 2, %v8291_v19 }
 0xccb   :  { %v1401_v50 = vsub.f32 %v1380_v38, %v1397_v45  ;;  %v1400_v51 = vsub.f32 %v1379_v39, %v1396_v47  ;;  %v1407_v52 = vsel %vm212_vm2, %v1403_v49, 0.0  ;;  %7196 = vmatpush3.bf16.msra.mxu1 %v7816_v42  ;;  %v1460_v45 = vrot.slane %v8559_v61, %v8581_v43 }
 0xccc   :  { %v1393_v54 = vpop.xlane.xlu0 %1392  ;;  %1408 = vadd.xlane.f32.xlu1 %v1407_v52 }
 0xccd   :  { %v1398_v55 = vmul.f32 0.03125, %v1393_v54  ;;  %v1405_v56 = vmul.f32 %v1401_v50, %v1401_v50  ;;  %v1404_v57 = vmul.f32 %v1400_v51, %v1400_v51 }
 0xccf   :  { %v1402_v59 = vsub.f32 %v1381_v13, %v1398_v55  ;;  %v1413_v62 = vsel %vm212_vm2, %v1405_v56, 0.0  ;;  %v1410_v0 = vsel %vm212_vm2, %v1404_v57, 0.0 }
 0xcd0   :  { %1414 = vadd.xlane.f32.xlu1 %v1413_v62  ;;  %1411 = vadd.xlane.f32.xlu0 %v1410_v0 }
 0xcd1   :  { %v1406_v1 = vmul.f32 %v1402_v59, %v1402_v59 }
 0xcd3   :  { %v1416_v2 = vsel %vm212_vm2, %v1406_v1, 0.0 }
 0xcd4   :  { %1417 = vadd.xlane.f32.xlu0 %v1416_v2  ;;  %v8590_v2 = vsub.s32 3, %v8291_v19 }
 0xcd6   :  { %v1545_v3 = vrot.slane %v8559_v61, %v8590_v2 }
 0xd55   :  { %v1409_v8 = vpop.xlane.xlu1 %1408 }
 0xd56   :  { %v1419_v9 = vmul.f32 0.03125, %v1409_v8 }
 0xd58   :  { %v1423_v12 = vadd.f32 1e-05, %v1419_v9 }
 0xd59   :  { %v1412_v17 = vpop.xlane.xlu0 %1411  ;;  %v1415_v18 = vpop.xlane.xlu1 %1414 }
 0xd5a   :  { %7960 = vrsqrt.f32 %v1423_v12  ;;  %v1420_v21 = vmul.f32 0.03125, %v1412_v17  ;;  %v1421_v24 = vmul.f32 0.03125, %v1415_v18 }
 0xd5c   :  { %v1424_v25 = vadd.f32 1e-05, %v1420_v21  ;;  %v1425_v46 = vadd.f32 1e-05, %v1421_v24 }
 0xd5d   :  { %v1418_v44 = vpop.xlane.xlu0 %1417 }
 0xd5e   :  { %7962 = vrsqrt.f32 %v1424_v25  ;;  %v1422_v31 = vmul.f32 0.03125, %v1418_v44 }
 0xd5f   :  { %7964 = vrsqrt.f32 %v1425_v46 }
 0xd60   :  { %v1426_v26 = vadd.f32 1e-05, %v1422_v31 }
 0xd62   :  { %7966 = vrsqrt.f32 %v1426_v26 }
 0xd67   :  { %v7961_v58 = vpop.eup %7960 }
 0xd68   :  { %v1431_v60 = vmul.f32 %v7961_v58, %v1399_v11  ;;  %v7817_v11 = vld [vmem:[%s9794_s8] sm:$0xff]  }
 0xd69   :  { %7197 = vmatprep.subr.bf16.mxu1 %v7817_v11 }
 0xd6a   :  { %v1439_v28 = vmul.f32 %v1438_v63, %v1431_v60  ;;  %7198 = vmatpush3.bf16.msra.mxu1 %v7817_v11  ;;  %v7818_v11 = vld [vmem:[%s9791_s5 + $0x18] sm:$0xff]  }
 0xd6b   :  { %v7963_v53 = vpop.eup %7962  ;;  %7217 = vmatprep.subr.bf16.mxu1 %v8166_v20  ;;  %7203 = vmatprep.subr.bf16.mxu0 %v7818_v11 }
 0xd6c   :  { %v7965_v6 = vpop.eup %7964  ;;  %v1432_v48 = vmul.f32 %v7963_v53, %v1400_v51  ;;  %v1447_v36 = vadd.f32 %v1446_v30, %v1439_v28 }
 0xd6d   :  { %v1433_v29 = vmul.f32 %v7965_v6, %v1401_v50 }
 0xd6e   :  { %v1440_v32 = vmul.f32 %v1438_v63, %v1432_v48 }
 0xd6f   :  { %v7967_v34 = vpop.eup %7966  ;;  %v1441_v38 = vmul.f32 %v1438_v63, %v1433_v29 }
 0xd70   :  { %v1434_v35 = vmul.f32 %v7967_v34, %v1402_v59  ;;  %v1448_v37 = vadd.f32 %v1446_v30, %v1440_v32 }
 0xd71   :  { %v1449_v15 = vadd.f32 %v1446_v30, %v1441_v38 }
 0xd72   :  { %v1451_v39 = vpack.c.bf16 %v1448_v37, %v1447_v36  ;;  %v1442_v40 = vmul.f32 %v1438_v63, %v1434_v35 }
 0xd74   :  { %7187 = vmatprep.mubr.msk.bf16.mxu0 %vm212_vm2, %v1451_v39  ;;  %v1450_v13 = vadd.f32 %v1446_v30, %v1442_v40 }
 0xd76   :  { %v1452_v23 = vpack.c.bf16 %v1450_v13, %v1449_v15 }
 0xd78   :  { %7188 = vmatmul.mubr.msk.bf16.vlgmr.msra.gmra.mxu0 %vm212_vm2, %v1452_v23 }
 0xd79   :  { %7204 = vmatpush3.bf16.msra.mxu0 %v7818_v11 }
 0xe38   :  { %v7189_v14 = vpop.f32.mrf.mxu0 }
 0xe39   :  { %v1522_v52 = vadd.f32 %v7189_v14, %v1460_v45  ;;  %v7819_v14 = vld [vmem:[%s9791_s5 + $0x10] sm:$0xff]  }
 0xe3a   :  { %v1513_v47 = vpop.f32.mrf.mxu0  ;;  %7205 = vmatprep.subr.bf16.mxu0 %v7819_v14 }
 0xe3b   :  { %v1514_v50 = vadd.f32 %v1513_v47, %v1460_v45  ;;  %v1530_v62 = vmax.f32 %v1522_v52, 0.0  ;;  %7206 = vmatpush3.bf16.msra.mxu0 %v7819_v14 }
 0xe3c   :  { %v7190_v49 = vpop.f32.mrf.mxu0  ;;  %7211 = vmatprep.subr.bf16.mxu0 %v8166_v20 }
 0xe3d   :  { %v1525_v51 = vadd.f32 %v7190_v49, %v1460_v45  ;;  %v1528_v57 = vmax.f32 %v1514_v50, 0.0 }
 0xe3e   :  { %v1516_v54 = vpop.f32.mrf.mxu0 }
 0xe3f   :  { %v1517_v55 = vadd.f32 %v1516_v54, %v1460_v45  ;;  %v1531_v56 = vmax.f32 %v1525_v51, 0.0 }
 0xe41   :  { %v1529_v59 = vmax.f32 %v1517_v55, 0.0  ;;  %v1533_v1 = vpack.c.bf16 %v1531_v56, %v1530_v62 }
 0xe43   :  { %v1532_v0 = vpack.c.bf16 %v1529_v59, %v1528_v57 }
 0xe45   :  { %7199 = vmatprep.mubr.msk.bf16.mxu1 %vm1570_vm6, %v1532_v0  ;;  %v8610_v0 = vsub.s32 6, %v8291_v19 }
 0xe46   :  { %7200 = vmatmul.mubr.msk.bf16.vlgmr.msra.gmra.mxu1 %vm1570_vm6, %v1533_v1 }
 0xe47   :  { %7219 = vmatprep.mubr.msk.bf16.mxu1 %vm8167_vm3, %v8166_v20 }
 0xf06   :  { %v7201_v5 = vpop.f32.mrf.mxu1 }
 0xf07   :  { %v1620_v8 = vadd.f32 %v7201_v5, %v1545_v3  ;;  %v1685_v5 = vrot.slane %v8559_v61, %v8610_v0 }
 0xf08   :  { %v1611_v7 = vpop.f32.mrf.mxu1 }
 0xf09   :  { %v1612_v9 = vadd.f32 %v1611_v7, %v1545_v3  ;;  %v1628_v46 = vadd.f32 %v1620_v8, %v1449_v15  ;;  %v8615_v7 = vsub.s32 7, %v8291_v19 }
 0xf0a   :  { %v7202_v12 = vpop.f32.mrf.mxu1 }
 0xf0b   :  { %v1626_v17 = vadd.f32 %v1612_v9, %v1447_v36  ;;  %v1623_v21 = vadd.f32 %v7202_v12, %v1545_v3  ;;  %v1636_v26 = vsel %vm212_vm2, %v1628_v46, 0.0 }
 0xf0c   :  { %v1614_v18 = vpop.f32.mrf.mxu1 }
 0xf0d   :  { %v1615_v24 = vadd.f32 %v1614_v18, %v1545_v3  ;;  %v1630_v25 = vsel %vm212_vm2, %v1626_v17, 0.0  ;;  %v1629_v58 = vadd.f32 %v1623_v21, %v1450_v13  ;;  %v1693_v18 = vrot.slane %v8559_v61, %v8615_v7 }
 0xf0e   :  { %1631 = vadd.xlane.f32.xlu1 %v1630_v25 }
 0xf0f   :  { %v1627_v44 = vadd.f32 %v1615_v24, %v1448_v37  ;;  %v1639_v60 = vsel %vm212_vm2, %v1629_v58, 0.0 }
 0xf11   :  { %v1633_v31 = vsel %vm212_vm2, %v1627_v44, 0.0 }
 0xf12   :  { %1634 = vadd.xlane.f32.xlu0 %v1633_v31  ;;  %1637 = vadd.xlane.f32.xlu1 %v1636_v26 }
 0xf16   :  { %1640 = vadd.xlane.f32.xlu0 %v1639_v60 }
 0xf97   :  { %v1632_v63 = vpop.xlane.xlu1 %1631 }
 0xf98   :  { %v1642_v53 = vmul.f32 0.03125, %v1632_v63 }
 0xf9a   :  { %v1646_v6 = vsub.f32 %v1626_v17, %v1642_v53  ;;  %v8638_v53 = vld [vmem:[%s9795_s9 + $0x8] sm:$0xff] }
 0xf9b   :  { %v1635_v48 = vpop.xlane.xlu0 %1634  ;;  %v1638_v28 = vpop.xlane.xlu1 %1637 }
 0xf9c   :  { %v1643_v30 = vmul.f32 0.03125, %v1635_v48  ;;  %v1644_v29 = vmul.f32 0.03125, %v1638_v28  ;;  %v1650_v32 = vmul.f32 %v1646_v6, %v1646_v6  ;;  %v1710_v48 = vrot.slane %v8638_v53, %v8296_v22 }
 0xf9e   :  { %v1647_v34 = vsub.f32 %v1627_v44, %v1643_v30  ;;  %v1648_v35 = vsub.f32 %v1628_v46, %v1644_v29  ;;  %v1654_v36 = vsel %vm212_vm2, %v1650_v32, 0.0 }
 0xf9f   :  { %v1641_v37 = vpop.xlane.xlu0 %1640  ;;  %1655 = vadd.xlane.f32.xlu1 %v1654_v36 }
 0xfa0   :  { %v1645_v38 = vmul.f32 0.03125, %v1641_v37  ;;  %v1651_v39 = vmul.f32 %v1647_v34, %v1647_v34  ;;  %v1652_v40 = vmul.f32 %v1648_v35, %v1648_v35 }
 0xfa2   :  { %v1649_v15 = vsub.f32 %v1629_v58, %v1645_v38  ;;  %v1657_v13 = vsel %vm212_vm2, %v1651_v39, 0.0  ;;  %v1660_v23 = vsel %vm212_vm2, %v1652_v40, 0.0 }
 0xfa3   :  { %1658 = vadd.xlane.f32.xlu0 %v1657_v13  ;;  %1661 = vadd.xlane.f32.xlu1 %v1660_v23 }
 0xfa4   :  { %v1653_v41 = vmul.f32 %v1649_v15, %v1649_v15 }
 0xfa6   :  { %v1663_v42 = vsel %vm212_vm2, %v1653_v41, 0.0 }
 0xfa7   :  { %1664 = vadd.xlane.f32.xlu0 %v1663_v42 }
0x1028   :  { %v1656_v45 = vpop.xlane.xlu1 %1655 }
0x1029   :  { %v1666_v47 = vmul.f32 0.03125, %v1656_v45 }
0x102b   :  { %v1670_v49 = vadd.f32 1e-05, %v1666_v47 }
0x102c   :  { %v1659_v50 = vpop.xlane.xlu0 %1658  ;;  %v1662_v51 = vpop.xlane.xlu1 %1661 }
0x102d   :  { %7968 = vrsqrt.f32 %v1670_v49  ;;  %v1667_v52 = vmul.f32 0.03125, %v1659_v50  ;;  %v1668_v54 = vmul.f32 0.03125, %v1662_v51 }
0x102f   :  { %v1671_v55 = vadd.f32 1e-05, %v1667_v52  ;;  %v1672_v56 = vadd.f32 1e-05, %v1668_v54 }
0x1030   :  { %v1665_v57 = vpop.xlane.xlu0 %1664 }
0x1031   :  { %7970 = vrsqrt.f32 %v1671_v55  ;;  %v1669_v59 = vmul.f32 0.03125, %v1665_v57 }
0x1032   :  { %7972 = vrsqrt.f32 %v1672_v56 }
0x1033   :  { %v1673_v62 = vadd.f32 1e-05, %v1669_v59 }
0x1035   :  { %7974 = vrsqrt.f32 %v1673_v62 }
0x103a   :  { %v7969_v1 = vpop.eup %7968 }
0x103b   :  { %v1678_v3 = vmul.f32 %v7969_v1, %v1646_v6 }
0x103d   :  { %v1686_v17 = vmul.f32 %v1685_v5, %v1678_v3 }
0x103e   :  { %v7971_v8 = vpop.eup %7970 }
0x103f   :  { %v7973_v9 = vpop.eup %7972  ;;  %v1679_v12 = vmul.f32 %v7971_v8, %v1647_v34  ;;  %v8619_v44 = vadd.f32 %v1693_v18, %v1686_v17 }
0x1040   :  { %v1680_v21 = vmul.f32 %v7973_v9, %v1648_v35 }
0x1041   :  { %v1687_v24 = vmul.f32 %v1685_v5, %v1679_v12 }
0x1042   :  { %v7975_v25 = vpop.eup %7974  ;;  %v1688_v26 = vmul.f32 %v1685_v5, %v1680_v21 }
0x1043   :  { %v1681_v46 = vmul.f32 %v7975_v25, %v1649_v15  ;;  %v8621_v31 = vadd.f32 %v1693_v18, %v1687_v24 }
0x1044   :  { %v8626_v60 = vadd.f32 %v1693_v18, %v1688_v26 }
0x1045   :  { %v1700_v19 = vpack.c.bf16 %v8621_v31, %v8619_v44  ;;  %v1689_v58 = vmul.f32 %v1685_v5, %v1681_v46 }
0x1047   :  { %7207 = vmatprep.mubr.msk.bf16.mxu0 %vm212_vm2, %v1700_v19  ;;  %v8628_v63 = vadd.f32 %v1693_v18, %v1689_v58 }
0x1049   :  { %v1701_v61 = vpack.c.bf16 %v8628_v63, %v8626_v60 }
0x104b   :  { %7208 = vmatmul.mubr.msk.bf16.vlgmr.msra.gmra.mxu0 %vm212_vm2, %v1701_v61 }
0x104c   :  { %7213 = vmatprep.mubr.msk.bf16.mxu0 %vm8167_vm3, %v8166_v20 }
0x110b   :  { %v7209_v6 = vpop.f32.mrf.mxu0 }
0x110c   :  { %v1772_v29 = vadd.f32 %v7209_v6, %v1710_v48 }
0x110d   :  { %v1763_v28 = vpop.f32.mrf.mxu0 }
0x110e   :  { %v1764_v35 = vadd.f32 %v1763_v28, %v1710_v48 }
0x110f   :  { %v7210_v30 = vpop.f32.mrf.mxu0 }
0x1110   :  { %v1775_v32 = vadd.f32 %v7210_v30, %v1710_v48 }
0x1111   :  { %v1766_v34 = vpop.f32.mrf.mxu0 }
0x1112   :  { %v8642_v36 = vpack.c.bf16 %v1775_v32, %v1772_v29  ;;  %v1767_v37 = vadd.f32 %v1766_v34, %v1710_v48 }
0x1114   :  { %v8644_v38 = vpack.c.bf16 %v1767_v37, %v1764_v35  ;;  %1831 = vrot.lane.b32.xlu0 %v8642_v36, %s8168_s17 }
0x1116   :  { %1781 = vrot.lane.b32.xlu1 %v8644_v38, %s8168_s17 }
0x1186   :  { %v1832_v39 = vpop.permute.xlu0 %1831 }
0x1187   :  { %v1837_v40 = vsel %vm58_vm1, %v1832_v39, 0 }
0x1188   :  { %7218 = vmatpush3.bf16.xpose.msra.mxu1 %v1837_v40  ;;  %v1782_v15 = vpop.permute.xlu1 %1781 }
0x1189   :  { %v1787_v13 = vsel %vm58_vm1, %v1782_v15, 0  ;;  %7229 = vmatprep.subr.bf16.mxu1 %v8166_v20 }
0x118a   :  { %7212 = vmatpush3.bf16.xpose.msra.mxu0 %v1787_v13 }
0x118b   :  { %7223 = vmatprep.subr.bf16.mxu0 %v8166_v20 }
0x118f   :  { %7220 = vmatmul.mubr.msk.bf16.vlgmr.msra.gmra.mxu1 %vm58_vm1, %v8642_v36 }
0x1190   :  { %7231 = vmatprep.mubr.msk.bf16.mxu1 %vm8167_vm3, %v8166_v20 }
0x1191   :  { %7214 = vmatmul.mubr.msk.bf16.vlgmr.msra.gmra.mxu0 %vm58_vm1, %v8644_v38 }
0x1192   :  { %7225 = vmatprep.mubr.msk.bf16.mxu0 %vm8167_vm3, %v8166_v20 }
0x124f   :  { %v1873_v23 = vpop.f32.mrf.mxu1 }
0x1250   :  { %v1886_v50 = vsel %vm144_vm4, %v1873_v23, -inf }
0x1251   :  { %v1823_v41 = vpop.f32.mrf.mxu0  ;;  %v7221_v42 = vpop.f32.mrf.mxu1 }
0x1252   :  { %v1880_v11 = vsel %vm144_vm4, %v1823_v41, -inf }
0x1253   :  { %v1876_v14 = vpop.f32.mrf.mxu1  ;;  %1881 = vmax.xlane.f32.xlu1 %v1880_v11  ;;  %v7215_v45 = vpop.f32.mrf.mxu0 }
0x1254   :  { %v1889_v54 = vsel %vm144_vm4, %v1876_v14, -inf }
0x1255   :  { %v1826_v47 = vpop.f32.mrf.mxu0  ;;  %v7222_v49 = vpop.f32.mrf.mxu1 }
0x1256   :  { %v1883_v51 = vsel %vm144_vm4, %v1826_v47, -inf }
0x1257   :  { %1887 = vmax.xlane.f32.xlu1 %v1886_v50  ;;  %1884 = vmax.xlane.f32.xlu0 %v1883_v51  ;;  %v7216_v52 = vpop.f32.mrf.mxu0 }
0x125b   :  { %1890 = vmax.xlane.f32.xlu0 %v1889_v54 }
0x1268   :  { %1926 = vrot.lane.b32.xlu1 %v8644_v38, %s8169_s22 }
0x12dc   :  { %v1882_v55 = vpop.xlane.xlu1 %1881 }
0x12dd   :  { %v1892_v56 = vsub.f32 %v1823_v41, %v1882_v55 }
0x12df   :  { %v1896_v1 = vmul.f32 1.442695, %v1892_v56 }
0x12e0   :  { %v1888_v57 = vpop.xlane.xlu1 %1887  ;;  %v1885_v59 = vpop.xlane.xlu0 %1884 }
0x12e1   :  { %v1894_v62 = vsub.f32 %v1873_v23, %v1888_v57  ;;  %v1893_v5 = vsub.f32 %v1826_v47, %v1885_v59 }
0x12e3   :  { %v1900_v3 = vmul.f32 1.442695, %v1894_v62  ;;  %v1898_v17 = vmul.f32 1.442695, %v1893_v5 }
0x12e4   :  { %v1927_v8 = vpop.permute.xlu1 %1926  ;;  %v1891_v9 = vpop.xlane.xlu0 %1890 }
0x12e5   :  { %7976 = vpow2.f32 %v1900_v3  ;;  %v1895_v12 = vsub.f32 %v1876_v14, %v1891_v9  ;;  %7224 = vmatpush3.bf16.msra.mxu0 %v1927_v8 }
0x12e6   :  { %7235 = vmatprep.subr.bf16.mxu0 %v8166_v20  ;;  %7978 = vpow2.f32 %v1896_v1 }
0x12e7   :  { %v1902_v18 = vmul.f32 1.442695, %v1895_v12 }
0x12e9   :  { %7980 = vpow2.f32 %v1902_v18 }
0x12ea   :  { %7982 = vpow2.f32 %v1898_v17 }
0x12f2   :  { %v7977_v21 = vpop.eup %7976 }
0x12f3   :  { %v1910_v24 = vsel %vm144_vm4, %v7977_v21, 0.0  ;;  %v7979_v25 = vpop.eup %7978 }
0x12f4   :  { %1911 = vadd.xlane.f32.xlu1 %v1910_v24  ;;  %v1904_v26 = vsel %vm144_vm4, %v7979_v25, 0.0 }
0x12f6   :  { %v7981_v46 = vpop.eup %7980 }
0x12f7   :  { %v1913_v19 = vsel %vm144_vm4, %v7981_v46, 0.0  ;;  %v7983_v58 = vpop.eup %7982 }
0x12f8   :  { %1905 = vadd.xlane.f32.xlu1 %v1904_v26  ;;  %1914 = vadd.xlane.f32.xlu0 %v1913_v19  ;;  %v1907_v61 = vsel %vm144_vm4, %v7983_v58, 0.0 }
0x12fc   :  { %1908 = vadd.xlane.f32.xlu0 %v1907_v61 }
0x1309   :  { %2022 = vrot.lane.b32.xlu1 %v8644_v38, %s8170_s3 }
0x130d   :  { %2073 = vrot.lane.b32.xlu1 %v8642_v36, %s8170_s3 }
0x1311   :  { %2071 = vrot.lane.b32.xlu1 %v8642_v36, %s8171_s1 }
0x1312   :  { %1973 = vrot.lane.b32.xlu0 %v8642_v36, %s8169_s22 }
0x1316   :  { %2020 = vrot.lane.b32.xlu0 %v8644_v38, %s8171_s1 }
0x137d   :  { %v1912_v6 = vpop.xlane.xlu1 %1911 }
0x137e   :  { %7984 = vrcp.f32 %v1912_v6 }
0x1381   :  { %v1906_v48 = vpop.xlane.xlu1 %1905  ;;  %v1915_v28 = vpop.xlane.xlu0 %1914 }
0x1382   :  { %7986 = vrcp.f32 %v1915_v28 }
0x1383   :  { %7988 = vrcp.f32 %v1906_v48 }
0x1385   :  { %v1909_v30 = vpop.xlane.xlu0 %1908  ;;  %v2023_v32 = vpop.permute.xlu1 %2022 }
0x1386   :  { %7990 = vrcp.f32 %v1909_v30  ;;  %v2028_v45 = vsel %vm58_vm1, %v2023_v32, 0 }
0x1389   :  { %v1974_v29 = vpop.permute.xlu0 %1973  ;;  %v2074_v15 = vpop.permute.xlu1 %2073 }
0x138a   :  { %7230 = vmatpush3.bf16.msra.mxu1 %v1974_v29  ;;  %v2079_v11 = vsel %vm58_vm1, %v2074_v15, 0 }
0x138b   :  { %7241 = vmatprep.subr.bf16.mxu1 %v8166_v20  ;;  %v7985_v34 = vpop.eup %7984 }
0x138c   :  { %v1922_v39 = vmul.f32 %v7985_v34, %v7977_v21 }
0x138d   :  { %v2072_v47 = vpop.permute.xlu1 %2071  ;;  %v2021_v49 = vpop.permute.xlu0 %2020 }
0x138f   :  { %v7987_v35 = vpop.eup %7986 }
0x1390   :  { %v7989_v37 = vpop.eup %7988  ;;  %v1923_v40 = vmul.f32 %v7987_v35, %v7981_v46 }
0x1391   :  { %v1920_v41 = vmul.f32 %v7989_v37, %v7979_v25 }
0x1392   :  { %v1925_v23 = vpack.c.bf16 %v1923_v40, %v1922_v39 }
0x1393   :  { %v7991_v13 = vpop.eup %7990 }
0x1394   :  { %v1921_v42 = vmul.f32 %v7991_v13, %v7983_v58  ;;  %7232 = vmatmul.mubr.msk.bf16.vlgmr.msra.gmra.mxu1 %vm144_vm4, %v1925_v23 }
0x1395   :  { %7242 = vmatpush3.bf16.xpose.msra.mxu1 %v2079_v11  ;;  %7243 = vmatprep.mubr.msk.bf16.mxu1 %vm8167_vm3, %v8166_v20 }
0x1396   :  { %v1924_v14 = vpack.c.bf16 %v1921_v42, %v1920_v41  ;;  %7253 = vmatprep.subr.bf16.mxu1 %v8166_v20 }
0x1398   :  { %7226 = vmatmul.mubr.msk.bf16.vlgmr.msra.gmra.mxu0 %vm144_vm4, %v1924_v14 }
0x1399   :  { %7236 = vmatpush3.bf16.xpose.msra.mxu0 %v2028_v45  ;;  %7237 = vmatprep.mubr.msk.bf16.mxu0 %vm8167_vm3, %v8166_v20 }
0x139a   :  { %7247 = vmatprep.subr.bf16.mxu0 %v8166_v20 }
0x139c   :  { %7244 = vmatmul.mubr.msk.bf16.vlgmr.msra.gmra.mxu1 %vm58_vm1, %v2072_v47 }
0x139d   :  { %7255 = vmatprep.mubr.msk.bf16.mxu1 %vm8167_vm3, %v8166_v20 }
0x13a0   :  { %7238 = vmatmul.mubr.msk.bf16.vlgmr.msra.gmra.mxu0 %vm58_vm1, %v2021_v49 }
0x13a1   :  { %7249 = vmatprep.mubr.msk.bf16.mxu0 %vm8167_vm3, %v8166_v20 }
0x1454   :  { %v8700_v50 = vpop.f32.mrf.mxu1 }
0x1456   :  { %v7233_v51 = vpop.f32.mrf.mxu1 }
0x1458   :  { %v8702_v52 = vpop.f32.mrf.mxu0  ;;  %v8704_v54 = vpop.f32.mrf.mxu1 }
0x145a   :  { %v7227_v55 = vpop.f32.mrf.mxu0  ;;  %v7234_v56 = vpop.f32.mrf.mxu1 }
0x145c   :  { %v8706_v57 = vpop.f32.mrf.mxu0  ;;  %v2115_v59 = vpop.f32.mrf.mxu1 }
0x145d   :  { %v2128_v18 = vsel %vm144_vm4, %v2115_v59, -inf }
0x145e   :  { %v7228_v62 = vpop.f32.mrf.mxu0  ;;  %v7245_v1 = vpop.f32.mrf.mxu1 }
0x1460   :  { %v2064_v3 = vpop.f32.mrf.mxu0  ;;  %v2118_v5 = vpop.f32.mrf.mxu1 }
0x1461   :  { %v2122_v8 = vsel %vm144_vm4, %v2064_v3, -inf  ;;  %v2131_v25 = vsel %vm144_vm4, %v2118_v5, -inf }
0x1462   :  { %2123 = vmax.xlane.f32.xlu0 %v2122_v8  ;;  %v7239_v9 = vpop.f32.mrf.mxu0  ;;  %v7246_v12 = vpop.f32.mrf.mxu1 }
0x1464   :  { %v2067_v17 = vpop.f32.mrf.mxu0 }
0x1465   :  { %v2125_v21 = vsel %vm144_vm4, %v2067_v17, -inf }
0x1466   :  { %2129 = vmax.xlane.f32.xlu0 %v2128_v18  ;;  %2126 = vmax.xlane.f32.xlu1 %v2125_v21  ;;  %v7240_v24 = vpop.f32.mrf.mxu0 }
0x146a   :  { %2132 = vmax.xlane.f32.xlu0 %v2131_v25 }
0x1477   :  { %2168 = vrot.lane.b32.xlu1 %v8644_v38, %s8172_s23 }
0x14eb   :  { %v2124_v46 = vpop.xlane.xlu0 %2123 }
0x14ec   :  { %v2134_v26 = vsub.f32 %v2064_v3, %v2124_v46 }
0x14ee   :  { %v2138_v6 = vmul.f32 1.442695, %v2134_v26 }
0x14ef   :  { %v2130_v19 = vpop.xlane.xlu0 %2129  ;;  %v2127_v58 = vpop.xlane.xlu1 %2126 }
0x14f0   :  { %v2136_v61 = vsub.f32 %v2115_v59, %v2130_v19  ;;  %v2135_v28 = vsub.f32 %v2067_v17, %v2127_v58 }
0x14f2   :  { %v2142_v48 = vmul.f32 1.442695, %v2136_v61  ;;  %v2140_v34 = vmul.f32 1.442695, %v2135_v28 }
0x14f3   :  { %v2133_v30 = vpop.xlane.xlu0 %2132  ;;  %v2169_v29 = vpop.permute.xlu1 %2168 }
0x14f4   :  { %7992 = vpow2.f32 %v2142_v48  ;;  %v2137_v32 = vsub.f32 %v2118_v5, %v2133_v30  ;;  %7248 = vmatpush3.bf16.msra.mxu0 %v2169_v29 }
0x14f5   :  { %7259 = vmatprep.subr.bf16.mxu0 %v8166_v20  ;;  %7994 = vpow2.f32 %v2138_v6 }
0x14f6   :  { %v2144_v35 = vmul.f32 1.442695, %v2137_v32 }
0x14f8   :  { %7996 = vpow2.f32 %v2144_v35 }
0x14f9   :  { %7998 = vpow2.f32 %v2140_v34 }
0x1501   :  { %v7993_v37 = vpop.eup %7992 }
0x1502   :  { %v2152_v39 = vsel %vm144_vm4, %v7993_v37, 0.0  ;;  %v7995_v40 = vpop.eup %7994 }
0x1503   :  { %2153 = vadd.xlane.f32.xlu1 %v2152_v39  ;;  %v2146_v23 = vsel %vm144_vm4, %v7995_v40, 0.0 }
0x1505   :  { %v7997_v15 = vpop.eup %7996 }
0x1506   :  { %v2155_v13 = vsel %vm144_vm4, %v7997_v15, 0.0  ;;  %v7999_v41 = vpop.eup %7998 }
0x1507   :  { %2156 = vadd.xlane.f32.xlu0 %v2155_v13  ;;  %2147 = vadd.xlane.f32.xlu1 %v2146_v23  ;;  %v2149_v42 = vsel %vm144_vm4, %v7999_v41, 0.0 }
0x150b   :  { %2150 = vadd.xlane.f32.xlu0 %v2149_v42 }
0x1518   :  { %2264 = vrot.lane.b32.xlu1 %v8644_v38, %s8173_s24 }
0x151c   :  { %2315 = vrot.lane.b32.xlu1 %v8642_v36, %s8173_s24 }
0x1520   :  { %2313 = vrot.lane.b32.xlu1 %v8642_v36, %s8174_s25 }
0x1521   :  { %2215 = vrot.lane.b32.xlu0 %v8642_v36, %s8172_s23 }
0x1525   :  { %2262 = vrot.lane.b32.xlu0 %v8644_v38, %s8174_s25 }
0x158c   :  { %v2154_v11 = vpop.xlane.xlu1 %2153 }
0x158d   :  { %8000 = vrcp.f32 %v2154_v11 }
0x1590   :  { %v2157_v14 = vpop.xlane.xlu0 %2156  ;;  %v2148_v45 = vpop.xlane.xlu1 %2147 }
0x1591   :  { %8002 = vrcp.f32 %v2157_v14 }
0x1592   :  { %8004 = vrcp.f32 %v2148_v45 }
0x1594   :  { %v2151_v47 = vpop.xlane.xlu0 %2150  ;;  %v2265_v51 = vpop.permute.xlu1 %2264 }
0x1595   :  { %8006 = vrcp.f32 %v2151_v47  ;;  %v2270_v21 = vsel %vm58_vm1, %v2265_v51, 0 }
0x1598   :  { %v2216_v49 = vpop.permute.xlu0 %2215  ;;  %v2316_v3 = vpop.permute.xlu1 %2315 }
0x1599   :  { %7254 = vmatpush3.bf16.msra.mxu1 %v2216_v49  ;;  %v2321_v9 = vsel %vm58_vm1, %v2316_v3, 0 }
0x159a   :  { %7265 = vmatprep.subr.bf16.mxu1 %v8166_v20  ;;  %v8001_v55 = vpop.eup %8000 }
0x159b   :  { %v2164_v59 = vmul.f32 %v8001_v55, %v7993_v37 }
0x159c   :  { %v2314_v24 = vpop.permute.xlu1 %2313  ;;  %v2263_v25 = vpop.permute.xlu0 %2262 }
0x159e   :  { %v8003_v56 = vpop.eup %8002 }
0x159f   :  { %v2165_v62 = vmul.f32 %v8003_v56, %v7997_v15  ;;  %v8005_v1 = vpop.eup %8004 }
0x15a0   :  { %v2162_v12 = vmul.f32 %v8005_v1, %v7995_v40 }
0x15a1   :  { %v2167_v5 = vpack.c.bf16 %v2165_v62, %v2164_v59 }
0x15a2   :  { %v8007_v8 = vpop.eup %8006 }
0x15a3   :  { %7256 = vmatmul.mubr.msk.bf16.vlgmr.msra.gmra.mxu1 %vm144_vm4, %v2167_v5  ;;  %v2163_v17 = vmul.f32 %v8007_v8, %v7999_v41 }
0x15a4   :  { %7266 = vmatpush3.bf16.xpose.msra.mxu1 %v2321_v9  ;;  %7267 = vmatprep.mubr.msk.bf16.mxu1 %vm8167_vm3, %v8166_v20 }
0x15a5   :  { %v2166_v18 = vpack.c.bf16 %v2163_v17, %v2162_v12  ;;  %7277 = vmatprep.subr.bf16.mxu1 %v8166_v20 }
0x15a7   :  { %7250 = vmatmul.mubr.msk.bf16.vlgmr.msra.gmra.mxu0 %vm144_vm4, %v2166_v18 }
0x15a8   :  { %7260 = vmatpush3.bf16.xpose.msra.mxu0 %v2270_v21  ;;  %7261 = vmatprep.mubr.msk.bf16.mxu0 %vm8167_vm3, %v8166_v20 }
0x15a9   :  { %7271 = vmatprep.subr.bf16.mxu0 %v8166_v20 }
0x15ab   :  { %7268 = vmatmul.mubr.msk.bf16.vlgmr.msra.gmra.mxu1 %vm58_vm1, %v2314_v24 }
0x15ac   :  { %7279 = vmatprep.mubr.msk.bf16.mxu1 %vm8167_vm3, %v8166_v20 }
0x15af   :  { %7262 = vmatmul.mubr.msk.bf16.vlgmr.msra.gmra.mxu0 %vm58_vm1, %v2263_v25 }
0x15b0   :  { %7273 = vmatprep.mubr.msk.bf16.mxu0 %vm8167_vm3, %v8166_v20 }
0x1663   :  { %v8746_v46 = vpop.f32.mrf.mxu1 }
0x1665   :  { %v7257_v26 = vpop.f32.mrf.mxu1 }
0x1667   :  { %v8748_v19 = vpop.f32.mrf.mxu0  ;;  %v8750_v58 = vpop.f32.mrf.mxu1 }
0x1668   :  { %v7656_v61 = vpack.i.bf16 %v8750_v58, %v8746_v46 }
0x1669   :  { %v7251_v6 = vpop.f32.mrf.mxu0  ;;  %v7258_v48 = vpop.f32.mrf.mxu1 }
0x166b   :  { %v8754_v28 = vpop.f32.mrf.mxu0  ;;  %v2357_v30 = vpop.f32.mrf.mxu1 }
0x166c   :  { %v7651_v29 = vpack.i.bf16 %v8754_v28, %v8748_v19  ;;  %v2370_v23 = vsel %vm144_vm4, %v2357_v30, -inf }
0x166d   :  { %v7252_v32 = vpop.f32.mrf.mxu0  ;;  %v7269_v34 = vpop.f32.mrf.mxu1 }
0x166f   :  { %v2306_v35 = vpop.f32.mrf.mxu0  ;;  %v2360_v37 = vpop.f32.mrf.mxu1 }
0x1670   :  { %v2364_v39 = vsel %vm144_vm4, %v2306_v35, -inf  ;;  %v2373_v11 = vsel %vm144_vm4, %v2360_v37, -inf }
0x1671   :  { %v7270_v40 = vpop.f32.mrf.mxu1  ;;  %2365 = vmax.xlane.f32.xlu0 %v2364_v39  ;;  %v7263_v15 = vpop.f32.mrf.mxu0 }
0x1673   :  { %v2309_v13 = vpop.f32.mrf.mxu0 }
0x1674   :  { %v2367_v41 = vsel %vm144_vm4, %v2309_v13, -inf }
0x1675   :  { %2371 = vmax.xlane.f32.xlu0 %v2370_v23  ;;  %2368 = vmax.xlane.f32.xlu1 %v2367_v41  ;;  %v7264_v42 = vpop.f32.mrf.mxu0 }
0x1679   :  { %2374 = vmax.xlane.f32.xlu0 %v2373_v11 }
0x1686   :  { %2410 = vrot.lane.b32.xlu1 %v8644_v38, %s8175_s26 }
0x16fa   :  { %v2366_v14 = vpop.xlane.xlu0 %2365 }
0x16fb   :  { %v2376_v45 = vsub.f32 %v2306_v35, %v2366_v14 }
0x16fd   :  { %v2380_v55 = vmul.f32 1.442695, %v2376_v45 }
0x16fe   :  { %v2372_v47 = vpop.xlane.xlu0 %2371  ;;  %v2369_v49 = vpop.xlane.xlu1 %2368 }
0x16ff   :  { %v2378_v51 = vsub.f32 %v2357_v30, %v2372_v47  ;;  %v2377_v59 = vsub.f32 %v2309_v13, %v2369_v49 }
0x1701   :  { %v2384_v56 = vmul.f32 1.442695, %v2378_v51  ;;  %v2382_v5 = vmul.f32 1.442695, %v2377_v59 }
0x1702   :  { %v2375_v62 = vpop.xlane.xlu0 %2374  ;;  %v2411_v1 = vpop.permute.xlu1 %2410 }
0x1703   :  { %8008 = vpow2.f32 %v2384_v56  ;;  %v2379_v3 = vsub.f32 %v2360_v37, %v2375_v62  ;;  %7272 = vmatpush3.bf16.msra.mxu0 %v2411_v1 }
0x1704   :  { %7283 = vmatprep.subr.bf16.mxu0 %v8166_v20  ;;  %8010 = vpow2.f32 %v2380_v55 }
0x1705   :  { %v2386_v8 = vmul.f32 1.442695, %v2379_v3 }
0x1707   :  { %8012 = vpow2.f32 %v2386_v8 }
0x1708   :  { %8014 = vpow2.f32 %v2382_v5 }
0x1710   :  { %v8009_v9 = vpop.eup %8008 }
0x1711   :  { %v2394_v12 = vsel %vm144_vm4, %v8009_v9, 0.0  ;;  %v8011_v17 = vpop.eup %8010 }
0x1712   :  { %2395 = vadd.xlane.f32.xlu1 %v2394_v12  ;;  %v2388_v24 = vsel %vm144_vm4, %v8011_v17, 0.0 }
0x1714   :  { %v8013_v18 = vpop.eup %8012 }
0x1715   :  { %v2397_v21 = vsel %vm144_vm4, %v8013_v18, 0.0  ;;  %v8015_v25 = vpop.eup %8014 }
0x1716   :  { %2398 = vadd.xlane.f32.xlu0 %v2397_v21  ;;  %2389 = vadd.xlane.f32.xlu1 %v2388_v24  ;;  %v2391_v26 = vsel %vm144_vm4, %v8015_v25, 0.0 }
0x171a   :  { %2392 = vadd.xlane.f32.xlu0 %v2391_v26 }
0x1727   :  { %2506 = vrot.lane.b32.xlu1 %v8644_v38, %s8176_s2 }
0x172b   :  { %2557 = vrot.lane.b32.xlu1 %v8642_v36, %s8176_s2 }
0x172f   :  { %2555 = vrot.lane.b32.xlu1 %v8642_v36, %s8177_s27 }
0x1730   :  { %2457 = vrot.lane.b32.xlu0 %v8642_v36, %s8175_s26 }
0x1734   :  { %2504 = vrot.lane.b32.xlu0 %v8644_v38, %s8177_s27 }
0x179b   :  { %v2396_v6 = vpop.xlane.xlu1 %2395 }
0x179c   :  { %8016 = vrcp.f32 %v2396_v6 }
0x179f   :  { %v2399_v48 = vpop.xlane.xlu0 %2398  ;;  %v2390_v30 = vpop.xlane.xlu1 %2389 }
0x17a0   :  { %8018 = vrcp.f32 %v2399_v48 }
0x17a1   :  { %8020 = vrcp.f32 %v2390_v30 }
0x17a3   :  { %v2393_v32 = vpop.xlane.xlu0 %2392  ;;  %v2507_v35 = vpop.permute.xlu1 %2506 }
0x17a4   :  { %8022 = vrcp.f32 %v2393_v32  ;;  %v2512_v49 = vsel %vm58_vm1, %v2507_v35, 0 }
0x17a7   :  { %v2458_v34 = vpop.permute.xlu0 %2457  ;;  %v2558_v23 = vpop.permute.xlu1 %2557 }
0x17a8   :  { %7278 = vmatpush3.bf16.msra.mxu1 %v2458_v34  ;;  %v2563_v11 = vsel %vm58_vm1, %v2558_v23, 0 }
0x17a9   :  { %7289 = vmatprep.subr.bf16.mxu1 %v8166_v20  ;;  %v8017_v37 = vpop.eup %8016 }
0x17aa   :  { %v2406_v40 = vmul.f32 %v8017_v37, %v8009_v9 }
0x17ab   :  { %v2556_v51 = vpop.permute.xlu1 %2555  ;;  %v2505_v55 = vpop.permute.xlu0 %2504 }
0x17ad   :  { %v8019_v39 = vpop.eup %8018 }
0x17ae   :  { %v2407_v15 = vmul.f32 %v8019_v39, %v8013_v18  ;;  %v8021_v13 = vpop.eup %8020 }
0x17af   :  { %v2404_v14 = vmul.f32 %v8021_v13, %v8011_v17 }
0x17b0   :  { %v2409_v41 = vpack.c.bf16 %v2407_v15, %v2406_v40 }
0x17b1   :  { %v8023_v42 = vpop.eup %8022 }
0x17b2   :  { %7280 = vmatmul.mubr.msk.bf16.vlgmr.msra.gmra.mxu1 %vm144_vm4, %v2409_v41  ;;  %v2405_v45 = vmul.f32 %v8023_v42, %v8015_v25 }
0x17b3   :  { %7290 = vmatpush3.bf16.xpose.msra.mxu1 %v2563_v11  ;;  %7291 = vmatprep.mubr.msk.bf16.mxu1 %vm8167_vm3, %v8166_v20 }
0x17b4   :  { %v2408_v47 = vpack.c.bf16 %v2405_v45, %v2404_v14  ;;  %7301 = vmatprep.subr.bf16.mxu1 %v8166_v20 }
0x17b6   :  { %7274 = vmatmul.mubr.msk.bf16.vlgmr.msra.gmra.mxu0 %vm144_vm4, %v2408_v47 }
0x17b7   :  { %7284 = vmatpush3.bf16.xpose.msra.mxu0 %v2512_v49  ;;  %7285 = vmatprep.mubr.msk.bf16.mxu0 %vm8167_vm3, %v8166_v20 }
0x17b8   :  { %7295 = vmatprep.subr.bf16.mxu0 %v8166_v20 }
0x17ba   :  { %7292 = vmatmul.mubr.msk.bf16.vlgmr.msra.gmra.mxu1 %vm58_vm1, %v2556_v51 }
0x17bb   :  { %7303 = vmatprep.mubr.msk.bf16.mxu1 %vm8167_vm3, %v8166_v20 }
0x17be   :  { %7286 = vmatmul.mubr.msk.bf16.vlgmr.msra.gmra.mxu0 %vm58_vm1, %v2505_v55 }
0x17bf   :  { %7297 = vmatprep.mubr.msk.bf16.mxu0 %vm8167_vm3, %v8166_v20 }
0x1872   :  { %v2497_v56 = vpop.f32.mrf.mxu1 }
0x1874   :  { %v7281_v59 = vpop.f32.mrf.mxu1 }
0x1876   :  { %v2450_v62 = vpop.f32.mrf.mxu0  ;;  %v2500_v1 = vpop.f32.mrf.mxu1 }
0x1877   :  { %v7666_v3 = vpack.i.bf16 %v2500_v1, %v2497_v56 }
0x1878   :  { %v7275_v5 = vpop.f32.mrf.mxu0  ;;  %v7282_v8 = vpop.f32.mrf.mxu1 }
0x187a   :  { %v2453_v9 = vpop.f32.mrf.mxu0  ;;  %v2599_v12 = vpop.f32.mrf.mxu1 }
0x187b   :  { %v7661_v17 = vpack.i.bf16 %v2453_v9, %v2450_v62  ;;  %v2612_v32 = vsel %vm144_vm4, %v2599_v12, -inf }
0x187c   :  { %v7276_v18 = vpop.f32.mrf.mxu0  ;;  %v7293_v21 = vpop.f32.mrf.mxu1 }
0x187e   :  { %v2548_v24 = vpop.f32.mrf.mxu0  ;;  %v2602_v25 = vpop.f32.mrf.mxu1 }
0x187f   :  { %v2606_v26 = vsel %vm144_vm4, %v2548_v24, -inf  ;;  %v2615_v37 = vsel %vm144_vm4, %v2602_v25, -inf }
0x1880   :  { %v7294_v6 = vpop.f32.mrf.mxu1  ;;  %2607 = vmax.xlane.f32.xlu0 %v2606_v26  ;;  %v7287_v48 = vpop.f32.mrf.mxu0  ;;  %v7820_v26 = vld [vmem:[%s9792_s6 + $0x18] sm:$0xff]  }
0x1881   :  { %v7821_v6 = vld [vmem:[%s9792_s6 + $0x10] sm:$0xff]  }
0x1882   :  { %v2551_v30 = vpop.f32.mrf.mxu0 }
0x1883   :  { %v2609_v34 = vsel %vm144_vm4, %v2551_v30, -inf }
0x1884   :  { %2613 = vmax.xlane.f32.xlu0 %v2612_v32  ;;  %2610 = vmax.xlane.f32.xlu1 %v2609_v34  ;;  %v7288_v35 = vpop.f32.mrf.mxu0 }
0x1888   :  { %2616 = vmax.xlane.f32.xlu0 %v2615_v37 }
0x1909   :  { %v2608_v39 = vpop.xlane.xlu0 %2607 }
0x190a   :  { %v2618_v40 = vsub.f32 %v2548_v24, %v2608_v39 }
0x190c   :  { %v2622_v41 = vmul.f32 1.442695, %v2618_v40 }
0x190d   :  { %v2614_v15 = vpop.xlane.xlu0 %2613  ;;  %v2611_v13 = vpop.xlane.xlu1 %2610 }
0x190e   :  { %v2620_v23 = vsub.f32 %v2599_v12, %v2614_v15  ;;  %v2619_v11 = vsub.f32 %v2551_v30, %v2611_v13 }
0x1910   :  { %v2626_v42 = vmul.f32 1.442695, %v2620_v23  ;;  %v2624_v47 = vmul.f32 1.442695, %v2619_v11 }
0x1911   :  { %v2617_v14 = vpop.xlane.xlu0 %2616 }
0x1912   :  { %8024 = vpow2.f32 %v2626_v42  ;;  %v2621_v45 = vsub.f32 %v2602_v25, %v2617_v14 }
0x1913   :  { %8026 = vpow2.f32 %v2622_v41 }
0x1914   :  { %v2628_v49 = vmul.f32 1.442695, %v2621_v45 }
0x1916   :  { %8028 = vpow2.f32 %v2628_v49 }
0x1917   :  { %8030 = vpow2.f32 %v2624_v47 }
0x191f   :  { %v8025_v51 = vpop.eup %8024 }
0x1920   :  { %v2636_v55 = vsel %vm144_vm4, %v8025_v51, 0.0  ;;  %v8027_v56 = vpop.eup %8026 }
0x1921   :  { %2637 = vadd.xlane.f32.xlu1 %v2636_v55  ;;  %v2630_v1 = vsel %vm144_vm4, %v8027_v56, 0.0 }
0x1923   :  { %v8029_v59 = vpop.eup %8028 }
0x1924   :  { %v2639_v62 = vsel %vm144_vm4, %v8029_v59, 0.0  ;;  %v8031_v5 = vpop.eup %8030 }
0x1925   :  { %2640 = vadd.xlane.f32.xlu0 %v2639_v62  ;;  %2631 = vadd.xlane.f32.xlu1 %v2630_v1  ;;  %v2633_v8 = vsel %vm144_vm4, %v8031_v5, 0.0 }
0x1929   :  { %2634 = vadd.xlane.f32.xlu0 %v2633_v8 }
0x1936   :  { %2652 = vrot.lane.b32.xlu1 %v8644_v38, %s8178_s28 }
0x193a   :  { %7652 = vrot.lane.b32.xlu1 %v7651_v29, %s8179_s29 }
0x193e   :  { %7657 = vrot.lane.b32.xlu1 %v7656_v61, %s8179_s29 }
0x193f   :  { %2699 = vrot.lane.b32.xlu0 %v8642_v36, %s8178_s28 }
0x1942   :  { %7667 = vrot.lane.b32.xlu1 %v7666_v3, %s8180_s30 }
0x1943   :  { %7662 = vrot.lane.b32.xlu0 %v7661_v17, %s8180_s30 }
0x19aa   :  { %v2638_v9 = vpop.xlane.xlu1 %2637 }
0x19ab   :  { %8032 = vrcp.f32 %v2638_v9 }
0x19ae   :  { %v2641_v38 = vpop.xlane.xlu0 %2640  ;;  %v2632_v12 = vpop.xlane.xlu1 %2631 }
0x19af   :  { %8034 = vrcp.f32 %v2641_v38 }
0x19b0   :  { %8036 = vrcp.f32 %v2632_v12 }
0x19b2   :  { %v2635_v19 = vpop.xlane.xlu0 %2634  ;;  %v2653_v28 = vpop.permute.xlu1 %2652 }
0x19b3   :  { %8038 = vrcp.f32 %v2635_v19  ;;  %7296 = vmatpush3.bf16.msra.mxu0 %v2653_v28 }
0x19b4   :  { %7307 = vmatprep.subr.bf16.mxu0 %v7820_v26 }
0x19b6   :  { %v2700_v29 = vpop.permute.xlu0 %2699  ;;  %v7653_v23 = vpop.permute.xlu1 %7652 }
0x19b7   :  { %7302 = vmatpush3.bf16.msra.mxu1 %v2700_v29  ;;  %v7655_v14 = vunpack.i.h.bf16 %v7653_v23  ;;  %v7654_v45 = vunpack.i.l.bf16 %v7653_v23 }
0x19b8   :  { %v8033_v46 = vpop.eup %8032 }
0x19b9   :  { %v2648_v36 = vmul.f32 %v8033_v46, %v8025_v51  ;;  %v2795_v8 = vsel %vm58_vm1, %v8706_v57, %v7655_v14  ;;  %v2794_v9 = vsel %vm58_vm1, %v8702_v52, %v7654_v45 }
0x19ba   :  { %v7658_v41 = vpop.permute.xlu1 %7657  ;;  %v7663_v11 = vpop.permute.xlu0 %7662 }
0x19bb   :  { %v7660_v47 = vunpack.i.h.bf16 %v7658_v41  ;;  %v7659_v49 = vunpack.i.l.bf16 %v7658_v41  ;;  %v7664_v62 = vunpack.i.l.bf16 %v7663_v11 }
0x19bc   :  { %v8035_v58 = vpop.eup %8034 }
0x19bd   :  { %v8037_v61 = vpop.eup %8036  ;;  %v2649_v18 = vmul.f32 %v8035_v58, %v8029_v59  ;;  %v7665_v59 = vunpack.i.h.bf16 %v7663_v11  ;;  %v2797_v38 = vsel %vm58_vm1, %v8704_v54, %v7660_v47  ;;  %v2796_v12 = vsel %vm58_vm1, %v8700_v50, %v7659_v49 }
0x19be   :  { %v2646_v17 = vmul.f32 %v8037_v61, %v8027_v56  ;;  %v7668_v42 = vpop.permute.xlu1 %7667  ;;  %v2798_v61 = vsel %vm144_vm4, %v2794_v9, %v7664_v62  ;;  %v7822_v9 = vld [vmem:[%s9793_s7 + $0x18] sm:$0xff]  }
0x19bf   :  { %v2651_v21 = vpack.c.bf16 %v2649_v18, %v2648_v36  ;;  %v7670_v51 = vunpack.i.h.bf16 %v7668_v42  ;;  %v7669_v55 = vunpack.i.l.bf16 %v7668_v42  ;;  %v2799_v57 = vsel %vm144_vm4, %v2795_v8, %v7665_v59  ;;  %7315 = vmatprep.subr.bf16.mxu1 %v7822_v9 }
0x19c0   :  { %v8039_v3 = vpop.eup %8038 }
0x19c1   :  { %v2647_v24 = vmul.f32 %v8039_v3, %v8031_v5  ;;  %7304 = vmatmul.mubr.msk.bf16.vlgmr.msra.gmra.mxu1 %vm144_vm4, %v2651_v21  ;;  %v2800_v28 = vsel %vm144_vm4, %v2796_v12, %v7669_v55  ;;  %v2801_v29 = vsel %vm144_vm4, %v2797_v38, %v7670_v51  ;;  %v7823_v38 = vld [vmem:[%s9793_s7 + $0x10] sm:$0xff]   ;;  %v7826_v12 = vld [vmem:[%s9794_s8 + $0x38] sm:$0xff]  }
0x19c2   :  { %7316 = vmatpush3.bf16.msra.mxu1 %v7822_v9 }
0x19c3   :  { %v2650_v25 = vpack.c.bf16 %v2647_v24, %v2646_v17  ;;  %7317 = vmatprep.subr.bf16.mxu1 %v7823_v38 }
0x19c5   :  { %7298 = vmatmul.mubr.msk.bf16.vlgmr.msra.gmra.mxu0 %vm144_vm4, %v2650_v25  ;;  %v2887_v25 = vrot.slane %v8638_v53, %v8528_v33 }
0x19c6   :  { %7308 = vmatpush3.bf16.msra.mxu0 %v7820_v26  ;;  %7318 = vmatpush3.bf16.msra.mxu1 %v7823_v38 }
0x19c7   :  { %7309 = vmatprep.subr.bf16.mxu0 %v7821_v6  ;;  %7335 = vmatprep.subr.bf16.mxu1 %v8166_v20 }
0x19ca   :  { %7310 = vmatpush3.bf16.msra.mxu0 %v7821_v6 }
0x19cb   :  { %7323 = vmatprep.subr.bf16.mxu0 %v7826_v12 }
0x1a81   :  { %v2739_v48 = vpop.f32.mrf.mxu1 }
0x1a83   :  { %v7305_v30 = vpop.f32.mrf.mxu1 }
0x1a85   :  { %v2692_v32 = vpop.f32.mrf.mxu0  ;;  %v2742_v34 = vpop.f32.mrf.mxu1 }
0x1a86   :  { %v7676_v35 = vpack.i.bf16 %v2742_v34, %v2739_v48 }
0x1a87   :  { %v7299_v37 = vpop.f32.mrf.mxu0  ;;  %v7306_v39 = vpop.f32.mrf.mxu1 }
0x1a88   :  { %7677 = vrot.lane.b32.xlu1 %v7676_v35, %s8181_s16 }
0x1a89   :  { %v2695_v40 = vpop.f32.mrf.mxu0 }
0x1a8a   :  { %v7671_v15 = vpack.i.bf16 %v2695_v40, %v2692_v32 }
0x1a8b   :  { %v7300_v13 = vpop.f32.mrf.mxu0 }
0x1a8c   :  { %7672 = vrot.lane.b32.xlu0 %v7671_v15, %s8181_s16 }
0x1afa   :  { %v7678_v56 = vpop.permute.xlu1 %7677 }
0x1afb   :  { %v7680_v1 = vunpack.i.h.bf16 %v7678_v56  ;;  %v7679_v5 = vunpack.i.l.bf16 %v7678_v56 }
0x1afd   :  { %v2804_v36 = vsel %vm1292_vm5, %v2800_v28, %v7679_v5  ;;  %v2805_v52 = vsel %vm1292_vm5, %v2801_v29, %v7680_v1 }
0x1afe   :  { %v7673_v19 = vpop.permute.xlu0 %7672  ;;  %v2807_v3 = vpack.c.bf16 %v2805_v52, %v2804_v36 }
0x1aff   :  { %v7675_v46 = vunpack.i.h.bf16 %v7673_v19  ;;  %v7674_v58 = vunpack.i.l.bf16 %v7673_v19 }
0x1b01   :  { %v2803_v54 = vsel %vm1292_vm5, %v2799_v57, %v7675_v46  ;;  %v2802_v18 = vsel %vm1292_vm5, %v2798_v61, %v7674_v58 }
0x1b02   :  { %v2806_v50 = vpack.c.bf16 %v2803_v54, %v2802_v18 }
0x1b04   :  { %7311 = vmatprep.mubr.msk.bf16.mxu0 %vm212_vm2, %v2806_v50 }
0x1b05   :  { %7312 = vmatmul.mubr.msk.bf16.vlgmr.msra.gmra.mxu0 %vm212_vm2, %v2807_v3 }
0x1b06   :  { %7324 = vmatpush3.bf16.msra.mxu0 %v7826_v12 }
0x1bc5   :  { %v7313_v21 = vpop.f32.mrf.mxu0 }
0x1bc6   :  { %v2882_v24 = vadd.f32 %v7313_v21, %v8626_v60 }
0x1bc7   :  { %v2865_v17 = vpop.f32.mrf.mxu0 }
0x1bc8   :  { %v2880_v26 = vadd.f32 %v2865_v17, %v8619_v44  ;;  %v2890_v32 = vadd.f32 %v2887_v25, %v2882_v24  ;;  %v8873_v17 = vld [vmem:[%s9795_s9 + $0x8] sm:$0xff] }
0x1bc9   :  { %v7314_v6 = vpop.f32.mrf.mxu0  ;;  %v2947_v24 = vrot.slane %v8873_v17, %v8554_v27 }
0x1bca   :  { %v2888_v48 = vadd.f32 %v2887_v25, %v2880_v26  ;;  %v2883_v34 = vadd.f32 %v7314_v6, %v8628_v63  ;;  %v2898_v60 = vsel %vm212_vm2, %v2890_v32, 0.0 }
0x1bcb   :  { %v2868_v30 = vpop.f32.mrf.mxu0 }
0x1bcc   :  { %v2881_v35 = vadd.f32 %v2868_v30, %v8621_v31  ;;  %v2892_v37 = vsel %vm212_vm2, %v2888_v48, 0.0  ;;  %v2891_v40 = vadd.f32 %v2887_v25, %v2883_v34  ;;  %v2955_v30 = vrot.slane %v8873_v17, %v8564_v4 }
0x1bcd   :  { %2893 = vadd.xlane.f32.xlu0 %v2892_v37 }
0x1bce   :  { %v2889_v39 = vadd.f32 %v2887_v25, %v2881_v35  ;;  %v2901_v44 = vsel %vm212_vm2, %v2891_v40, 0.0 }
0x1bd0   :  { %v2895_v15 = vsel %vm212_vm2, %v2889_v39, 0.0 }
0x1bd1   :  { %2899 = vadd.xlane.f32.xlu0 %v2898_v60  ;;  %2896 = vadd.xlane.f32.xlu1 %v2895_v15 }
0x1bd5   :  { %2902 = vadd.xlane.f32.xlu0 %v2901_v44 }
0x1c56   :  { %v2894_v53 = vpop.xlane.xlu0 %2893 }
0x1c57   :  { %v2904_v13 = vmul.f32 0.03125, %v2894_v53 }
0x1c59   :  { %v2908_v23 = vsub.f32 %v2888_v48, %v2904_v13 }
0x1c5a   :  { %v2900_v63 = vpop.xlane.xlu0 %2899  ;;  %v2897_v41 = vpop.xlane.xlu1 %2896 }
0x1c5b   :  { %v2906_v31 = vmul.f32 0.03125, %v2900_v63  ;;  %v2905_v42 = vmul.f32 0.03125, %v2897_v41  ;;  %v2912_v11 = vmul.f32 %v2908_v23, %v2908_v23  ;;  %v6552_v41 = vld [vmem:[%s9790_s4 + $0x10] ss:$0 sm:$0xff] }
0x1c5d   :  { %v2910_v14 = vsub.f32 %v2890_v32, %v2906_v31  ;;  %v2909_v45 = vsub.f32 %v2889_v39, %v2905_v42  ;;  %v2916_v47 = vsel %vm212_vm2, %v2912_v11, 0.0  ;;  %v7825_v31 = vld [vmem:[%s9791_s5 + $0x20] sm:$0xff]   ;;  %v8905_v42 = vadd.f32 %v6552_v41, %v8361_v10  ;;  %v7827_v10 = vld [vmem:[%s9794_s8 + $0x30] sm:$0xff]  }
0x1c5e   :  { %v2903_v49 = vpop.xlane.xlu0 %2902  ;;  %2917 = vadd.xlane.f32.xlu1 %v2916_v47  ;;  %v8908_v11 = vadd.f32 %v6552_v41, %v8363_v16  ;;  %7325 = vmatprep.subr.bf16.mxu0 %v7827_v10  ;;  %v7828_v16 = vld [vmem:[%s9794_s8 + $0x28] sm:$0xff]  }
0x1c5f   :  { %v2907_v51 = vmul.f32 0.03125, %v2903_v49  ;;  %v2914_v55 = vmul.f32 %v2910_v14, %v2910_v14  ;;  %v2913_v56 = vmul.f32 %v2909_v45, %v2909_v45  ;;  %7326 = vmatpush3.bf16.msra.mxu0 %v7827_v10  ;;  %v2970_v49 = vrot.slane %v8873_v17, %v8581_v43 }
0x1c60   :  { %7327 = vmatprep.subr.bf16.mxu0 %v7828_v16 }
0x1c61   :  { %v2911_v59 = vsub.f32 %v2891_v40, %v2907_v51  ;;  %v2922_v62 = vsel %vm212_vm2, %v2914_v55, 0.0  ;;  %v2919_v1 = vsel %vm212_vm2, %v2913_v56, 0.0  ;;  %v8932_v55 = vld [vmem:[%s9795_s9 + $0x10] sm:$0xff] }
0x1c62   :  { %2923 = vadd.xlane.f32.xlu1 %v2922_v62  ;;  %2920 = vadd.xlane.f32.xlu0 %v2919_v1  ;;  %v3219_v1 = vrot.slane %v8932_v55, %v8296_v22 }
0x1c63   :  { %v2915_v5 = vmul.f32 %v2911_v59, %v2911_v59  ;;  %7328 = vmatpush3.bf16.msra.mxu0 %v7828_v16 }
0x1c65   :  { %v2925_v8 = vsel %vm212_vm2, %v2915_v5, 0.0 }
0x1c66   :  { %2926 = vadd.xlane.f32.xlu0 %v2925_v8 }
0x1ce7   :  { %v2918_v19 = vpop.xlane.xlu1 %2917 }
0x1ce8   :  { %v2928_v28 = vmul.f32 0.03125, %v2918_v19 }
0x1cea   :  { %v2932_v29 = vadd.f32 1e-05, %v2928_v28 }
0x1ceb   :  { %v2921_v46 = vpop.xlane.xlu0 %2920  ;;  %v2924_v58 = vpop.xlane.xlu1 %2923 }
0x1cec   :  { %8040 = vrsqrt.f32 %v2932_v29  ;;  %v2929_v61 = vmul.f32 0.03125, %v2921_v46  ;;  %v2930_v57 = vmul.f32 0.03125, %v2924_v58 }
0x1cee   :  { %v2933_v36 = vadd.f32 1e-05, %v2929_v61  ;;  %v2934_v52 = vadd.f32 1e-05, %v2930_v57 }
0x1cef   :  { %v2927_v54 = vpop.xlane.xlu0 %2926 }
0x1cf0   :  { %8042 = vrsqrt.f32 %v2933_v36  ;;  %v2931_v18 = vmul.f32 0.03125, %v2927_v54 }
0x1cf1   :  { %8044 = vrsqrt.f32 %v2934_v52 }
0x1cf2   :  { %v2935_v50 = vadd.f32 1e-05, %v2931_v18 }
0x1cf4   :  { %8046 = vrsqrt.f32 %v2935_v50 }
0x1cf9   :  { %v8041_v3 = vpop.eup %8040 }
0x1cfa   :  { %v2940_v21 = vmul.f32 %v8041_v3, %v2908_v23  ;;  %v7824_v23 = vld [vmem:[%s9791_s5 + $0x28] sm:$0xff]  }
0x1cfc   :  { %v2948_v48 = vmul.f32 %v2947_v24, %v2940_v21 }
0x1cfd   :  { %v8043_v25 = vpop.eup %8042 }
0x1cfe   :  { %v8045_v26 = vpop.eup %8044  ;;  %v2941_v6 = vmul.f32 %v8043_v25, %v2909_v45  ;;  %v8879_v39 = vadd.f32 %v2955_v30, %v2948_v48  ;;  %v7829_v45 = vld [vmem:[%s9794_s8 + $0x20] sm:$0xff]  }
0x1cff   :  { %v2942_v32 = vmul.f32 %v8045_v26, %v2910_v14  ;;  %v3210_v14 = vpack.c.bf16 %v8908_v11, %v8905_v42  ;;  %7329 = vmatprep.subr.bf16.mxu0 %v7829_v45 }
0x1d00   :  { %v2949_v34 = vmul.f32 %v2947_v24, %v2941_v6  ;;  %7330 = vmatpush3.bf16.msra.mxu0 %v7829_v45  ;;  %v8964_v6 = vrot.slane %v8873_v17, %v8590_v2 }
0x1d01   :  { %v8047_v35 = vpop.eup %8046  ;;  %v2950_v60 = vmul.f32 %v2947_v24, %v2942_v32  ;;  %7349 = vmatprep.subr.bf16.mxu0 %v8166_v20 }
0x1d02   :  { %v2943_v37 = vmul.f32 %v8047_v35, %v2911_v59  ;;  %v8881_v40 = vadd.f32 %v2955_v30, %v2949_v34 }
0x1d03   :  { %v8886_v53 = vadd.f32 %v2955_v30, %v2950_v60 }
0x1d04   :  { %v2960_v15 = vpack.c.bf16 %v8881_v40, %v8879_v39  ;;  %v2951_v44 = vmul.f32 %v2947_v24, %v2943_v37 }
0x1d06   :  { %7319 = vmatprep.mubr.msk.bf16.mxu1 %vm212_vm2, %v2960_v15  ;;  %v8888_v13 = vadd.f32 %v2955_v30, %v2951_v44 }
0x1d08   :  { %v2961_v63 = vpack.c.bf16 %v8888_v13, %v8886_v53 }
0x1d0a   :  { %7320 = vmatmul.mubr.msk.bf16.vlgmr.msra.gmra.mxu1 %vm212_vm2, %v2961_v63 }
0x1d0b   :  { %7336 = vmatpush3.bf16.msra.mxu1 %v7824_v23  ;;  %7339 = vmatprep.mubr.msk.bf16.mxu1 %vm8167_vm3, %v8166_v20 }
0x1d0c   :  { %7337 = vmatprep.subr.bf16.mxu1 %v8166_v20 }
0x1d0f   :  { %7338 = vmatpush3.bf16.msra.mxu1 %v7825_v31 }
0x1d10   :  { %7343 = vmatprep.subr.bf16.mxu1 %v8166_v20 }
0x1d12   :  { %7340 = vmatmul.mubr.msk.bf16.vlgmr.msra.gmra.mxu1 %vm212_vm2, %v3210_v14 }
0x1d13   :  { %7345 = vmatprep.mubr.msk.bf16.mxu1 %vm8167_vm3, %v8166_v20 }
0x1dca   :  { %v7321_v47 = vpop.f32.mrf.mxu1 }
0x1dcb   :  { %v3032_v5 = vadd.f32 %v7321_v47, %v2970_v49 }
0x1dcc   :  { %v3023_v51 = vpop.f32.mrf.mxu1 }
0x1dcd   :  { %v3024_v59 = vadd.f32 %v3023_v51, %v2970_v49  ;;  %v3040_v46 = vmax.f32 %v3032_v5, 0.0 }
0x1dce   :  { %v7322_v56 = vpop.f32.mrf.mxu1 }
0x1dcf   :  { %v3035_v62 = vadd.f32 %v7322_v56, %v2970_v49  ;;  %v3038_v19 = vmax.f32 %v3024_v59, 0.0 }
0x1dd0   :  { %v3026_v8 = vpop.f32.mrf.mxu1 }
0x1dd1   :  { %v3027_v9 = vadd.f32 %v3026_v8, %v2970_v49  ;;  %v3041_v38 = vmax.f32 %v3035_v62, 0.0 }
0x1dd2   :  { %v3269_v12 = vpop.f32.mrf.mxu1 }
0x1dd3   :  { %v3039_v28 = vmax.f32 %v3027_v9, 0.0  ;;  %v3270_v29 = vadd.f32 %v3269_v12, %v3219_v1  ;;  %v3043_v36 = vpack.c.bf16 %v3041_v38, %v3040_v46 }
0x1dd4   :  { %v7341_v58 = vpop.f32.mrf.mxu1 }
0x1dd5   :  { %v3042_v61 = vpack.c.bf16 %v3039_v28, %v3038_v19  ;;  %v8936_v57 = vpack.c.bf16 %v3270_v29, %v3270_v29 }
0x1dd6   :  { %v3272_v52 = vpop.f32.mrf.mxu1 }
0x1dd7   :  { %v3273_v54 = vadd.f32 %v3272_v52, %v3219_v1  ;;  %3279 = vrot.lane.b32.xlu1 %v8936_v57, %s8168_s17  ;;  %7331 = vmatprep.mubr.msk.bf16.mxu0 %vm1570_vm6, %v3042_v61 }
0x1dd8   :  { %7332 = vmatmul.mubr.msk.bf16.vlgmr.msra.gmra.mxu0 %vm1570_vm6, %v3043_v36  ;;  %v7342_v18 = vpop.f32.mrf.mxu1 }
0x1dd9   :  { %v8942_v50 = vpack.c.bf16 %v3273_v54, %v3273_v54  ;;  %7351 = vmatprep.mubr.msk.bf16.mxu0 %vm8167_vm3, %v8166_v20 }
0x1ddb   :  { %3328 = vrot.lane.b32.xlu0 %v8942_v50, %s8168_s17 }
0x1e49   :  { %v3280_v3 = vpop.permute.xlu1 %3279 }
0x1e4a   :  { %v3285_v21 = vsel %vm58_vm1, %v3280_v3, 0 }
0x1e4b   :  { %7344 = vmatpush3.bf16.xpose.msra.mxu1 %v3285_v21 }
0x1e4c   :  { %7355 = vmatprep.subr.bf16.mxu1 %v8166_v20 }
0x1e4d   :  { %v3329_v24 = vpop.permute.xlu0 %3328 }
0x1e4e   :  { %v3334_v25 = vsel %vm58_vm1, %v3329_v24, 0 }
0x1e4f   :  { %7350 = vmatpush3.bf16.xpose.msra.mxu0 %v3334_v25 }
0x1e50   :  { %7361 = vmatprep.subr.bf16.mxu0 %v8166_v20 }
0x1e52   :  { %7346 = vmatmul.mubr.msk.bf16.vlgmr.msra.gmra.mxu1 %vm58_vm1, %v8936_v57 }
0x1e53   :  { %7357 = vmatprep.mubr.msk.bf16.mxu1 %vm8167_vm3, %v8166_v20 }
0x1e56   :  { %7352 = vmatmul.mubr.msk.bf16.vlgmr.msra.gmra.mxu0 %vm58_vm1, %v8942_v50 }
0x1e57   :  { %7363 = vmatprep.mubr.msk.bf16.mxu0 %vm8167_vm3, %v8166_v20 }
0x1e98   :  { %v8960_v26 = vpop.f32.mrf.mxu0 }
0x1e9a   :  { %v3121_v48 = vpop.f32.mrf.mxu0 }
0x1e9b   :  { %v8967_v30 = vadd.f32 %v3121_v48, %v8964_v6 }
0x1e9c   :  { %v8969_v32 = vpop.f32.mrf.mxu0 }
0x1e9e   :  { %v8972_v37 = vpop.f32.mrf.mxu0 }
0x1f12   :  { %v3321_v34 = vpop.f32.mrf.mxu1 }
0x1f13   :  { %v3376_v35 = vsel %vm58_vm1, %v3321_v34, -inf }
0x1f14   :  { %3377 = vmax.xlane.f32.xlu1 %v3376_v35  ;;  %v7347_v60 = vpop.f32.mrf.mxu1 }
0x1f16   :  { %v3324_v15 = vpop.f32.mrf.mxu1  ;;  %v3370_v44 = vpop.f32.mrf.mxu0 }
0x1f17   :  { %v3379_v23 = vsel %vm58_vm1, %v3370_v44, -inf }
0x1f18   :  { %v7348_v63 = vpop.f32.mrf.mxu1  ;;  %3380 = vmax.xlane.f32.xlu0 %v3379_v23  ;;  %v7353_v17 = vpop.f32.mrf.mxu0 }
0x1f1a   :  { %v3373_v41 = vpop.f32.mrf.mxu0 }
0x1f1c   :  { %v7354_v31 = vpop.f32.mrf.mxu0 }
0x1f25   :  { %3400 = vrot.lane.b32.xlu1 %v8936_v57, %s8169_s22 }
0x1f9d   :  { %v3378_v14 = vpop.xlane.xlu1 %3377 }
0x1f9e   :  { %v3382_v10 = vsub.f32 %v3321_v34, %v3378_v14 }
0x1fa0   :  { %v3384_v16 = vmul.f32 1.442695, %v3382_v10 }
0x1fa1   :  { %v3401_v45 = vpop.permute.xlu1 %3400  ;;  %v3381_v47 = vpop.xlane.xlu0 %3380 }
0x1fa2   :  { %8048 = vpow2.f32 %v3384_v16  ;;  %v3406_v49 = vsel %vm65_vm0, %v3401_v45, 0  ;;  %v3383_v51 = vsub.f32 %v3370_v44, %v3381_v47 }
0x1fa3   :  { %7356 = vmatpush3.bf16.msra.mxu1 %v3406_v49 }
0x1fa4   :  { %v3386_v56 = vmul.f32 1.442695, %v3383_v51  ;;  %7367 = vmatprep.subr.bf16.mxu1 %v8166_v20 }
0x1fa6   :  { %8050 = vpow2.f32 %v3386_v56 }
0x1faf   :  { %v8049_v59 = vpop.eup %8048 }
0x1fb0   :  { %v3388_v62 = vsel %vm58_vm1, %v8049_v59, 0.0 }
0x1fb1   :  { %3389 = vadd.xlane.f32.xlu1 %v3388_v62 }
0x1fb3   :  { %v8051_v1 = vpop.eup %8050 }
0x1fb4   :  { %v3391_v5 = vsel %vm58_vm1, %v8051_v1, 0.0 }
0x1fb5   :  { %3392 = vadd.xlane.f32.xlu0 %v3391_v5 }
0x1fc2   :  { %3498 = vrot.lane.b32.xlu1 %v8936_v57, %s8170_s3 }
0x1fc6   :  { %3548 = vrot.lane.b32.xlu1 %v8942_v50, %s8170_s3 }
0x1fca   :  { %3546 = vrot.lane.b32.xlu1 %v8942_v50, %s8171_s1 }
0x1fcb   :  { %3448 = vrot.lane.b32.xlu0 %v8942_v50, %s8169_s22 }
0x1fcf   :  { %3496 = vrot.lane.b32.xlu0 %v8936_v57, %s8171_s1 }
0x203a   :  { %v3390_v8 = vpop.xlane.xlu1 %3389 }
0x203b   :  { %8052 = vrcp.f32 %v3390_v8 }
0x203e   :  { %v3393_v9 = vpop.xlane.xlu0 %3392  ;;  %v3499_v28 = vpop.permute.xlu1 %3498 }
0x203f   :  { %8054 = vrcp.f32 %v3393_v9  ;;  %v3504_v61 = vsel %vm58_vm1, %v3499_v28, 0 }
0x2042   :  { %v3449_v38 = vpop.permute.xlu0 %3448  ;;  %v3549_v52 = vpop.permute.xlu1 %3548 }
0x2043   :  { %v3454_v12 = vsel %vm65_vm0, %v3449_v38, 0  ;;  %v3554_v18 = vsel %vm58_vm1, %v3549_v52, 0 }
0x2044   :  { %7362 = vmatpush3.bf16.msra.mxu0 %v3454_v12 }
0x2045   :  { %7373 = vmatprep.subr.bf16.mxu0 %v8166_v20 }
0x2046   :  { %v3497_v3 = vpop.permute.xlu0 %3496  ;;  %v3547_v21 = vpop.permute.xlu1 %3546 }
0x2048   :  { %v8053_v19 = vpop.eup %8052 }
0x2049   :  { %v3396_v29 = vmul.f32 %v8053_v19, %v8049_v59 }
0x204b   :  { %v3398_v46 = vpack.c.bf16 %v3396_v29, %v3396_v29 }
0x204c   :  { %v8055_v58 = vpop.eup %8054 }
0x204d   :  { %7358 = vmatmul.mubr.msk.bf16.vlgmr.msra.gmra.mxu1 %vm58_vm1, %v3398_v46  ;;  %v3397_v36 = vmul.f32 %v8055_v58, %v8051_v1 }
0x204e   :  { %7368 = vmatpush3.bf16.xpose.msra.mxu1 %v3504_v61  ;;  %7369 = vmatprep.mubr.msk.bf16.mxu1 %vm8167_vm3, %v8166_v20 }
0x204f   :  { %v3399_v54 = vpack.c.bf16 %v3397_v36, %v3397_v36  ;;  %7379 = vmatprep.subr.bf16.mxu1 %v8166_v20 }
0x2051   :  { %7364 = vmatmul.mubr.msk.bf16.vlgmr.msra.gmra.mxu0 %vm58_vm1, %v3399_v54 }
0x2052   :  { %7374 = vmatpush3.bf16.xpose.msra.mxu0 %v3554_v18  ;;  %7375 = vmatprep.mubr.msk.bf16.mxu0 %vm8167_vm3, %v8166_v20 }
0x2053   :  { %7385 = vmatprep.subr.bf16.mxu0 %v8166_v20 }
0x2055   :  { %7370 = vmatmul.mubr.msk.bf16.vlgmr.msra.gmra.mxu1 %vm58_vm1, %v3497_v3 }
0x2056   :  { %7381 = vmatprep.mubr.msk.bf16.mxu1 %vm8167_vm3, %v8166_v20 }
0x2059   :  { %7376 = vmatmul.mubr.msk.bf16.vlgmr.msra.gmra.mxu0 %vm58_vm1, %v3547_v21 }
0x205a   :  { %7387 = vmatprep.mubr.msk.bf16.mxu0 %vm8167_vm3, %v8166_v20 }
0x210d   :  { %v9009_v24 = vpop.f32.mrf.mxu1 }
0x210f   :  { %v7359_v25 = vpop.f32.mrf.mxu1 }
0x2111   :  { %v3445_v48 = vpop.f32.mrf.mxu1  ;;  %v9011_v34 = vpop.f32.mrf.mxu0 }
0x2113   :  { %v7360_v35 = vpop.f32.mrf.mxu1  ;;  %v7365_v60 = vpop.f32.mrf.mxu0 }
0x2115   :  { %v3493_v15 = vpop.f32.mrf.mxu0  ;;  %v3540_v44 = vpop.f32.mrf.mxu1 }
0x2116   :  { %v3596_v23 = vsel %vm58_vm1, %v3540_v44, -inf }
0x2117   :  { %3597 = vmax.xlane.f32.xlu0 %v3596_v23  ;;  %v7366_v63 = vpop.f32.mrf.mxu0  ;;  %v7371_v17 = vpop.f32.mrf.mxu1 }
0x2119   :  { %v3543_v41 = vpop.f32.mrf.mxu1  ;;  %v3590_v31 = vpop.f32.mrf.mxu0 }
0x211a   :  { %v3599_v14 = vsel %vm58_vm1, %v3590_v31, -inf }
0x211b   :  { %v7372_v10 = vpop.f32.mrf.mxu1  ;;  %3600 = vmax.xlane.f32.xlu1 %v3599_v14  ;;  %v7377_v16 = vpop.f32.mrf.mxu0 }
0x211d   :  { %v3593_v45 = vpop.f32.mrf.mxu0 }
0x211f   :  { %v7378_v47 = vpop.f32.mrf.mxu0 }
0x212c   :  { %3620 = vrot.lane.b32.xlu1 %v8936_v57, %s8172_s23 }
0x2130   :  { %3718 = vrot.lane.b32.xlu1 %v8936_v57, %s8173_s24 }
0x2134   :  { %3768 = vrot.lane.b32.xlu1 %v8942_v50, %s8173_s24 }
0x2138   :  { %3766 = vrot.lane.b32.xlu1 %v8942_v50, %s8174_s25 }
0x21a0   :  { %v3598_v49 = vpop.xlane.xlu0 %3597 }
0x21a1   :  { %v3602_v51 = vsub.f32 %v3540_v44, %v3598_v49 }
0x21a3   :  { %v3604_v56 = vmul.f32 1.442695, %v3602_v51 }
0x21a4   :  { %v3601_v59 = vpop.xlane.xlu1 %3600 }
0x21a5   :  { %8056 = vpow2.f32 %v3604_v56  ;;  %v3603_v62 = vsub.f32 %v3590_v31, %v3601_v59 }
0x21a7   :  { %v3606_v1 = vmul.f32 1.442695, %v3603_v62 }
0x21a8   :  { %v3621_v5 = vpop.permute.xlu1 %3620 }
0x21a9   :  { %8058 = vpow2.f32 %v3606_v1  ;;  %v3626_v8 = vsel %vm65_vm0, %v3621_v5, 0 }
0x21aa   :  { %7380 = vmatpush3.bf16.msra.mxu1 %v3626_v8 }
0x21ab   :  { %7391 = vmatprep.subr.bf16.mxu1 %v8166_v20 }
0x21ac   :  { %v3719_v36 = vpop.permute.xlu1 %3718 }
0x21ad   :  { %v3724_v3 = vsel %vm58_vm1, %v3719_v36, 0 }
0x21b0   :  { %v3769_v25 = vpop.permute.xlu1 %3768 }
0x21b1   :  { %v3774_v35 = vsel %vm58_vm1, %v3769_v25, 0 }
0x21b2   :  { %v8057_v9 = vpop.eup %8056 }
0x21b3   :  { %v3608_v38 = vsel %vm58_vm1, %v8057_v9, 0.0 }
0x21b4   :  { %3609 = vadd.xlane.f32.xlu0 %v3608_v38  ;;  %v3767_v15 = vpop.permute.xlu1 %3766 }
0x21b6   :  { %v8059_v12 = vpop.eup %8058 }
0x21b7   :  { %v3611_v19 = vsel %vm58_vm1, %v8059_v12, 0.0 }
0x21b8   :  { %3612 = vadd.xlane.f32.xlu0 %v3611_v19 }
0x21ce   :  { %3668 = vrot.lane.b32.xlu0 %v8942_v50, %s8172_s23 }
0x21d2   :  { %3716 = vrot.lane.b32.xlu0 %v8936_v57, %s8174_s25 }
0x223d   :  { %v3610_v28 = vpop.xlane.xlu0 %3609 }
0x223e   :  { %8060 = vrcp.f32 %v3610_v28 }
0x2241   :  { %v3613_v29 = vpop.xlane.xlu0 %3612 }
0x2242   :  { %8062 = vrcp.f32 %v3613_v29 }
0x2245   :  { %v3669_v46 = vpop.permute.xlu0 %3668 }
0x2246   :  { %v3674_v58 = vsel %vm65_vm0, %v3669_v46, 0 }
0x2247   :  { %7386 = vmatpush3.bf16.msra.mxu0 %v3674_v58 }
0x2248   :  { %7397 = vmatprep.subr.bf16.mxu0 %v8166_v20 }
0x2249   :  { %v3717_v60 = vpop.permute.xlu0 %3716 }
0x224b   :  { %v8061_v61 = vpop.eup %8060 }
0x224c   :  { %v3616_v52 = vmul.f32 %v8061_v61, %v8057_v9 }
0x224e   :  { %v3618_v54 = vpack.c.bf16 %v3616_v52, %v3616_v52 }
0x224f   :  { %v8063_v18 = vpop.eup %8062 }
0x2250   :  { %7382 = vmatmul.mubr.msk.bf16.vlgmr.msra.gmra.mxu1 %vm58_vm1, %v3618_v54  ;;  %v3617_v21 = vmul.f32 %v8063_v18, %v8059_v12 }
0x2251   :  { %7392 = vmatpush3.bf16.xpose.msra.mxu1 %v3724_v3  ;;  %7393 = vmatprep.mubr.msk.bf16.mxu1 %vm8167_vm3, %v8166_v20 }
0x2252   :  { %v3619_v48 = vpack.c.bf16 %v3617_v21, %v3617_v21  ;;  %7403 = vmatprep.subr.bf16.mxu1 %v8166_v20 }
0x2254   :  { %7388 = vmatmul.mubr.msk.bf16.vlgmr.msra.gmra.mxu0 %vm58_vm1, %v3619_v48 }
0x2255   :  { %7398 = vmatpush3.bf16.xpose.msra.mxu0 %v3774_v35  ;;  %7399 = vmatprep.mubr.msk.bf16.mxu0 %vm8167_vm3, %v8166_v20 }
0x2256   :  { %7409 = vmatprep.subr.bf16.mxu0 %v8166_v20 }
0x2258   :  { %7394 = vmatmul.mubr.msk.bf16.vlgmr.msra.gmra.mxu1 %vm58_vm1, %v3717_v60 }
0x2259   :  { %7405 = vmatprep.mubr.msk.bf16.mxu1 %vm8167_vm3, %v8166_v20 }
0x225c   :  { %7400 = vmatmul.mubr.msk.bf16.vlgmr.msra.gmra.mxu0 %vm58_vm1, %v3767_v15 }
0x225d   :  { %7411 = vmatprep.mubr.msk.bf16.mxu0 %vm8167_vm3, %v8166_v20 }
0x2310   :  { %v9049_v44 = vpop.f32.mrf.mxu1 }
0x2312   :  { %v7383_v23 = vpop.f32.mrf.mxu1 }
0x2314   :  { %v3665_v63 = vpop.f32.mrf.mxu1  ;;  %v9051_v17 = vpop.f32.mrf.mxu0 }
0x2315   :  { %v7681_v41 = vpack.i.bf16 %v9051_v17, %v9049_v44 }
0x2316   :  { %v7384_v31 = vpop.f32.mrf.mxu1  ;;  %v7389_v14 = vpop.f32.mrf.mxu0 }
0x2318   :  { %v3713_v10 = vpop.f32.mrf.mxu0  ;;  %v3760_v16 = vpop.f32.mrf.mxu1 }
0x2319   :  { %v3816_v45 = vsel %vm58_vm1, %v3760_v16, -inf }
0x231a   :  { %3817 = vmax.xlane.f32.xlu0 %v3816_v45  ;;  %v7390_v47 = vpop.f32.mrf.mxu0  ;;  %v7395_v49 = vpop.f32.mrf.mxu1 }
0x231c   :  { %v3763_v51 = vpop.f32.mrf.mxu1  ;;  %v3810_v56 = vpop.f32.mrf.mxu0 }
0x231d   :  { %v3819_v59 = vsel %vm58_vm1, %v3810_v56, -inf }
0x231e   :  { %v7396_v62 = vpop.f32.mrf.mxu1  ;;  %3820 = vmax.xlane.f32.xlu1 %v3819_v59  ;;  %v7401_v1 = vpop.f32.mrf.mxu0 }
0x2320   :  { %v3813_v5 = vpop.f32.mrf.mxu0 }
0x2322   :  { %v7402_v8 = vpop.f32.mrf.mxu0 }
0x232f   :  { %3840 = vrot.lane.b32.xlu1 %v8936_v57, %s8175_s26 }
0x2333   :  { %3938 = vrot.lane.b32.xlu1 %v8936_v57, %s8176_s2 }
0x2337   :  { %3988 = vrot.lane.b32.xlu1 %v8942_v50, %s8176_s2 }
0x233b   :  { %3986 = vrot.lane.b32.xlu1 %v8942_v50, %s8177_s27 }
0x23a3   :  { %v3818_v9 = vpop.xlane.xlu0 %3817 }
0x23a4   :  { %v3822_v38 = vsub.f32 %v3760_v16, %v3818_v9 }
0x23a6   :  { %v3824_v12 = vmul.f32 1.442695, %v3822_v38 }
0x23a7   :  { %v3821_v19 = vpop.xlane.xlu1 %3820 }
0x23a8   :  { %8064 = vpow2.f32 %v3824_v12  ;;  %v3823_v28 = vsub.f32 %v3810_v56, %v3821_v19 }
0x23aa   :  { %v3826_v29 = vmul.f32 1.442695, %v3823_v28 }
0x23ab   :  { %v3841_v46 = vpop.permute.xlu1 %3840 }
0x23ac   :  { %8066 = vpow2.f32 %v3826_v29  ;;  %v3846_v58 = vsel %vm65_vm0, %v3841_v46, 0 }
0x23ad   :  { %7404 = vmatpush3.bf16.msra.mxu1 %v3846_v58 }
0x23ae   :  { %7415 = vmatprep.subr.bf16.mxu1 %v8166_v20 }
0x23af   :  { %v3939_v35 = vpop.permute.xlu1 %3938 }
0x23b0   :  { %v3944_v63 = vsel %vm58_vm1, %v3939_v35, 0 }
0x23b3   :  { %v3989_v14 = vpop.permute.xlu1 %3988 }
0x23b4   :  { %v3994_v16 = vsel %vm58_vm1, %v3989_v14, 0 }
0x23b5   :  { %v8065_v61 = vpop.eup %8064 }
0x23b6   :  { %v3828_v36 = vsel %vm58_vm1, %v8065_v61, 0.0 }
0x23b7   :  { %3829 = vadd.xlane.f32.xlu0 %v3828_v36  ;;  %v3987_v47 = vpop.permute.xlu1 %3986 }
0x23b9   :  { %v8067_v52 = vpop.eup %8066 }
0x23ba   :  { %v3831_v54 = vsel %vm58_vm1, %v8067_v52, 0.0 }
0x23bb   :  { %3832 = vadd.xlane.f32.xlu0 %v3831_v54 }
0x23d1   :  { %3888 = vrot.lane.b32.xlu0 %v8942_v50, %s8175_s26 }
0x23d5   :  { %3936 = vrot.lane.b32.xlu0 %v8936_v57, %s8177_s27 }
0x2440   :  { %v3830_v18 = vpop.xlane.xlu0 %3829 }
0x2441   :  { %8068 = vrcp.f32 %v3830_v18 }
0x2444   :  { %v3833_v3 = vpop.xlane.xlu0 %3832 }
0x2445   :  { %8070 = vrcp.f32 %v3833_v3 }
0x2448   :  { %v3889_v21 = vpop.permute.xlu0 %3888 }
0x2449   :  { %v3894_v25 = vsel %vm65_vm0, %v3889_v21, 0 }
0x244a   :  { %7410 = vmatpush3.bf16.msra.mxu0 %v3894_v25 }
0x244b   :  { %7421 = vmatprep.subr.bf16.mxu0 %v8166_v20 }
0x244c   :  { %v3937_v45 = vpop.permute.xlu0 %3936 }
0x244e   :  { %v8069_v48 = vpop.eup %8068 }
0x244f   :  { %v3836_v60 = vmul.f32 %v8069_v48, %v8065_v61 }
0x2451   :  { %v3838_v15 = vpack.c.bf16 %v3836_v60, %v3836_v60 }
0x2452   :  { %v8071_v23 = vpop.eup %8070 }
0x2453   :  { %v3837_v31 = vmul.f32 %v8071_v23, %v8067_v52  ;;  %7406 = vmatmul.mubr.msk.bf16.vlgmr.msra.gmra.mxu1 %vm58_vm1, %v3838_v15 }
0x2454   :  { %7416 = vmatpush3.bf16.xpose.msra.mxu1 %v3944_v63  ;;  %7417 = vmatprep.mubr.msk.bf16.mxu1 %vm8167_vm3, %v8166_v20 }
0x2455   :  { %v3839_v10 = vpack.c.bf16 %v3837_v31, %v3837_v31  ;;  %7427 = vmatprep.subr.bf16.mxu1 %v8166_v20 }
0x2457   :  { %7412 = vmatmul.mubr.msk.bf16.vlgmr.msra.gmra.mxu0 %vm58_vm1, %v3839_v10 }
0x2458   :  { %7422 = vmatpush3.bf16.xpose.msra.mxu0 %v3994_v16  ;;  %7423 = vmatprep.mubr.msk.bf16.mxu0 %vm8167_vm3, %v8166_v20 }
0x2459   :  { %7433 = vmatprep.subr.bf16.mxu0 %v8166_v20 }
0x245b   :  { %7418 = vmatmul.mubr.msk.bf16.vlgmr.msra.gmra.mxu1 %vm58_vm1, %v3937_v45 }
0x245c   :  { %7429 = vmatprep.mubr.msk.bf16.mxu1 %vm8167_vm3, %v8166_v20 }
0x245f   :  { %7424 = vmatmul.mubr.msk.bf16.vlgmr.msra.gmra.mxu0 %vm58_vm1, %v3987_v47 }
0x2460   :  { %7435 = vmatprep.mubr.msk.bf16.mxu0 %vm8167_vm3, %v8166_v20 }
0x2513   :  { %v3882_v49 = vpop.f32.mrf.mxu1 }
0x2515   :  { %v7407_v51 = vpop.f32.mrf.mxu1 }
0x2516   :  { %v7831_v51 = vld [vmem:[%s9792_s6 + $0x20] sm:$0xff]  }
0x2517   :  { %v3885_v56 = vpop.f32.mrf.mxu1  ;;  %v3930_v59 = vpop.f32.mrf.mxu0 }
0x2518   :  { %v7686_v52 = vpack.i.bf16 %v3930_v59, %v3882_v49  ;;  %v7830_v49 = vld [vmem:[%s9792_s6 + $0x28] sm:$0xff]  }
0x2519   :  { %v7408_v62 = vpop.f32.mrf.mxu1  ;;  %v7413_v1 = vpop.f32.mrf.mxu0 }
0x251b   :  { %v3933_v5 = vpop.f32.mrf.mxu0  ;;  %v3980_v8 = vpop.f32.mrf.mxu1 }
0x251c   :  { %v4036_v9 = vsel %vm58_vm1, %v3980_v8, -inf }
0x251d   :  { %4037 = vmax.xlane.f32.xlu0 %v4036_v9  ;;  %v7414_v38 = vpop.f32.mrf.mxu0  ;;  %v7419_v12 = vpop.f32.mrf.mxu1 }
0x251f   :  { %v3983_v19 = vpop.f32.mrf.mxu1  ;;  %v4030_v28 = vpop.f32.mrf.mxu0 }
0x2520   :  { %v4039_v29 = vsel %vm58_vm1, %v4030_v28, -inf }
0x2521   :  { %v7420_v46 = vpop.f32.mrf.mxu1  ;;  %4040 = vmax.xlane.f32.xlu1 %v4039_v29  ;;  %v7425_v58 = vpop.f32.mrf.mxu0 }
0x2523   :  { %v4033_v61 = vpop.f32.mrf.mxu0 }
0x2525   :  { %v7426_v36 = vpop.f32.mrf.mxu0 }
0x2532   :  { %4060 = vrot.lane.b32.xlu1 %v8936_v57, %s8178_s28 }
0x2536   :  { %7682 = vrot.lane.b32.xlu1 %v7681_v41, %s8179_s29 }
0x253a   :  { %7687 = vrot.lane.b32.xlu1 %v7686_v52, %s8180_s30 }
0x25a6   :  { %v4038_v54 = vpop.xlane.xlu0 %4037 }
0x25a7   :  { %v4042_v18 = vsub.f32 %v3980_v8, %v4038_v54 }
0x25a9   :  { %v4044_v3 = vmul.f32 1.442695, %v4042_v18 }
0x25aa   :  { %v4041_v21 = vpop.xlane.xlu1 %4040 }
0x25ab   :  { %8072 = vpow2.f32 %v4044_v3  ;;  %v4043_v25 = vsub.f32 %v4030_v28, %v4041_v21 }
0x25ad   :  { %v4046_v48 = vmul.f32 1.442695, %v4043_v25 }
0x25ae   :  { %v4061_v35 = vpop.permute.xlu1 %4060 }
0x25af   :  { %8074 = vpow2.f32 %v4046_v48  ;;  %v4066_v60 = vsel %vm65_vm0, %v4061_v35, 0 }
0x25b0   :  { %7428 = vmatpush3.bf16.msra.mxu1 %v4066_v60 }
0x25b1   :  { %7439 = vmatprep.subr.bf16.mxu1 %v8166_v20 }
0x25b2   :  { %v7683_v19 = vpop.permute.xlu1 %7682 }
0x25b3   :  { %v7685_v29 = vunpack.i.h.bf16 %v7683_v19  ;;  %v7684_v46 = vunpack.i.l.bf16 %v7683_v19 }
0x25b5   :  { %v4181_v52 = vsel %vm58_vm1, %v9011_v34, %v7685_v29  ;;  %v4180_v54 = vsel %vm58_vm1, %v9009_v24, %v7684_v46  ;;  %v4253_v34 = vrot.slane %v8932_v55, %v8528_v33  ;;  %v4285_v29 = vrot.slane %v8932_v55, %v8554_v27 }
0x25b6   :  { %v7688_v28 = vpop.permute.xlu1 %7687 }
0x25b7   :  { %v7690_v58 = vunpack.i.h.bf16 %v7688_v28  ;;  %v7689_v61 = vunpack.i.l.bf16 %v7688_v28 }
0x25b8   :  { %v8073_v57 = vpop.eup %8072 }
0x25b9   :  { %v4048_v44 = vsel %vm58_vm1, %v8073_v57, 0.0  ;;  %v4182_v21 = vsel %vm144_vm4, %v4180_v54, %v7689_v61  ;;  %v4183_v25 = vsel %vm144_vm4, %v4181_v52, %v7690_v58  ;;  %v4291_v52 = vrot.slane %v8932_v55, %v8564_v4 }
0x25ba   :  { %4049 = vadd.xlane.f32.xlu0 %v4048_v44 }
0x25bc   :  { %v8075_v17 = vpop.eup %8074 }
0x25bd   :  { %v4051_v41 = vsel %vm58_vm1, %v8075_v17, 0.0 }
0x25be   :  { %4052 = vadd.xlane.f32.xlu0 %v4051_v41 }
0x25d4   :  { %4108 = vrot.lane.b32.xlu0 %v8942_v50, %s8178_s28 }
0x2643   :  { %v4050_v15 = vpop.xlane.xlu0 %4049 }
0x2644   :  { %8076 = vrcp.f32 %v4050_v15 }
0x2647   :  { %v4053_v23 = vpop.xlane.xlu0 %4052 }
0x2648   :  { %8078 = vrcp.f32 %v4053_v23 }
0x264b   :  { %v4109_v63 = vpop.permute.xlu0 %4108 }
0x264c   :  { %v4114_v31 = vsel %vm65_vm0, %v4109_v63, 0 }
0x264d   :  { %7434 = vmatpush3.bf16.msra.mxu0 %v4114_v31 }
0x264e   :  { %7447 = vmatprep.subr.bf16.mxu0 %v8166_v20 }
0x2651   :  { %v8077_v14 = vpop.eup %8076 }
0x2652   :  { %v4056_v10 = vmul.f32 %v8077_v14, %v8073_v57 }
0x2654   :  { %v4058_v16 = vpack.c.bf16 %v4056_v10, %v4056_v10 }
0x2655   :  { %v8079_v45 = vpop.eup %8078 }
0x2656   :  { %v4057_v47 = vmul.f32 %v8079_v45, %v8075_v17  ;;  %7430 = vmatmul.mubr.msk.bf16.vlgmr.msra.gmra.mxu1 %vm58_vm1, %v4058_v16 }
0x2657   :  { %7443 = vmatprep.mubr.msk.bf16.mxu1 %vm8167_vm3, %v8166_v20  ;;  %7440 = vmatpush3.bf16.msra.mxu1 %v7830_v49 }
0x2658   :  { %v4059_v50 = vpack.c.bf16 %v4057_v47, %v4057_v47  ;;  %7441 = vmatprep.subr.bf16.mxu1 %v8166_v20 }
0x265a   :  { %7436 = vmatmul.mubr.msk.bf16.vlgmr.msra.gmra.mxu0 %vm58_vm1, %v4059_v50 }
0x265b   :  { %7451 = vmatprep.mubr.msk.bf16.mxu0 %vm8167_vm3, %v8166_v20  ;;  %7442 = vmatpush3.bf16.msra.mxu1 %v7831_v51 }
0x265c   :  { %7455 = vmatprep.subr.bf16.mxu1 %v8166_v20 }
0x2716   :  { %v4102_v56 = vpop.f32.mrf.mxu1 }
0x2718   :  { %v7431_v59 = vpop.f32.mrf.mxu1 }
0x2719   :  { %v7832_v59 = vld [vmem:[%s9793_s7 + $0x28] sm:$0xff]  }
0x271a   :  { %v4105_v62 = vpop.f32.mrf.mxu1  ;;  %v4150_v1 = vpop.f32.mrf.mxu0  ;;  %7448 = vmatpush3.bf16.msra.mxu0 %v7832_v59 }
0x271b   :  { %v7691_v5 = vpack.i.bf16 %v4150_v1, %v4102_v56  ;;  %v7833_v62 = vld [vmem:[%s9793_s7 + $0x20] sm:$0xff]   ;;  %7449 = vmatprep.subr.bf16.mxu0 %v8166_v20  ;;  %v7834_v1 = vld [vmem:[%s9794_s8 + $0x58] sm:$0xff]  }
0x271c   :  { %v7432_v8 = vpop.f32.mrf.mxu1  ;;  %v7437_v9 = vpop.f32.mrf.mxu0 }
0x271d   :  { %7692 = vrot.lane.b32.xlu0 %v7691_v5, %s8181_s16 }
0x271e   :  { %v4153_v38 = vpop.f32.mrf.mxu0  ;;  %7450 = vmatpush3.bf16.msra.mxu0 %v7833_v62 }
0x271f   :  { %7467 = vmatprep.subr.bf16.mxu0 %v8166_v20 }
0x2720   :  { %v7438_v12 = vpop.f32.mrf.mxu0 }
0x278f   :  { %v7693_v36 = vpop.permute.xlu0 %7692 }
0x2790   :  { %v7695_v18 = vunpack.i.h.bf16 %v7693_v36  ;;  %v7694_v3 = vunpack.i.l.bf16 %v7693_v36 }
0x2792   :  { %v4185_v48 = vsel %vm1292_vm5, %v4183_v25, %v7695_v18  ;;  %v4184_v35 = vsel %vm1292_vm5, %v4182_v21, %v7694_v3  ;;  %v7835_v25 = vld [vmem:[%s9794_s8 + $0x50] sm:$0xff]  }
0x2793   :  { %v4186_v60 = vpack.c.bf16 %v4185_v48, %v4184_v35  ;;  %v7836_v48 = vld [vmem:[%s9794_s8 + $0x48] sm:$0xff]   ;;  %v7837_v35 = vld [vmem:[%s9794_s8 + $0x40] sm:$0xff]  }
0x2795   :  { %7444 = vmatmul.mubr.msk.bf16.vlgmr.msra.gmra.mxu1 %vm212_vm2, %v4186_v60  ;;  %v4303_v60 = vrot.slane %v8932_v55, %v8581_v43 }
0x2796   :  { %7463 = vmatprep.mubr.msk.bf16.mxu1 %vm8167_vm3, %v8166_v20  ;;  %7456 = vmatpush3.bf16.msra.mxu1 %v7834_v1 }
0x2797   :  { %7457 = vmatprep.subr.bf16.mxu1 %v8166_v20 }
0x279a   :  { %7458 = vmatpush3.bf16.msra.mxu1 %v7835_v25 }
0x279b   :  { %7459 = vmatprep.subr.bf16.mxu1 %v8166_v20 }
0x279e   :  { %7460 = vmatpush3.bf16.msra.mxu1 %v7836_v48 }
0x279f   :  { %7461 = vmatprep.subr.bf16.mxu1 %v8166_v20 }
0x27a2   :  { %7462 = vmatpush3.bf16.msra.mxu1 %v7837_v35 }
0x27a3   :  { %7481 = vmatprep.subr.bf16.mxu1 %v8166_v20 }
0x2855   :  { %v4241_v24 = vpop.f32.mrf.mxu1 }
0x2856   :  { %v4248_v57 = vadd.f32 %v4241_v24, %v8905_v42 }
0x2857   :  { %v7445_v44 = vpop.f32.mrf.mxu1 }
0x2858   :  { %v4254_v17 = vadd.f32 %v4253_v34, %v4248_v57 }
0x2859   :  { %v4244_v41 = vpop.f32.mrf.mxu1 }
0x285a   :  { %v4249_v15 = vadd.f32 %v4244_v41, %v8908_v11  ;;  %v4256_v23 = vsel %vm212_vm2, %v4254_v17, 0.0 }
0x285b   :  { %4257 = vadd.xlane.f32.xlu1 %v4256_v23  ;;  %v7446_v63 = vpop.f32.mrf.mxu1 }
0x285c   :  { %v4255_v31 = vadd.f32 %v4253_v34, %v4249_v15 }
0x285e   :  { %v4259_v14 = vsel %vm212_vm2, %v4255_v31, 0.0 }
0x285f   :  { %4260 = vadd.xlane.f32.xlu0 %v4259_v14 }
0x28e4   :  { %v4258_v10 = vpop.xlane.xlu1 %4257 }
0x28e5   :  { %v4262_v16 = vmul.f32 0.03125, %v4258_v10 }
0x28e7   :  { %v4264_v45 = vsub.f32 %v4254_v17, %v4262_v16 }
0x28e8   :  { %v4261_v47 = vpop.xlane.xlu0 %4260 }
0x28e9   :  { %v4263_v50 = vmul.f32 0.03125, %v4261_v47  ;;  %v4266_v49 = vmul.f32 %v4264_v45, %v4264_v45 }
0x28eb   :  { %v4265_v42 = vsub.f32 %v4255_v31, %v4263_v50  ;;  %v4268_v51 = vsel %vm212_vm2, %v4266_v49, 0.0  ;;  %v4375_v31 = vrot.slane %v8932_v55, %v8590_v2 }
0x28ec   :  { %4269 = vadd.xlane.f32.xlu0 %v4268_v51 }
0x28ed   :  { %v4267_v56 = vmul.f32 %v4265_v42, %v4265_v42 }
0x28ef   :  { %v4271_v11 = vsel %vm212_vm2, %v4267_v56, 0.0 }
0x28f0   :  { %4272 = vadd.xlane.f32.xlu1 %v4271_v11 }
0x2975   :  { %v4270_v5 = vpop.xlane.xlu0 %4269 }
0x2976   :  { %v4274_v8 = vmul.f32 0.03125, %v4270_v5 }
0x2978   :  { %v4276_v9 = vadd.f32 1e-05, %v4274_v8 }
0x2979   :  { %v4273_v38 = vpop.xlane.xlu1 %4272 }
0x297a   :  { %8080 = vrsqrt.f32 %v4276_v9  ;;  %v4275_v12 = vmul.f32 0.03125, %v4273_v38 }
0x297c   :  { %v4277_v19 = vadd.f32 1e-05, %v4275_v12 }
0x297e   :  { %8082 = vrsqrt.f32 %v4277_v19 }
0x2987   :  { %v8081_v28 = vpop.eup %8080 }
0x2988   :  { %v4280_v46 = vmul.f32 %v8081_v28, %v4264_v45  ;;  %v7838_v28 = vld [vmem:[%s9791_s5 + $0x38] sm:$0xff]  }
0x298a   :  { %v4286_v61 = vmul.f32 %v4285_v29, %v4280_v46 }
0x298b   :  { %v8083_v58 = vpop.eup %8082 }
0x298c   :  { %v4281_v36 = vmul.f32 %v8083_v58, %v4265_v42  ;;  %v4292_v18 = vadd.f32 %v4291_v52, %v4286_v61 }
0x298e   :  { %v4287_v54 = vmul.f32 %v4285_v29, %v4281_v36  ;;  %v7839_v29 = vld [vmem:[%s9791_s5 + $0x30] sm:$0xff]  }
0x2990   :  { %v4293_v3 = vadd.f32 %v4291_v52, %v4287_v54 }
0x2992   :  { %v4294_v21 = vpack.c.bf16 %v4293_v3, %v4292_v18 }
0x2994   :  { %7452 = vmatmul.mubr.msk.bf16.vlgmr.msra.gmra.mxu0 %vm212_vm2, %v4294_v21 }
0x2995   :  { %7471 = vmatprep.mubr.msk.bf16.mxu0 %vm8167_vm3, %v8166_v20  ;;  %7468 = vmatpush3.bf16.msra.mxu0 %v7838_v28 }
0x2996   :  { %7469 = vmatprep.subr.bf16.mxu0 %v8166_v20 }
0x2999   :  { %7470 = vmatpush3.bf16.msra.mxu0 %v7839_v29 }
0x299a   :  { %7475 = vmatprep.subr.bf16.mxu0 %v8166_v20 }
0x2a54   :  { %v4353_v34 = vpop.f32.mrf.mxu0 }
0x2a55   :  { %v4354_v57 = vadd.f32 %v4353_v34, %v4303_v60 }
0x2a56   :  { %v7453_v24 = vpop.f32.mrf.mxu0 }
0x2a57   :  { %v4360_v15 = vmax.f32 %v4354_v57, 0.0 }
0x2a58   :  { %v4356_v44 = vpop.f32.mrf.mxu0 }
0x2a59   :  { %v4357_v17 = vadd.f32 %v4356_v44, %v4303_v60  ;;  %v4481_v60 = vrot.slane %v8932_v55, %v8615_v7 }
0x2a5a   :  { %v7454_v41 = vpop.f32.mrf.mxu0 }
0x2a5b   :  { %v4361_v23 = vmax.f32 %v4357_v17, 0.0  ;;  %v9208_v17 = vld [vmem:[%s9795_s9 + $0x18] sm:$0xff] }
0x2a5d   :  { %v4362_v63 = vpack.c.bf16 %v4361_v23, %v4360_v15 }
0x2a5f   :  { %7464 = vmatmul.mubr.msk.bf16.vlgmr.msra.gmra.mxu1 %vm1570_vm6, %v4362_v63 }
0x2a60   :  { %7483 = vmatprep.mubr.msk.bf16.mxu1 %vm8167_vm3, %v8166_v20 }
0x2b1f   :  { %v4437_v14 = vpop.f32.mrf.mxu1 }
0x2b20   :  { %v4438_v10 = vadd.f32 %v4437_v14, %v4375_v31 }
0x2b21   :  { %v7465_v16 = vpop.f32.mrf.mxu1 }
0x2b22   :  { %v4444_v45 = vadd.f32 %v4438_v10, %v4292_v18 }
0x2b23   :  { %v4440_v47 = vpop.f32.mrf.mxu1 }
0x2b24   :  { %v4441_v50 = vadd.f32 %v4440_v47, %v4375_v31  ;;  %v4446_v49 = vsel %vm212_vm2, %v4444_v45, 0.0 }
0x2b25   :  { %4447 = vadd.xlane.f32.xlu0 %v4446_v49  ;;  %v7466_v42 = vpop.f32.mrf.mxu1 }
0x2b26   :  { %v4445_v51 = vadd.f32 %v4441_v50, %v4293_v3  ;;  %v4475_v3 = vrot.slane %v8932_v55, %v8610_v0  ;;  %v4495_v55 = vrot.slane %v9208_v17, %v8296_v22 }
0x2b28   :  { %v4449_v56 = vsel %vm212_vm2, %v4445_v51, 0.0 }
0x2b29   :  { %4450 = vadd.xlane.f32.xlu1 %v4449_v56 }
0x2bae   :  { %v4448_v11 = vpop.xlane.xlu0 %4447 }
0x2baf   :  { %v4452_v59 = vmul.f32 0.03125, %v4448_v11 }
0x2bb1   :  { %v4454_v62 = vsub.f32 %v4444_v45, %v4452_v59 }
0x2bb2   :  { %v4451_v1 = vpop.xlane.xlu1 %4450 }
0x2bb3   :  { %v4453_v5 = vmul.f32 0.03125, %v4451_v1  ;;  %v4456_v8 = vmul.f32 %v4454_v62, %v4454_v62 }
0x2bb5   :  { %v4455_v9 = vsub.f32 %v4445_v51, %v4453_v5  ;;  %v4458_v38 = vsel %vm212_vm2, %v4456_v8, 0.0 }
0x2bb6   :  { %4459 = vadd.xlane.f32.xlu0 %v4458_v38 }
0x2bb7   :  { %v4457_v12 = vmul.f32 %v4455_v9, %v4455_v9 }
0x2bb9   :  { %v4461_v19 = vsel %vm212_vm2, %v4457_v12, 0.0 }
0x2bba   :  { %4462 = vadd.xlane.f32.xlu1 %v4461_v19 }
0x2c3f   :  { %v4460_v46 = vpop.xlane.xlu0 %4459 }
0x2c40   :  { %v4464_v58 = vmul.f32 0.03125, %v4460_v46 }
0x2c42   :  { %v4466_v61 = vadd.f32 1e-05, %v4464_v58 }
0x2c43   :  { %v4463_v36 = vpop.xlane.xlu1 %4462 }
0x2c44   :  { %8084 = vrsqrt.f32 %v4466_v61  ;;  %v4465_v52 = vmul.f32 0.03125, %v4463_v36 }
0x2c46   :  { %v4467_v54 = vadd.f32 1e-05, %v4465_v52 }
0x2c48   :  { %8086 = vrsqrt.f32 %v4467_v54 }
0x2c51   :  { %v8085_v18 = vpop.eup %8084 }
0x2c52   :  { %v4470_v21 = vmul.f32 %v8085_v18, %v4454_v62 }
0x2c54   :  { %v4476_v48 = vmul.f32 %v4475_v3, %v4470_v21 }
0x2c55   :  { %v8087_v25 = vpop.eup %8086 }
0x2c56   :  { %v4471_v35 = vmul.f32 %v8087_v25, %v4455_v9  ;;  %v9196_v24 = vadd.f32 %v4481_v60, %v4476_v48 }
0x2c58   :  { %v4477_v34 = vmul.f32 %v4475_v3, %v4471_v35 }
0x2c5a   :  { %v9198_v57 = vadd.f32 %v4481_v60, %v4477_v34 }
0x2c5c   :  { %v4486_v44 = vpack.c.bf16 %v9198_v57, %v9196_v24 }
0x2c5e   :  { %7472 = vmatmul.mubr.msk.bf16.vlgmr.msra.gmra.mxu0 %vm212_vm2, %v4486_v44 }
0x2c5f   :  { %7477 = vmatprep.mubr.msk.bf16.mxu0 %vm8167_vm3, %v8166_v20 }
0x2d1e   :  { %v4545_v41 = vpop.f32.mrf.mxu0 }
0x2d1f   :  { %v4546_v15 = vadd.f32 %v4545_v41, %v4495_v55 }
0x2d20   :  { %v7473_v23 = vpop.f32.mrf.mxu0 }
0x2d21   :  { %v9212_v63 = vpack.c.bf16 %v4546_v15, %v4546_v15 }
0x2d22   :  { %v4548_v31 = vpop.f32.mrf.mxu0 }
0x2d23   :  { %v4549_v14 = vadd.f32 %v4548_v31, %v4495_v55  ;;  %4555 = vrot.lane.b32.xlu0 %v9212_v63, %s8168_s17 }
0x2d24   :  { %v7474_v10 = vpop.f32.mrf.mxu0 }
0x2d25   :  { %v9216_v16 = vpack.c.bf16 %v4549_v14, %v4549_v14 }
0x2d27   :  { %4604 = vrot.lane.b32.xlu1 %v9216_v16, %s8168_s17 }
0x2d95   :  { %v4556_v45 = vpop.permute.xlu0 %4555 }
0x2d96   :  { %v4561_v47 = vsel %vm58_vm1, %v4556_v45, 0 }
0x2d97   :  { %7476 = vmatpush3.bf16.xpose.msra.mxu0 %v4561_v47 }
0x2d98   :  { %7487 = vmatprep.subr.bf16.mxu0 %v8166_v20 }
0x2d99   :  { %v4605_v22 = vpop.permute.xlu1 %4604 }
0x2d9a   :  { %v4610_v50 = vsel %vm58_vm1, %v4605_v22, 0 }
0x2d9b   :  { %7482 = vmatpush3.bf16.xpose.msra.mxu1 %v4610_v50 }
0x2d9c   :  { %7493 = vmatprep.subr.bf16.mxu1 %v8166_v20 }
0x2d9e   :  { %7478 = vmatmul.mubr.msk.bf16.vlgmr.msra.gmra.mxu0 %vm58_vm1, %v9212_v63 }
0x2d9f   :  { %7489 = vmatprep.mubr.msk.bf16.mxu0 %vm8167_vm3, %v8166_v20 }
0x2da2   :  { %7484 = vmatmul.mubr.msk.bf16.vlgmr.msra.gmra.mxu1 %vm58_vm1, %v9216_v16 }
0x2da3   :  { %7495 = vmatprep.mubr.msk.bf16.mxu1 %vm8167_vm3, %v8166_v20 }
0x2e5e   :  { %v4597_v49 = vpop.f32.mrf.mxu0 }
0x2e5f   :  { %v4652_v42 = vsel %vm58_vm1, %v4597_v49, -inf }
0x2e60   :  { %4653 = vmax.xlane.f32.xlu1 %v4652_v42  ;;  %v7479_v51 = vpop.f32.mrf.mxu0 }
0x2e62   :  { %v4600_v56 = vpop.f32.mrf.mxu0  ;;  %v4646_v11 = vpop.f32.mrf.mxu1 }
0x2e63   :  { %v4655_v59 = vsel %vm58_vm1, %v4646_v11, -inf }
0x2e64   :  { %4656 = vmax.xlane.f32.xlu0 %v4655_v59  ;;  %v7480_v62 = vpop.f32.mrf.mxu0  ;;  %v7485_v1 = vpop.f32.mrf.mxu1 }
0x2e66   :  { %v4649_v5 = vpop.f32.mrf.mxu1 }
0x2e68   :  { %v7486_v8 = vpop.f32.mrf.mxu1 }
0x2e71   :  { %4724 = vrot.lane.b32.xlu1 %v9216_v16, %s8169_s22 }
0x2e7a   :  { %4676 = vrot.lane.b32.xlu0 %v9212_v63, %s8169_s22 }
0x2ee9   :  { %v4654_v9 = vpop.xlane.xlu1 %4653 }
0x2eea   :  { %v4658_v38 = vsub.f32 %v4597_v49, %v4654_v9 }
0x2eec   :  { %v4660_v12 = vmul.f32 1.442695, %v4658_v38 }
0x2eed   :  { %v4657_v19 = vpop.xlane.xlu0 %4656  ;;  %v4725_v28 = vpop.permute.xlu1 %4724 }
0x2eee   :  { %8088 = vpow2.f32 %v4660_v12  ;;  %v4659_v29 = vsub.f32 %v4646_v11, %v4657_v19  ;;  %v4730_v46 = vsel %vm65_vm0, %v4725_v28, 0 }
0x2eef   :  { %7494 = vmatpush3.bf16.msra.mxu1 %v4730_v46 }
0x2ef0   :  { %v4662_v58 = vmul.f32 1.442695, %v4659_v29  ;;  %7505 = vmatprep.subr.bf16.mxu1 %v8166_v20 }
0x2ef1   :  { %v4677_v61 = vpop.permute.xlu0 %4676 }
0x2ef2   :  { %8090 = vpow2.f32 %v4662_v58  ;;  %v4682_v36 = vsel %vm65_vm0, %v4677_v61, 0 }
0x2ef3   :  { %7488 = vmatpush3.bf16.msra.mxu0 %v4682_v36 }
0x2ef4   :  { %7499 = vmatprep.subr.bf16.mxu0 %v8166_v20 }
0x2efb   :  { %v8089_v52 = vpop.eup %8088 }
0x2efc   :  { %v4664_v54 = vsel %vm58_vm1, %v8089_v52, 0.0 }
0x2efd   :  { %4665 = vadd.xlane.f32.xlu0 %v4664_v54 }
0x2eff   :  { %v8091_v18 = vpop.eup %8090 }
0x2f00   :  { %v4667_v3 = vsel %vm58_vm1, %v8091_v18, 0.0 }
0x2f01   :  { %4668 = vadd.xlane.f32.xlu1 %v4667_v3 }
0x2f12   :  { %4774 = vrot.lane.b32.xlu1 %v9212_v63, %s8170_s3 }
0x2f13   :  { %4824 = vrot.lane.b32.xlu0 %v9216_v16, %s8170_s3 }
0x2f16   :  { %4772 = vrot.lane.b32.xlu1 %v9212_v63, %s8171_s1 }
0x2f17   :  { %4822 = vrot.lane.b32.xlu0 %v9216_v16, %s8171_s1 }
0x2f86   :  { %v4666_v21 = vpop.xlane.xlu0 %4665 }
0x2f87   :  { %8092 = vrcp.f32 %v4666_v21 }
0x2f8a   :  { %v4669_v25 = vpop.xlane.xlu1 %4668  ;;  %v4825_v15 = vpop.permute.xlu0 %4824 }
0x2f8b   :  { %8094 = vrcp.f32 %v4669_v25  ;;  %v4830_v31 = vsel %vm58_vm1, %v4825_v15, 0 }
0x2f8e   :  { %v4775_v60 = vpop.permute.xlu1 %4774  ;;  %v4823_v10 = vpop.permute.xlu0 %4822 }
0x2f8f   :  { %v4780_v41 = vsel %vm58_vm1, %v4775_v60, 0 }
0x2f92   :  { %v4773_v14 = vpop.permute.xlu1 %4772 }
0x2f94   :  { %v8093_v48 = vpop.eup %8092 }
0x2f95   :  { %v4672_v35 = vmul.f32 %v8093_v48, %v8089_v52 }
0x2f97   :  { %v4674_v34 = vpack.c.bf16 %v4672_v35, %v4672_v35 }
0x2f98   :  { %v8095_v44 = vpop.eup %8094 }
0x2f99   :  { %v4673_v55 = vmul.f32 %v8095_v44, %v8091_v18  ;;  %7490 = vmatmul.mubr.msk.bf16.vlgmr.msra.gmra.mxu0 %vm58_vm1, %v4674_v34 }
0x2f9a   :  { %7500 = vmatpush3.bf16.xpose.msra.mxu0 %v4780_v41  ;;  %7501 = vmatprep.mubr.msk.bf16.mxu0 %vm8167_vm3, %v8166_v20 }
0x2f9b   :  { %v4675_v23 = vpack.c.bf16 %v4673_v55, %v4673_v55  ;;  %7511 = vmatprep.subr.bf16.mxu0 %v8166_v20 }
0x2f9d   :  { %7496 = vmatmul.mubr.msk.bf16.vlgmr.msra.gmra.mxu1 %vm58_vm1, %v4675_v23 }
0x2f9e   :  { %7506 = vmatpush3.bf16.xpose.msra.mxu1 %v4830_v31  ;;  %7507 = vmatprep.mubr.msk.bf16.mxu1 %vm8167_vm3, %v8166_v20 }
0x2f9f   :  { %7517 = vmatprep.subr.bf16.mxu1 %v8166_v20 }
0x2fa1   :  { %7502 = vmatmul.mubr.msk.bf16.vlgmr.msra.gmra.mxu0 %vm58_vm1, %v4773_v14 }
0x2fa2   :  { %7513 = vmatprep.mubr.msk.bf16.mxu0 %vm8167_vm3, %v8166_v20 }
0x2fa5   :  { %7508 = vmatmul.mubr.msk.bf16.vlgmr.msra.gmra.mxu1 %vm58_vm1, %v4823_v10 }
0x2fa6   :  { %7519 = vmatprep.mubr.msk.bf16.mxu1 %vm8167_vm3, %v8166_v20 }
0x3059   :  { %v9268_v45 = vpop.f32.mrf.mxu0 }
0x305b   :  { %v7491_v47 = vpop.f32.mrf.mxu0 }
0x305d   :  { %v4721_v22 = vpop.f32.mrf.mxu0  ;;  %v9270_v50 = vpop.f32.mrf.mxu1 }
0x305f   :  { %v7492_v49 = vpop.f32.mrf.mxu0  ;;  %v7497_v42 = vpop.f32.mrf.mxu1 }
0x3061   :  { %v4769_v51 = vpop.f32.mrf.mxu1  ;;  %v4816_v56 = vpop.f32.mrf.mxu0 }
0x3062   :  { %v4872_v11 = vsel %vm58_vm1, %v4816_v56, -inf }
0x3063   :  { %v7498_v59 = vpop.f32.mrf.mxu1  ;;  %4873 = vmax.xlane.f32.xlu1 %v4872_v11  ;;  %v7503_v62 = vpop.f32.mrf.mxu0 }
0x3065   :  { %v4819_v1 = vpop.f32.mrf.mxu0  ;;  %v4866_v5 = vpop.f32.mrf.mxu1 }
0x3066   :  { %v4875_v8 = vsel %vm58_vm1, %v4866_v5, -inf }
0x3067   :  { %4876 = vmax.xlane.f32.xlu0 %v4875_v8  ;;  %v7504_v9 = vpop.f32.mrf.mxu0  ;;  %v7509_v38 = vpop.f32.mrf.mxu1 }
0x3069   :  { %v4869_v12 = vpop.f32.mrf.mxu1 }
0x306b   :  { %v7510_v19 = vpop.f32.mrf.mxu1 }
0x3074   :  { %4944 = vrot.lane.b32.xlu1 %v9216_v16, %s8172_s23 }
0x307d   :  { %4896 = vrot.lane.b32.xlu0 %v9212_v63, %s8172_s23 }
0x30ec   :  { %v4874_v28 = vpop.xlane.xlu1 %4873 }
0x30ed   :  { %v4878_v29 = vsub.f32 %v4816_v56, %v4874_v28 }
0x30ef   :  { %v4880_v46 = vmul.f32 1.442695, %v4878_v29 }
0x30f0   :  { %v4877_v58 = vpop.xlane.xlu0 %4876  ;;  %v4945_v61 = vpop.permute.xlu1 %4944 }
0x30f1   :  { %8096 = vpow2.f32 %v4880_v46  ;;  %v4879_v36 = vsub.f32 %v4866_v5, %v4877_v58  ;;  %v4950_v52 = vsel %vm65_vm0, %v4945_v61, 0 }
0x30f2   :  { %7518 = vmatpush3.bf16.msra.mxu1 %v4950_v52 }
0x30f3   :  { %v4882_v54 = vmul.f32 1.442695, %v4879_v36  ;;  %7529 = vmatprep.subr.bf16.mxu1 %v8166_v20 }
0x30f4   :  { %v4897_v18 = vpop.permute.xlu0 %4896 }
0x30f5   :  { %8098 = vpow2.f32 %v4882_v54  ;;  %v4902_v3 = vsel %vm65_vm0, %v4897_v18, 0 }
0x30f6   :  { %7512 = vmatpush3.bf16.msra.mxu0 %v4902_v3 }
0x30f7   :  { %7523 = vmatprep.subr.bf16.mxu0 %v8166_v20 }
0x30fe   :  { %v8097_v21 = vpop.eup %8096 }
0x30ff   :  { %v4884_v25 = vsel %vm58_vm1, %v8097_v21, 0.0 }
0x3100   :  { %4885 = vadd.xlane.f32.xlu0 %v4884_v25 }
0x3102   :  { %v8099_v48 = vpop.eup %8098 }
0x3103   :  { %v4887_v35 = vsel %vm58_vm1, %v8099_v48, 0.0 }
0x3104   :  { %4888 = vadd.xlane.f32.xlu1 %v4887_v35 }
0x3115   :  { %4994 = vrot.lane.b32.xlu1 %v9212_v63, %s8173_s24 }
0x3116   :  { %5044 = vrot.lane.b32.xlu0 %v9216_v16, %s8173_s24 }
0x3119   :  { %4992 = vrot.lane.b32.xlu1 %v9212_v63, %s8174_s25 }
0x311a   :  { %5042 = vrot.lane.b32.xlu0 %v9216_v16, %s8174_s25 }
0x3189   :  { %v4886_v60 = vpop.xlane.xlu0 %4885 }
0x318a   :  { %8100 = vrcp.f32 %v4886_v60 }
0x318d   :  { %v4889_v34 = vpop.xlane.xlu1 %4888  ;;  %v5045_v10 = vpop.permute.xlu0 %5044 }
0x318e   :  { %8102 = vrcp.f32 %v4889_v34  ;;  %v5050_v22 = vsel %vm58_vm1, %v5045_v10, 0 }
0x3191   :  { %v4995_v41 = vpop.permute.xlu1 %4994  ;;  %v5043_v42 = vpop.permute.xlu0 %5042 }
0x3192   :  { %v5000_v14 = vsel %vm58_vm1, %v4995_v41, 0 }
0x3195   :  { %v4993_v49 = vpop.permute.xlu1 %4992 }
0x3197   :  { %v8101_v44 = vpop.eup %8100 }
0x3198   :  { %v4892_v55 = vmul.f32 %v8101_v44, %v8097_v21 }
0x319a   :  { %v4894_v15 = vpack.c.bf16 %v4892_v55, %v4892_v55 }
0x319b   :  { %v8103_v23 = vpop.eup %8102 }
0x319c   :  { %v4893_v31 = vmul.f32 %v8103_v23, %v8099_v48  ;;  %7514 = vmatmul.mubr.msk.bf16.vlgmr.msra.gmra.mxu0 %vm58_vm1, %v4894_v15 }
0x319d   :  { %7524 = vmatpush3.bf16.xpose.msra.mxu0 %v5000_v14  ;;  %7525 = vmatprep.mubr.msk.bf16.mxu0 %vm8167_vm3, %v8166_v20 }
0x319e   :  { %v4895_v47 = vpack.c.bf16 %v4893_v31, %v4893_v31  ;;  %7535 = vmatprep.subr.bf16.mxu0 %v8166_v20 }
0x31a0   :  { %7520 = vmatmul.mubr.msk.bf16.vlgmr.msra.gmra.mxu1 %vm58_vm1, %v4895_v47 }
0x31a1   :  { %7530 = vmatpush3.bf16.xpose.msra.mxu1 %v5050_v22  ;;  %7531 = vmatprep.mubr.msk.bf16.mxu1 %vm8167_vm3, %v8166_v20 }
0x31a2   :  { %7541 = vmatprep.subr.bf16.mxu1 %v8166_v20 }
0x31a4   :  { %7526 = vmatmul.mubr.msk.bf16.vlgmr.msra.gmra.mxu0 %vm58_vm1, %v4993_v49 }
0x31a5   :  { %7537 = vmatprep.mubr.msk.bf16.mxu0 %vm8167_vm3, %v8166_v20 }
0x31a8   :  { %7532 = vmatmul.mubr.msk.bf16.vlgmr.msra.gmra.mxu1 %vm58_vm1, %v5043_v42 }
0x31a9   :  { %7543 = vmatprep.mubr.msk.bf16.mxu1 %vm8167_vm3, %v8166_v20 }
0x325c   :  { %v9308_v51 = vpop.f32.mrf.mxu0 }
0x325e   :  { %v7515_v56 = vpop.f32.mrf.mxu0 }
0x3260   :  { %v4941_v11 = vpop.f32.mrf.mxu0  ;;  %v9310_v59 = vpop.f32.mrf.mxu1 }
0x3261   :  { %v7696_v62 = vpack.i.bf16 %v9310_v59, %v9308_v51 }
0x3262   :  { %v7516_v1 = vpop.f32.mrf.mxu0  ;;  %v7521_v5 = vpop.f32.mrf.mxu1 }
0x3264   :  { %v4989_v8 = vpop.f32.mrf.mxu1  ;;  %v5036_v9 = vpop.f32.mrf.mxu0 }
0x3265   :  { %v5092_v38 = vsel %vm58_vm1, %v5036_v9, -inf }
0x3266   :  { %v7522_v12 = vpop.f32.mrf.mxu1  ;;  %5093 = vmax.xlane.f32.xlu1 %v5092_v38  ;;  %v7527_v19 = vpop.f32.mrf.mxu0 }
0x3268   :  { %v5039_v28 = vpop.f32.mrf.mxu0  ;;  %v5086_v29 = vpop.f32.mrf.mxu1 }
0x3269   :  { %v5095_v46 = vsel %vm58_vm1, %v5086_v29, -inf }
0x326a   :  { %5096 = vmax.xlane.f32.xlu0 %v5095_v46  ;;  %v7528_v58 = vpop.f32.mrf.mxu0  ;;  %v7533_v61 = vpop.f32.mrf.mxu1 }
0x326c   :  { %v5089_v36 = vpop.f32.mrf.mxu1 }
0x326e   :  { %v7534_v52 = vpop.f32.mrf.mxu1 }
0x3277   :  { %5164 = vrot.lane.b32.xlu1 %v9216_v16, %s8175_s26 }
0x3280   :  { %5116 = vrot.lane.b32.xlu0 %v9212_v63, %s8175_s26 }
0x32ef   :  { %v5094_v54 = vpop.xlane.xlu1 %5093 }
0x32f0   :  { %v5098_v18 = vsub.f32 %v5036_v9, %v5094_v54 }
0x32f2   :  { %v5100_v3 = vmul.f32 1.442695, %v5098_v18 }
0x32f3   :  { %v5097_v21 = vpop.xlane.xlu0 %5096  ;;  %v5165_v25 = vpop.permute.xlu1 %5164 }
0x32f4   :  { %8104 = vpow2.f32 %v5100_v3  ;;  %v5099_v48 = vsub.f32 %v5086_v29, %v5097_v21  ;;  %v5170_v35 = vsel %vm65_vm0, %v5165_v25, 0 }
0x32f5   :  { %7542 = vmatpush3.bf16.msra.mxu1 %v5170_v35 }
0x32f6   :  { %v5102_v60 = vmul.f32 1.442695, %v5099_v48  ;;  %7553 = vmatprep.subr.bf16.mxu1 %v8166_v20 }
0x32f7   :  { %v5117_v34 = vpop.permute.xlu0 %5116 }
0x32f8   :  { %8106 = vpow2.f32 %v5102_v60  ;;  %v5122_v44 = vsel %vm65_vm0, %v5117_v34, 0 }
0x32f9   :  { %7536 = vmatpush3.bf16.msra.mxu0 %v5122_v44 }
0x32fa   :  { %7547 = vmatprep.subr.bf16.mxu0 %v8166_v20 }
0x3301   :  { %v8105_v55 = vpop.eup %8104 }
0x3302   :  { %v5104_v41 = vsel %vm58_vm1, %v8105_v55, 0.0 }
0x3303   :  { %5105 = vadd.xlane.f32.xlu0 %v5104_v41 }
0x3305   :  { %v8107_v15 = vpop.eup %8106 }
0x3306   :  { %v5107_v23 = vsel %vm58_vm1, %v8107_v15, 0.0 }
0x3307   :  { %5108 = vadd.xlane.f32.xlu1 %v5107_v23 }
0x3318   :  { %5214 = vrot.lane.b32.xlu1 %v9212_v63, %s8176_s2 }
0x3319   :  { %5264 = vrot.lane.b32.xlu0 %v9216_v16, %s8176_s2 }
0x331c   :  { %5212 = vrot.lane.b32.xlu1 %v9212_v63, %s8177_s27 }
0x331d   :  { %5262 = vrot.lane.b32.xlu0 %v9216_v16, %s8177_s27 }
0x338c   :  { %v5106_v31 = vpop.xlane.xlu0 %5105 }
0x338d   :  { %8108 = vrcp.f32 %v5106_v31 }
0x3390   :  { %v5109_v14 = vpop.xlane.xlu1 %5108  ;;  %v5265_v1 = vpop.permute.xlu0 %5264 }
0x3391   :  { %8110 = vrcp.f32 %v5109_v14  ;;  %v5270_v8 = vsel %vm58_vm1, %v5265_v1, 0 }
0x3394   :  { %v5215_v22 = vpop.permute.xlu1 %5214  ;;  %v5263_v38 = vpop.permute.xlu0 %5262 }
0x3395   :  { %v5220_v11 = vsel %vm58_vm1, %v5215_v22, 0 }
0x3398   :  { %v5213_v9 = vpop.permute.xlu1 %5212 }
0x339a   :  { %v8109_v10 = vpop.eup %8108 }
0x339b   :  { %v5112_v47 = vmul.f32 %v8109_v10, %v8105_v55 }
0x339d   :  { %v5114_v49 = vpack.c.bf16 %v5112_v47, %v5112_v47 }
0x339e   :  { %v8111_v42 = vpop.eup %8110 }
0x339f   :  { %v5113_v56 = vmul.f32 %v8111_v42, %v8107_v15  ;;  %7538 = vmatmul.mubr.msk.bf16.vlgmr.msra.gmra.mxu0 %vm58_vm1, %v5114_v49 }
0x33a0   :  { %7548 = vmatpush3.bf16.xpose.msra.mxu0 %v5220_v11  ;;  %7549 = vmatprep.mubr.msk.bf16.mxu0 %vm8167_vm3, %v8166_v20 }
0x33a1   :  { %v5115_v5 = vpack.c.bf16 %v5113_v56, %v5113_v56  ;;  %7559 = vmatprep.subr.bf16.mxu0 %v8166_v20 }
0x33a3   :  { %7544 = vmatmul.mubr.msk.bf16.vlgmr.msra.gmra.mxu1 %vm58_vm1, %v5115_v5 }
0x33a4   :  { %7554 = vmatpush3.bf16.xpose.msra.mxu1 %v5270_v8  ;;  %7555 = vmatprep.mubr.msk.bf16.mxu1 %vm8167_vm3, %v8166_v20 }
0x33a5   :  { %7565 = vmatprep.subr.bf16.mxu1 %v8166_v20 }
0x33a7   :  { %7550 = vmatmul.mubr.msk.bf16.vlgmr.msra.gmra.mxu0 %vm58_vm1, %v5213_v9 }
0x33a8   :  { %7561 = vmatprep.mubr.msk.bf16.mxu0 %vm8167_vm3, %v8166_v20 }
0x33ab   :  { %7556 = vmatmul.mubr.msk.bf16.vlgmr.msra.gmra.mxu1 %vm58_vm1, %v5263_v38  ;;  %v7840_v38 = vld [vmem:[%s9792_s6 + $0x38] sm:$0xff]  }
0x33ac   :  { %7567 = vmatprep.mubr.msk.bf16.mxu1 %vm8167_vm3, %v8166_v20 }
0x345f   :  { %v5158_v12 = vpop.f32.mrf.mxu0 }
0x3461   :  { %v7539_v19 = vpop.f32.mrf.mxu0 }
0x3463   :  { %v5161_v28 = vpop.f32.mrf.mxu0  ;;  %v5206_v29 = vpop.f32.mrf.mxu1 }
0x3464   :  { %v7701_v46 = vpack.i.bf16 %v5206_v29, %v5158_v12  ;;  %v7841_v12 = vld [vmem:[%s9792_s6 + $0x30] sm:$0xff]  }
0x3465   :  { %v7540_v58 = vpop.f32.mrf.mxu0  ;;  %v7545_v61 = vpop.f32.mrf.mxu1 }
0x3467   :  { %v5209_v36 = vpop.f32.mrf.mxu1  ;;  %v5256_v52 = vpop.f32.mrf.mxu0 }
0x3468   :  { %v5312_v54 = vsel %vm58_vm1, %v5256_v52, -inf }
0x3469   :  { %v7546_v18 = vpop.f32.mrf.mxu1  ;;  %5313 = vmax.xlane.f32.xlu1 %v5312_v54  ;;  %v7551_v3 = vpop.f32.mrf.mxu0 }
0x346b   :  { %v5259_v21 = vpop.f32.mrf.mxu0  ;;  %v5306_v25 = vpop.f32.mrf.mxu1 }
0x346c   :  { %v5315_v48 = vsel %vm58_vm1, %v5306_v25, -inf }
0x346d   :  { %5316 = vmax.xlane.f32.xlu0 %v5315_v48  ;;  %v7552_v35 = vpop.f32.mrf.mxu0  ;;  %v7557_v60 = vpop.f32.mrf.mxu1 }
0x346f   :  { %v5309_v34 = vpop.f32.mrf.mxu1 }
0x3471   :  { %v7558_v44 = vpop.f32.mrf.mxu1 }
0x34f2   :  { %v5314_v55 = vpop.xlane.xlu1 %5313 }
0x34f3   :  { %v5318_v41 = vsub.f32 %v5256_v52, %v5314_v55 }
0x34f5   :  { %v5320_v15 = vmul.f32 1.442695, %v5318_v41 }
0x34f6   :  { %v5317_v23 = vpop.xlane.xlu0 %5316 }
0x34f7   :  { %8112 = vpow2.f32 %v5320_v15  ;;  %v5319_v31 = vsub.f32 %v5306_v25, %v5317_v23 }
0x34f9   :  { %v5322_v14 = vmul.f32 1.442695, %v5319_v31 }
0x34fb   :  { %8114 = vpow2.f32 %v5322_v14 }
0x3504   :  { %v8113_v10 = vpop.eup %8112 }
0x3505   :  { %v5324_v47 = vsel %vm58_vm1, %v8113_v10, 0.0 }
0x3506   :  { %5325 = vadd.xlane.f32.xlu0 %v5324_v47 }
0x3508   :  { %v8115_v22 = vpop.eup %8114 }
0x3509   :  { %v5327_v49 = vsel %vm58_vm1, %v8115_v22, 0.0 }
0x350a   :  { %5328 = vadd.xlane.f32.xlu1 %v5327_v49 }
0x351b   :  { %5384 = vrot.lane.b32.xlu1 %v9216_v16, %s8178_s28 }
0x351c   :  { %5336 = vrot.lane.b32.xlu0 %v9212_v63, %s8178_s28 }
0x351f   :  { %7697 = vrot.lane.b32.xlu1 %v7696_v62, %s8179_s29 }
0x3520   :  { %7702 = vrot.lane.b32.xlu0 %v7701_v46, %s8180_s30 }
0x358f   :  { %v5326_v42 = vpop.xlane.xlu0 %5325 }
0x3590   :  { %8116 = vrcp.f32 %v5326_v42 }
0x3593   :  { %v5337_v56 = vpop.permute.xlu0 %5336  ;;  %v5329_v11 = vpop.xlane.xlu1 %5328 }
0x3594   :  { %v5342_v1 = vsel %vm65_vm0, %v5337_v56, 0  ;;  %8118 = vrcp.f32 %v5329_v11  ;;  %v3130_v56 = vadd.f32 %v8960_v26, %v8964_v6 }
0x3595   :  { %7560 = vmatpush3.bf16.msra.mxu0 %v5342_v1 }
0x3596   :  { %7571 = vmatprep.subr.bf16.mxu0 %v8166_v20 }
0x3597   :  { %v5385_v16 = vpop.permute.xlu1 %5384  ;;  %v7703_v25 = vpop.permute.xlu0 %7702 }
0x3598   :  { %v5390_v63 = vsel %vm65_vm0, %v5385_v16, 0  ;;  %v7705_v60 = vunpack.i.h.bf16 %v7703_v25  ;;  %v7704_v34 = vunpack.i.l.bf16 %v7703_v25 }
0x3599   :  { %7566 = vmatpush3.bf16.msra.mxu1 %v5390_v63 }
0x359a   :  { %7579 = vmatprep.subr.bf16.mxu1 %v8166_v20 }
0x359b   :  { %v7698_v18 = vpop.permute.xlu1 %7697 }
0x359c   :  { %v7700_v3 = vunpack.i.h.bf16 %v7698_v18  ;;  %v7699_v21 = vunpack.i.l.bf16 %v7698_v18 }
0x359d   :  { %v8117_v51 = vpop.eup %8116 }
0x359e   :  { %v5332_v59 = vmul.f32 %v8117_v51, %v8113_v10  ;;  %v5457_v48 = vsel %vm58_vm1, %v9270_v50, %v7700_v3  ;;  %v5456_v35 = vsel %vm58_vm1, %v9268_v45, %v7699_v21  ;;  %v5529_v45 = vrot.slane %v9208_v17, %v8528_v33 }
0x359f   :  { %v5458_v15 = vsel %vm144_vm4, %v5456_v35, %v7704_v34  ;;  %v5459_v23 = vsel %vm144_vm4, %v5457_v48, %v7705_v60  ;;  %v9401_v51 = vadd.f32 %v3130_v56, %v8886_v53  ;;  %v3133_v33 = vadd.f32 %v8969_v32, %v8964_v6 }
0x35a0   :  { %v5334_v62 = vpack.c.bf16 %v5332_v59, %v5332_v59  ;;  %v5561_v21 = vrot.slane %v9208_v17, %v8554_v27  ;;  %v5567_v34 = vrot.slane %v9208_v17, %v8564_v4  ;;  %v7846_v27 = vld [vmem:[%s9794_s8 + $0x68] sm:$0xff]   ;;  %v7847_v4 = vld [vmem:[%s9794_s8 + $0x60] sm:$0xff]  }
0x35a1   :  { %v8119_v5 = vpop.eup %8118  ;;  %v9407_v59 = vadd.f32 %v3133_v33, %v8888_v13  ;;  %v3146_v26 = vsel %vm212_vm2, %v9401_v51, 0.0 }
0x35a2   :  { %v5333_v8 = vmul.f32 %v8119_v5, %v8115_v22  ;;  %7562 = vmatmul.mubr.msk.bf16.vlgmr.msra.gmra.mxu0 %vm58_vm1, %v5334_v62 }
0x35a3   :  { %7575 = vmatprep.mubr.msk.bf16.mxu0 %vm8167_vm3, %v8166_v20  ;;  %7572 = vmatpush3.bf16.msra.mxu0 %v7840_v38 }
0x35a4   :  { %v5335_v9 = vpack.c.bf16 %v5333_v8, %v5333_v8  ;;  %7573 = vmatprep.subr.bf16.mxu0 %v8166_v20 }
0x35a6   :  { %7568 = vmatmul.mubr.msk.bf16.vlgmr.msra.gmra.mxu1 %vm58_vm1, %v5335_v9 }
0x35a7   :  { %7583 = vmatprep.mubr.msk.bf16.mxu1 %vm8167_vm3, %v8166_v20  ;;  %7574 = vmatpush3.bf16.msra.mxu0 %v7841_v12 }
0x35a8   :  { %7587 = vmatprep.subr.bf16.mxu0 %v8166_v20 }
0x3662   :  { %v5378_v19 = vpop.f32.mrf.mxu0 }
0x3664   :  { %v7563_v28 = vpop.f32.mrf.mxu0 }
0x3665   :  { %v3125_v28 = vadd.f32 %v8972_v37, %v8964_v6  ;;  %v7843_v6 = vld [vmem:[%s9793_s7 + $0x30] sm:$0xff]  }
0x3666   :  { %v5381_v29 = vpop.f32.mrf.mxu0  ;;  %v5426_v46 = vpop.f32.mrf.mxu1 }
0x3667   :  { %v7706_v58 = vpack.i.bf16 %v5426_v46, %v5378_v19  ;;  %v9416_v19 = vadd.f32 %v8967_v30, %v8879_v39  ;;  %v9422_v46 = vadd.f32 %v3125_v28, %v8881_v40  ;;  %v7842_v39 = vld [vmem:[%s9793_s7 + $0x38] sm:$0xff]  }
0x3668   :  { %v7564_v61 = vpop.f32.mrf.mxu0  ;;  %v7569_v36 = vpop.f32.mrf.mxu1  ;;  %7580 = vmatpush3.bf16.msra.mxu1 %v7842_v39  ;;  %v7844_v40 = vld [vmem:[%s9794_s8 + $0x78] sm:$0xff]  }
0x3669   :  { %7707 = vrot.lane.b32.xlu1 %v7706_v58, %s8181_s16  ;;  %v3140_v58 = vsel %vm212_vm2, %v9416_v19, 0.0  ;;  %v3143_v61 = vsel %vm212_vm2, %v9422_v46, 0.0  ;;  %7581 = vmatprep.subr.bf16.mxu1 %v8166_v20 }
0x366a   :  { %v5429_v52 = vpop.f32.mrf.mxu1 }
0x366c   :  { %v7570_v54 = vpop.f32.mrf.mxu1  ;;  %7582 = vmatpush3.bf16.msra.mxu1 %v7843_v6 }
0x36db   :  { %v7708_v44 = vpop.permute.xlu1 %7707 }
0x36dc   :  { %v7710_v55 = vunpack.i.h.bf16 %v7708_v44  ;;  %v7709_v41 = vunpack.i.l.bf16 %v7708_v44 }
0x36de   :  { %v5461_v31 = vsel %vm1292_vm5, %v5459_v23, %v7710_v55  ;;  %v5460_v14 = vsel %vm1292_vm5, %v5458_v15, %v7709_v41  ;;  %v7845_v23 = vld [vmem:[%s9794_s8 + $0x70] sm:$0xff]   ;;  %s6540_s8 = sshll.u32 %s8186_s18, 4  ;;  %s6541_s8 = int_to_ptr.vmem [resolvable:$true] %s6540_s8 }
0x36df   :  { %v5462_v10 = vpack.c.bf16 %v5461_v31, %v5460_v14  ;;  %v5579_v31 = vrot.slane %v9208_v17, %v8581_v43  ;;  %s8144_s20 = scalar_lea.vmem %s6541_s8, 32  ;;  %p8149_p1 = scmp.lt.s32.totalorder %s6541_s8, %s6541_s8 }
0x36e0   :  { %p8145_p0 = scmp.ne.s32.totalorder %s6541_s8, %s8144_s20  ;;  %p8150_p2 = scmp.lt.s32.totalorder %s8144_s20, %s8144_s20 }
0x36e1   :  { %7576 = vmatmul.mubr.msk.bf16.vlgmr.msra.gmra.mxu0 %vm212_vm2, %v5462_v10 }
0x36e2   :  { %7595 = vmatprep.mubr.msk.bf16.mxu0 %vm8167_vm3, %v8166_v20  ;;  %7588 = vmatpush3.bf16.msra.mxu0 %v7844_v40  ;;  %v7848_v40 = vld [vmem:[%s9796_s10 + $0x78] sm:$0xff]   ;;  %p8151_p3 = por %p8150_p2, %p8149_p1 }
0x36e3   :  { %7589 = vmatprep.subr.bf16.mxu0 %v8166_v20  ;;  %6993 = vmatprep.subr.bf16.mxu1 %v7848_v40 }
0x36e4   :  { %p8152_p4 = pnand %p8151_p3, %p8145_p0 }
0x36e6   :  { %7590 = vmatpush3.bf16.msra.mxu0 %v7845_v23 }
0x36e7   :  { %7591 = vmatprep.subr.bf16.mxu0 %v8166_v20 }
0x36ea   :  { %7592 = vmatpush3.bf16.msra.mxu0 %v7846_v27 }
0x36eb   :  { %7593 = vmatprep.subr.bf16.mxu0 %v8166_v20 }
0x36ee   :  { %7594 = vmatpush3.bf16.msra.mxu0 %v7847_v4 }
0x37a1   :  { %v5517_v50 = vpop.f32.mrf.mxu0 }
0x37a2   :  { %v5524_v47 = vadd.f32 %v5517_v50, %v9196_v24 }
0x37a3   :  { %v7577_v22 = vpop.f32.mrf.mxu0 }
0x37a4   :  { %v5530_v49 = vadd.f32 %v5529_v45, %v5524_v47 }
0x37a5   :  { %v5520_v42 = vpop.f32.mrf.mxu0 }
0x37a6   :  { %v5525_v11 = vadd.f32 %v5520_v42, %v9198_v57  ;;  %v5532_v1 = vsel %vm212_vm2, %v5530_v49, 0.0  ;;  %v3149_v57 = vsel %vm212_vm2, %v9407_v59, 0.0 }
0x37a7   :  { %5533 = vadd.xlane.f32.xlu0 %v5532_v1  ;;  %v7578_v16 = vpop.f32.mrf.mxu0 }
0x37a8   :  { %v5531_v63 = vadd.f32 %v5529_v45, %v5525_v11  ;;  %v5651_v16 = vrot.slane %v9208_v17, %v8590_v2 }
0x37aa   :  { %v5535_v24 = vsel %vm212_vm2, %v5531_v63, 0.0 }
0x37ab   :  { %5536 = vadd.xlane.f32.xlu1 %v5535_v24 }
0x37af   :  { %3147 = vadd.xlane.f32.xlu1 %v3146_v26 }
0x37b3   :  { %3150 = vadd.xlane.f32.xlu1 %v3149_v57 }
0x3830   :  { %v5534_v62 = vpop.xlane.xlu0 %5533 }
0x3831   :  { %v5538_v53 = vmul.f32 0.03125, %v5534_v62 }
0x3833   :  { %v5540_v5 = vsub.f32 %v5530_v49, %v5538_v53 }
0x3834   :  { %v5537_v8 = vpop.xlane.xlu1 %5536 }
0x3835   :  { %v5539_v9 = vmul.f32 0.03125, %v5537_v8  ;;  %v5542_v32 = vmul.f32 %v5540_v5, %v5540_v5 }
0x3837   :  { %v5541_v38 = vsub.f32 %v5531_v63, %v5539_v9  ;;  %v5544_v12 = vsel %vm212_vm2, %v5542_v32, 0.0 }
0x3838   :  { %5545 = vadd.xlane.f32.xlu0 %v5544_v12  ;;  %v3148_v11 = vpop.xlane.xlu1 %3147 }
0x3839   :  { %v5543_v13 = vmul.f32 %v5541_v38, %v5541_v38  ;;  %v3154_v33 = vmul.f32 0.03125, %v3148_v11  ;;  %v7854_v11 = vld [vmem:[%s9796_s10 + $0x60] sm:$0xff]  }
0x383b   :  { %v5547_v29 = vsel %vm212_vm2, %v5543_v13, 0.0  ;;  %v9464_v8 = vsub.f32 %v9401_v51, %v3154_v33 }
0x383c   :  { %5548 = vadd.xlane.f32.xlu0 %v5547_v29  ;;  %v3151_v24 = vpop.xlane.xlu1 %3150 }
0x383d   :  { %v3155_v9 = vmul.f32 0.03125, %v3151_v24  ;;  %v3162_v28 = vmul.f32 %v9464_v8, %v9464_v8 }
0x383f   :  { %v9475_v51 = vsub.f32 %v9407_v59, %v3155_v9  ;;  %v7857_v9 = vld [vmem:[%s9796_s10 + $0x18] sm:$0xff]  }
0x3840   :  { %3141 = vadd.xlane.f32.xlu0 %v3140_v58 }
0x3841   :  { %v3163_v6 = vmul.f32 %v9475_v51, %v9475_v51 }
0x3843   :  { %v3173_v59 = vsel %vm212_vm2, %v3163_v6, 0.0 }
0x3844   :  { %3144 = vadd.xlane.f32.xlu0 %v3143_v61  ;;  %v3170_v61 = vsel %vm212_vm2, %v3162_v28, 0.0  ;;  %v7858_v28 = vld [vmem:[%s9796_s10 + $0x50] sm:$0xff]  }
0x38c1   :  { %v5546_v30 = vpop.xlane.xlu0 %5545 }
0x38c2   :  { %v5550_v37 = vmul.f32 0.03125, %v5546_v30  ;;  %v7849_v30 = vld [vmem:[%s9796_s10 + $0x38] sm:$0xff]  }
0x38c4   :  { %v5552_v36 = vadd.f32 1e-05, %v5550_v37  ;;  %v7850_v37 = vld [vmem:[%s9796_s10 + $0x70] sm:$0xff]  }
0x38c5   :  { %v5549_v52 = vpop.xlane.xlu0 %5548 }
0x38c6   :  { %8120 = vrsqrt.f32 %v5552_v36  ;;  %v5551_v54 = vmul.f32 0.03125, %v5549_v52 }
0x38c8   :  { %v5553_v18 = vadd.f32 1e-05, %v5551_v54 }
0x38c9   :  { %v3142_v20 = vpop.xlane.xlu0 %3141 }
0x38ca   :  { %8122 = vrsqrt.f32 %v5553_v18  ;;  %v3152_v1 = vmul.f32 0.03125, %v3142_v20 }
0x38cc   :  { %v9461_v26 = vsub.f32 %v9416_v19, %v3152_v1 }
0x38cd   :  { %v3145_v63 = vpop.xlane.xlu0 %3144 }
0x38ce   :  { %v3153_v57 = vmul.f32 0.03125, %v3145_v63  ;;  %v3160_v12 = vmul.f32 %v9461_v26, %v9461_v26 }
0x38d3   :  { %v8121_v3 = vpop.eup %8120 }
0x38d4   :  { %v5556_v25 = vmul.f32 %v8121_v3, %v5540_v5 }
0x38d6   :  { %v5562_v35 = vmul.f32 %v5561_v21, %v5556_v25 }
0x38d7   :  { %v8123_v48 = vpop.eup %8122 }
0x38d8   :  { %v5557_v60 = vmul.f32 %v8123_v48, %v5541_v38  ;;  %v5568_v55 = vadd.f32 %v5567_v34, %v5562_v35  ;;  %v9467_v38 = vsub.f32 %v9422_v46, %v3153_v57  ;;  %v3164_v46 = vsel %vm212_vm2, %v3160_v12, 0.0 }
0x38da   :  { %v5563_v44 = vmul.f32 %v5561_v21, %v5557_v60  ;;  %v3161_v58 = vmul.f32 %v9467_v38, %v9467_v38 }
0x38dc   :  { %v5569_v41 = vadd.f32 %v5567_v34, %v5563_v44  ;;  %v3167_v39 = vsel %vm212_vm2, %v3161_v58, 0.0 }
0x38de   :  { %v5570_v15 = vpack.c.bf16 %v5569_v41, %v5568_v55 }
0x38e0   :  { %7584 = vmatmul.mubr.msk.bf16.vlgmr.msra.gmra.mxu1 %vm212_vm2, %v5570_v15 }
0x38e1   :  { %6994 = vmatpush3.bf16.msra.mxu1 %v7849_v30  ;;  %v7860_v30 = vld [vmem:[%s9796_s10 + $0x48] sm:$0xff]  }
0x38e2   :  { %6995 = vmatprep.subr.bf16.mxu1 %v7850_v37  ;;  %v7861_v37 = vld [vmem:[%s9796_s10 + $0x8] sm:$0xff]  }
0x39a0   :  { %v5629_v14 = vpop.f32.mrf.mxu1 }
0x39a1   :  { %v5630_v45 = vadd.f32 %v5629_v14, %v5579_v31 }
0x39a2   :  { %v7585_v10 = vpop.f32.mrf.mxu1 }
0x39a3   :  { %v5636_v49 = vmax.f32 %v5630_v45, 0.0 }
0x39a4   :  { %v5632_v50 = vpop.f32.mrf.mxu1 }
0x39a5   :  { %v5633_v47 = vadd.f32 %v5632_v50, %v5579_v31  ;;  %v7851_v50 = vld [vmem:[%s9796_s10 + $0x30] sm:$0xff]  }
0x39a6   :  { %v7586_v22 = vpop.f32.mrf.mxu1  ;;  %6996 = vmatpush3.bf16.msra.mxu1 %v7851_v50  ;;  %v7865_v50 = vld [vmem:[%s9796_s10 + $0xb8] sm:$0xff]  }
0x39a7   :  { %v5637_v42 = vmax.f32 %v5633_v47, 0.0  ;;  %v7852_v47 = vld [vmem:[%s9796_s10 + $0x68] sm:$0xff]  }
0x39a8   :  { %6997 = vmatprep.subr.bf16.mxu1 %v7852_v47  ;;  %v7866_v47 = vld [vmem:[%s9796_s10 + $0xf0] sm:$0xff]  }
0x39a9   :  { %v5638_v56 = vpack.c.bf16 %v5637_v42, %v5636_v49  ;;  %v7853_v49 = vld [vmem:[%s9796_s10 + $0x28] sm:$0xff]  }
0x39aa   :  { %v8142_v42 = vld [vmem:[%s9795_s9 + $0x8] sm:$0xff]  ;;  %6998 = vmatpush3.bf16.msra.mxu1 %v7853_v49  ;;  %v7867_v49 = vld [vmem:[%s9796_s10 + $0xb0] sm:$0xff]  }
0x39ab   :  { %7596 = vmatmul.mubr.msk.bf16.vlgmr.msra.gmra.mxu0 %vm1570_vm6, %v5638_v56  ;;  %v3195_v56 = vrot.slane %v8142_v42, %v8610_v0  ;;  %v3203_v33 = vrot.slane %v8142_v42, %v8615_v7  ;;  %6999 = vmatprep.subr.bf16.mxu1 %v7854_v11  ;;  %v7870_v42 = vld [vmem:[%s9796_s10 + $0xe8] sm:$0xff]  }
0x3a6b   :  { %v5713_v43 = vpop.f32.mrf.mxu0 }
0x3a6c   :  { %v5714_v62 = vadd.f32 %v5713_v43, %v5651_v16 }
0x3a6d   :  { %v7597_v53 = vpop.f32.mrf.mxu0 }
0x3a6e   :  { %v5720_v5 = vadd.f32 %v5714_v62, %v5568_v55  ;;  %v7856_v62 = vld [vmem:[%s9796_s10 + $0x58] sm:$0xff]  }
0x3a6f   :  { %v5716_v32 = vpop.f32.mrf.mxu0 }
0x3a70   :  { %v5717_v2 = vadd.f32 %v5716_v32, %v5651_v16  ;;  %v5722_v17 = vsel %vm212_vm2, %v5720_v5, 0.0  ;;  %v7855_v16 = vld [vmem:[%s9796_s10 + $0x20] sm:$0xff]  }
0x3a71   :  { %v7598_v13 = vpop.f32.mrf.mxu0  ;;  %5723 = vadd.xlane.f32.xlu0 %v5722_v17  ;;  %7000 = vmatpush3.bf16.msra.mxu1 %v7855_v16 }
0x3a72   :  { %v5721_v19 = vadd.f32 %v5717_v2, %v5569_v41  ;;  %7001 = vmatprep.subr.bf16.mxu1 %v7856_v62 }
0x3a74   :  { %v5725_v29 = vsel %vm212_vm2, %v5721_v19, 0.0 }
0x3a75   :  { %5726 = vadd.xlane.f32.xlu1 %v5725_v29  ;;  %3165 = vadd.xlane.f32.xlu0 %v3164_v46 }
0x3a76   :  { %7002 = vmatpush3.bf16.msra.mxu1 %v7857_v9 }
0x3a77   :  { %7003 = vmatprep.subr.bf16.mxu1 %v7858_v28 }
0x3a79   :  { %3171 = vadd.xlane.f32.xlu1 %v3170_v61  ;;  %3168 = vadd.xlane.f32.xlu0 %v3167_v39 }
0x3a7d   :  { %3174 = vadd.xlane.f32.xlu1 %v3173_v59 }
0x3afa   :  { %v5724_v36 = vpop.xlane.xlu0 %5723 }
0x3afb   :  { %v5728_v52 = vmul.f32 0.03125, %v5724_v36 }
0x3afd   :  { %v9495_v54 = vsub.f32 %v5720_v5, %v5728_v52 }
0x3afe   :  { %v5727_v18 = vpop.xlane.xlu1 %5726  ;;  %v3166_v3 = vpop.xlane.xlu0 %3165 }
0x3aff   :  { %v5729_v21 = vmul.f32 0.03125, %v5727_v18  ;;  %v3176_v25 = vmul.f32 0.03125, %v3166_v3  ;;  %v5732_v48 = vmul.f32 %v9495_v54, %v9495_v54 }
0x3b01   :  { %v9499_v35 = vsub.f32 %v5721_v19, %v5729_v21  ;;  %v3180_v60 = vadd.f32 1e-05, %v3176_v25  ;;  %v5734_v34 = vsel %vm212_vm2, %v5732_v48, 0.0  ;;  %v7862_v48 = vld [vmem:[%s9796_s10 + $0x40] sm:$0xff]  }
0x3b02   :  { %v3172_v44 = vpop.xlane.xlu1 %3171  ;;  %5735 = vadd.xlane.f32.xlu0 %v5734_v34  ;;  %v3169_v55 = vpop.xlane.xlu0 %3168 }
0x3b03   :  { %8124 = vrsqrt.f32 %v3180_v60  ;;  %v3178_v41 = vmul.f32 0.03125, %v3172_v44  ;;  %v3177_v15 = vmul.f32 0.03125, %v3169_v55  ;;  %v5733_v23 = vmul.f32 %v9499_v35, %v9499_v35  ;;  %v7863_v60 = vld [vmem:[%s9796_s10] sm:$0xff]  }
0x3b05   :  { %v3182_v27 = vadd.f32 1e-05, %v3178_v41  ;;  %v3181_v4 = vadd.f32 1e-05, %v3177_v15  ;;  %v5737_v31 = vsel %vm212_vm2, %v5733_v23, 0.0 }
0x3b06   :  { %5738 = vadd.xlane.f32.xlu1 %v5737_v31  ;;  %v3175_v14 = vpop.xlane.xlu1 %3174 }
0x3b07   :  { %8126 = vrsqrt.f32 %v3182_v27  ;;  %v3179_v10 = vmul.f32 0.03125, %v3175_v14 }
0x3b08   :  { %8128 = vrsqrt.f32 %v3181_v4 }
0x3b09   :  { %v3183_v45 = vadd.f32 1e-05, %v3179_v10 }
0x3b0b   :  { %8130 = vrsqrt.f32 %v3183_v45  ;;  %v7864_v45 = vld [vmem:[%s9796_s10 + $0xf8] sm:$0xff]  }
0x3b0c   :  { %7015 = vmatprep.subr.bf16.mxu0 %v7864_v45 }
0x3b0d   :  { %7016 = vmatpush3.bf16.msra.mxu0 %v7865_v50  ;;  %v7882_v50 = vld [vmem:[%s9796_s10 + $0xd0] sm:$0xff]  }
0x3b0e   :  { %7017 = vmatprep.subr.bf16.mxu0 %v7866_v47 }
0x3b10   :  { %v8125_v22 = vpop.eup %8124 }
0x3b11   :  { %v3188_v20 = vmul.f32 %v8125_v22, %v9461_v26  ;;  %v7868_v22 = vld [vmem:[%s9796_s10 + $0x178] sm:$0xff]   ;;  %7018 = vmatpush3.bf16.msra.mxu0 %v7867_v49 }
0x3b12   :  { %7019 = vmatprep.subr.bf16.mxu0 %v7870_v42 }
0x3b13   :  { %v3196_v43 = vmul.f32 %v3195_v56, %v3188_v20  ;;  %v7874_v20 = vld [vmem:[%s9796_s10 + $0xe0] sm:$0xff]  }
0x3b14   :  { %v8127_v1 = vpop.eup %8126 }
0x3b15   :  { %v8129_v63 = vpop.eup %8128  ;;  %v3190_v24 = vmul.f32 %v8127_v1, %v9464_v8  ;;  %v9534_v32 = vadd.f32 %v3203_v33, %v3196_v43 }
0x3b16   :  { %v3189_v26 = vmul.f32 %v8129_v63, %v9467_v38 }
0x3b17   :  { %v3198_v57 = vmul.f32 %v3195_v56, %v3190_v24  ;;  %v5857_v58 = vrot.slane %v9534_v32, 1  ;;  %v5871_v61 = vrot.slane %v9534_v32, 5  ;;  %v5861_v59 = vrot.slane %v9534_v32, 2 }
0x3b18   :  { %v8131_v53 = vpop.eup %8130  ;;  %v3197_v5 = vmul.f32 %v3195_v56, %v3189_v26  ;;  %v5875_v40 = vrot.slane %v9534_v32, 6  ;;  %v5865_v44 = vrot.slane %v9534_v32, 3  ;;  %v5879_v55 = vrot.slane %v9534_v32, 7 }
0x3b19   :  { %v9536_v2 = vadd.f32 %v3203_v33, %v3198_v57  ;;  %v3191_v8 = vmul.f32 %v8131_v53, %v9475_v51  ;;  %v7859_v51 = vld [vmem:[%s9796_s10 + $0x10] sm:$0xff]   ;;  %v7721_v36 = vpack.i.bf16 %v5857_v58, %v5871_v61  ;;  %v5869_v58 = vrot.slane %v9534_v32, 4 }
0x3b1a   :  { %v9539_v38 = vadd.f32 %v3203_v33, %v3197_v5  ;;  %7004 = vmatpush3.bf16.msra.mxu1 %v7859_v51  ;;  %v7731_v3 = vpack.i.bf16 %v5861_v59, %v5875_v40  ;;  %v7736_v15 = vpack.i.bf16 %v5865_v44, %v5879_v55 }
0x3b1b   :  { %v3199_v17 = vmul.f32 %v3195_v56, %v3191_v8  ;;  %v5924_v12 = vrot.slane %v9536_v2, 1  ;;  %v5938_v13 = vrot.slane %v9536_v2, 5  ;;  %v5928_v19 = vrot.slane %v9536_v2, 2  ;;  %7005 = vmatprep.subr.bf16.mxu1 %v7860_v30  ;;  %v7871_v56 = vld [vmem:[%s9796_s10 + $0xa8] sm:$0xff]  }
0x3b1c   :  { %v5942_v29 = vrot.slane %v9536_v2, 6  ;;  %v5932_v52 = vrot.slane %v9536_v2, 3  ;;  %v5946_v18 = vrot.slane %v9536_v2, 7  ;;  %7020 = vmatpush3.bf16.msra.mxu0 %v7871_v56  ;;  %v5936_v5 = vrot.slane %v9536_v2, 4  ;;  %v7869_v56 = vld [vmem:[%s9796_s10 + $0x138] sm:$0xff]  }
0x3b1d   :  { %v7711_v46 = vpack.i.bf16 %v5924_v12, %v5938_v13  ;;  %v9553_v39 = vadd.f32 %v3203_v33, %v3199_v17  ;;  %7021 = vmatprep.subr.bf16.mxu0 %v7874_v20 }
0x3b1e   :  { %v7716_v6 = vpack.i.bf16 %v5928_v19, %v5942_v29  ;;  %7006 = vmatpush3.bf16.msra.mxu1 %v7861_v37  ;;  %v7726_v34 = vpack.i.bf16 %v5932_v52, %v5946_v18  ;;  %v8143_v29 = vld [vmem:[%s9795_s9 + $0x18] sm:$0xff] }
0x3b1f   :  { %7712 = vrot.lane.b32.xlu1 %v7711_v46, %s8182_s19  ;;  %v5951_v21 = vrot.slane %v9553_v39, 1  ;;  %v5965_v25 = vrot.slane %v9553_v39, 5  ;;  %7007 = vmatprep.subr.bf16.mxu1 %v7862_v48  ;;  %v5955_v23 = vrot.slane %v9553_v39, 2  ;;  %v5969_v27 = vrot.slane %v9553_v39, 6 }
0x3b20   :  { %7717 = vrot.lane.b32.xlu0 %v7716_v6, %s8169_s22  ;;  %v5959_v31 = vrot.slane %v9553_v39, 3  ;;  %v5973_v14 = vrot.slane %v9553_v39, 7  ;;  %v5751_v51 = vrot.slane %v8143_v29, %v8610_v0 }
0x3b21   :  { %v7741_v41 = vpack.i.bf16 %v5951_v21, %v5965_v25  ;;  %v7746_v4 = vpack.i.bf16 %v5955_v23, %v5969_v27 }
0x3b22   :  { %7008 = vmatpush3.bf16.msra.mxu1 %v7863_v60  ;;  %v7751_v10 = vpack.i.bf16 %v5959_v31, %v5973_v14  ;;  %v7879_v14 = vld [vmem:[%s9796_s10 + $0x98] sm:$0xff]  }
0x3b23   :  { %7722 = vrot.lane.b32.xlu1 %v7721_v36, %s8182_s19  ;;  %7037 = vmatprep.subr.bf16.mxu1 %v7868_v22 }
0x3b24   :  { %7732 = vrot.lane.b32.xlu0 %v7731_v3, %s8169_s22  ;;  %v7875_v3 = vld [vmem:[%s9796_s10 + $0xa0] sm:$0xff]  }
0x3b25   :  { %7022 = vmatpush3.bf16.msra.mxu0 %v7875_v3 }
0x3b27   :  { %7727 = vrot.lane.b32.xlu1 %v7726_v34, %s8168_s17 }
0x3b28   :  { %7742 = vrot.lane.b32.xlu0 %v7741_v41, %s8182_s19 }
0x3b2b   :  { %7737 = vrot.lane.b32.xlu1 %v7736_v15, %s8168_s17 }
0x3b2f   :  { %7747 = vrot.lane.b32.xlu1 %v7746_v4, %s8169_s22 }
0x3b33   :  { %7752 = vrot.lane.b32.xlu1 %v7751_v10, %s8168_s17 }
0x3b8b   :  { %v5736_v11 = vpop.xlane.xlu0 %5735 }
0x3b8c   :  { %v5740_v1 = vmul.f32 0.03125, %v5736_v11  ;;  %v7872_v11 = vld [vmem:[%s9796_s10 + $0x170] sm:$0xff]  }
0x3b8e   :  { %v5742_v16 = vadd.f32 1e-05, %v5740_v1  ;;  %v7883_v1 = vld [vmem:[%s9796_s10 + $0x90] sm:$0xff]  }
0x3b8f   :  { %v5739_v63 = vpop.xlane.xlu1 %5738 }
0x3b90   :  { %8132 = vrsqrt.f32 %v5742_v16  ;;  %v5741_v33 = vmul.f32 0.03125, %v5739_v63  ;;  %v7886_v63 = vld [vmem:[%s9796_s10 + $0xc8] sm:$0xff]  }
0x3b92   :  { %v5743_v43 = vadd.f32 1e-05, %v5741_v33  ;;  %v7718_v26 = vpop.permute.xlu0 %7717  ;;  %v5902_v33 = vrot.slane %v9539_v38, 6 }
0x3b93   :  { %v7713_v24 = vpop.permute.xlu1 %7712  ;;  %v7720_v13 = vunpack.i.h.bf16 %v7718_v26  ;;  %v7719_v19 = vunpack.i.l.bf16 %v7718_v26 }
0x3b94   :  { %8134 = vrsqrt.f32 %v5743_v43  ;;  %v7715_v57 = vunpack.i.h.bf16 %v7713_v24  ;;  %v7714_v62 = vunpack.i.l.bf16 %v7713_v24  ;;  %v5898_v24 = vrot.slane %v9539_v38, 5 }
0x3b96   :  { %v5977_v8 = vsel %vm212_vm2, %v9536_v2, %v7715_v57  ;;  %v5980_v17 = vsel %vm212_vm2, %v5936_v5, %v7714_v62  ;;  %v7733_v46 = vpop.permute.xlu0 %7732  ;;  %v5757_v2 = vrot.slane %v8143_v29, %v8615_v7  ;;  %v7873_v57 = vld [vmem:[%s9796_s10 + $0x130] sm:$0xff]  }
0x3b97   :  { %v7723_v53 = vpop.permute.xlu1 %7722  ;;  %v5978_v30 = vsel %vm1570_vm6, %v5977_v8, %v7720_v13  ;;  %v5981_v37 = vsel %vm1570_vm6, %v5980_v17, %v7719_v19  ;;  %v7735_v7 = vunpack.i.h.bf16 %v7733_v46  ;;  %v7734_v21 = vunpack.i.l.bf16 %v7733_v46  ;;  %v7877_v19 = vld [vmem:[%s9796_s10 + $0x128] sm:$0xff]   ;;  %v7880_v46 = vld [vmem:[%s9796_s10 + $0x160] sm:$0xff]  }
0x3b98   :  { %v7725_v9 = vunpack.i.h.bf16 %v7723_v53  ;;  %v7724_v12 = vunpack.i.l.bf16 %v7723_v53  ;;  %v5906_v17 = vrot.slane %v9539_v38, 7  ;;  %v5884_v13 = vrot.slane %v9539_v38, 1 }
0x3b9a   :  { %v5910_v40 = vsel %vm212_vm2, %v9534_v32, %v7725_v9  ;;  %v5914_v52 = vsel %vm212_vm2, %v5869_v58, %v7724_v12  ;;  %v7878_v32 = vld [vmem:[%s9796_s10 + $0xd8] sm:$0xff]   ;;  %v7876_v9 = vld [vmem:[%s9796_s10 + $0x168] sm:$0xff]  }
0x3b9b   :  { %v7728_v28 = vpop.permute.xlu1 %7727  ;;  %v5911_v41 = vsel %vm1570_vm6, %v5910_v40, %v7735_v7  ;;  %v5915_v15 = vsel %vm1570_vm6, %v5914_v52, %v7734_v21  ;;  %7023 = vmatprep.subr.bf16.mxu0 %v7878_v32  ;;  %v7887_v12 = vld [vmem:[%s9796_s10 + $0x88] sm:$0xff]   ;;  %v7881_v40 = vld [vmem:[%s9796_s10 + $0x120] sm:$0xff]   ;;  %v7884_v52 = vld [vmem:[%s9796_s10 + $0x158] sm:$0xff]  }
0x3b9c   :  { %v7730_v61 = vunpack.i.h.bf16 %v7728_v28  ;;  %v7729_v6 = vunpack.i.l.bf16 %v7728_v28  ;;  %7024 = vmatpush3.bf16.msra.mxu0 %v7879_v14  ;;  %v7890_v28 = vld [vmem:[%s9796_s10 + $0xc0] sm:$0xff]   ;;  %v7885_v7 = vld [vmem:[%s9796_s10 + $0x118] sm:$0xff]   ;;  %v5963_v14 = vrot.slane %v9553_v39, 4 }
0x3b9d   :  { %v8133_v59 = vpop.eup %8132  ;;  %7025 = vmatprep.subr.bf16.mxu0 %v7882_v50 }
0x3b9e   :  { %v5746_v36 = vmul.f32 %v8133_v59, %v9495_v54  ;;  %v5979_v0 = vsel %vm5912_vm7, %v5978_v30, %v7730_v61  ;;  %v5982_v18 = vsel %vm5912_vm7, %v5981_v37, %v7729_v6  ;;  %v5892_v6 = vrot.slane %v9539_v38, 3  ;;  %v7891_v59 = vld [vmem:[%s9796_s10 + $0x80] sm:$0xff]  }
0x3b9f   :  { %v7738_v25 = vpop.permute.xlu1 %7737  ;;  %v5993_v44 = vrot.slane %v5979_v0, 7  ;;  %v5994_v55 = vrot.slane %v5982_v18, 7 }
0x3ba0   :  { %v5752_v48 = vmul.f32 %v5751_v51, %v5746_v36  ;;  %v7740_v54 = vunpack.i.h.bf16 %v7738_v25  ;;  %v7739_v60 = vunpack.i.l.bf16 %v7738_v25  ;;  %7026 = vmatpush3.bf16.msra.mxu0 %v7883_v1  ;;  %v7888_v25 = vld [vmem:[%s9796_s10 + $0x150] sm:$0xff]  }
0x3ba1   :  { %v8135_v34 = vpop.eup %8134  ;;  %7027 = vmatprep.subr.bf16.mxu0 %v7886_v63 }
0x3ba2   :  { %v9638_v23 = vadd.f32 %v5757_v2, %v5752_v48  ;;  %v5747_v27 = vmul.f32 %v8135_v34, %v9499_v35  ;;  %v5913_v4 = vsel %vm5912_vm7, %v5911_v41, %v7740_v54  ;;  %v5916_v31 = vsel %vm5912_vm7, %v5915_v15, %v7739_v60  ;;  %v7889_v48 = vld [vmem:[%s9796_s10 + $0x110] sm:$0xff]   ;;  %v7892_v54 = vld [vmem:[%s9796_s10 + $0x148] sm:$0xff]   ;;  %v7894_v34 = vld [vmem:[%s9796_s10 + $0x140] sm:$0xff]   ;;  %v7743_v41 = vpop.permute.xlu0 %7742 }
0x3ba3   :  { %v6002_v10 = vsel %vm6001_vm8, %v5913_v4, %v5993_v44  ;;  %v6003_v45 = vsel %vm6001_vm8, %v5916_v31, %v5994_v55  ;;  %v7893_v60 = vld [vmem:[%s9796_s10 + $0x108] sm:$0xff]   ;;  %v7895_v44 = vld [vmem:[%s9796_s10 + $0x100] sm:$0xff]   ;;  %v7748_v55 = vpop.permute.xlu1 %7747 }
0x3ba4   :  { %v5753_v47 = vmul.f32 %v5751_v51, %v5747_v27  ;;  %v6006_v22 = vpack.c.bf16 %v6002_v10, %v6002_v10  ;;  %v6007_v35 = vpack.c.bf16 %v6003_v45, %v6003_v45  ;;  %v6283_v49 = vrot.slane %v9638_v23, 1  ;;  %7028 = vmatpush3.bf16.msra.mxu0 %v7887_v12 }
0x3ba5   :  { %v6297_v42 = vrot.slane %v9638_v23, 5  ;;  %7029 = vmatprep.subr.bf16.mxu0 %v7890_v28  ;;  %v6291_v37 = vrot.slane %v9638_v23, 3  ;;  %v6305_v36 = vrot.slane %v9638_v23, 7  ;;  %v6287_v18 = vrot.slane %v9638_v23, 2 }
0x3ba6   :  { %v9656_v20 = vadd.f32 %v5757_v2, %v5753_v47  ;;  %6234 = vmatprep.mubr.bf16.mxu1 %v6007_v35  ;;  %v5888_v2 = vrot.slane %v9539_v38, 2  ;;  %v6301_v3 = vrot.slane %v9638_v23, 6  ;;  %v7744_v27 = vunpack.i.l.bf16 %v7743_v41 }
0x3ba7   :  { %v7756_v16 = vpack.i.bf16 %v6283_v49, %v6297_v42  ;;  %6235 = vmatmul.mubr.bf16.vlgmr.msra.gmra.mxu1 %v6006_v22  ;;  %v7796_v21 = vpack.i.bf16 %v6291_v37, %v6305_v36  ;;  %v7753_v15 = vpop.permute.xlu1 %7752  ;;  %v7749_v31 = vunpack.i.l.bf16 %v7748_v55  ;;  %v5896_v47 = vrot.slane %v9539_v38, 4 }
0x3ba8   :  { %v6334_v43 = vrot.slane %v9656_v20, 6  ;;  %v6330_v26 = vrot.slane %v9656_v20, 5  ;;  %7038 = vmatpush3.bf16.msra.mxu1 %v7869_v56  ;;  %v6338_v5 = vrot.slane %v9656_v20, 7  ;;  %v6316_v8 = vrot.slane %v9656_v20, 1  ;;  %7030 = vmatpush3.bf16.msra.mxu0 %v7891_v59 }
0x3ba9   :  { %7757 = vrot.lane.b32.xlu0 %v7756_v16, %s8182_s19  ;;  %7039 = vmatprep.subr.bf16.mxu1 %v7872_v11  ;;  %v6324_v51 = vrot.slane %v9656_v20, 3  ;;  %v6320_v61 = vrot.slane %v9656_v20, 2  ;;  %v7781_v32 = vpack.i.bf16 %v6287_v18, %v6301_v3  ;;  %v7754_v10 = vunpack.i.l.bf16 %v7753_v15 }
0x3baa   :  { %v7771_v62 = vpack.i.bf16 %v6334_v43, %v5902_v33  ;;  %v7761_v53 = vpack.i.bf16 %v6330_v26, %v5898_v24  ;;  %v7786_v29 = vpack.i.bf16 %v6338_v5, %v5906_v17  ;;  %v7766_v58 = vpack.i.bf16 %v6316_v8, %v5884_v13 }
0x3bab   :  { %v7791_v30 = vpack.i.bf16 %v6324_v51, %v5892_v6  ;;  %v7776_v0 = vpack.i.bf16 %v6320_v61, %v5888_v2  ;;  %v5986_v50 = vsel %vm212_vm2, %v5963_v14, %v7744_v27  ;;  %v7745_v35 = vunpack.i.h.bf16 %v7743_v41 }
0x3bac   :  { %7772 = vrot.lane.b32.xlu1 %v7771_v62, %s8169_s22  ;;  %7040 = vmatpush3.bf16.msra.mxu1 %v7873_v57  ;;  %v5987_v49 = vsel %vm1570_vm6, %v5986_v50, %v7749_v31  ;;  %v7750_v1 = vunpack.i.h.bf16 %v7748_v55  ;;  %v7755_v43 = vunpack.i.h.bf16 %v7753_v15  ;;  %v6295_v59 = vrot.slane %v9638_v23, 4 }
0x3bad   :  { %7762 = vrot.lane.b32.xlu0 %v7761_v53, %s8182_s19  ;;  %7041 = vmatprep.subr.bf16.mxu1 %v7876_v9  ;;  %v5988_v11 = vsel %vm5912_vm7, %v5987_v49, %v7754_v10  ;;  %v5983_v57 = vsel %vm212_vm2, %v9553_v39, %v7745_v35  ;;  %v6328_v53 = vrot.slane %v9656_v20, 4 }
0x3bae   :  { %v5996_v62 = vrot.slane %v5988_v11, 7  ;;  %v5984_v13 = vsel %vm1570_vm6, %v5983_v57, %v7750_v1 }
0x3baf   :  { %v5985_v39 = vsel %vm5912_vm7, %v5984_v13, %v7755_v43 }
0x3bb0   :  { %7787 = vrot.lane.b32.xlu1 %v7786_v29, %s8168_s17  ;;  %7042 = vmatpush3.bf16.msra.mxu1 %v7877_v19  ;;  %v5995_v18 = vrot.slane %v5985_v39, 7  ;;  %v8183_v39 = vmov 1  }
0x3bb1   :  { %7767 = vrot.lane.b32.xlu0 %v7766_v58, %s8182_s19  ;;  %7043 = vmatprep.subr.bf16.mxu1 %v7880_v46 }
0x3bb2   :  { %7802 = vset.pattern.permute.xlu1 %v8183_v39 }
0x3bb4   :  { %7792 = vrot.lane.b32.xlu1 %v7791_v30, %s8168_s17  ;;  %7044 = vmatpush3.bf16.msra.mxu1 %v7881_v40 }
0x3bb5   :  { %7777 = vrot.lane.b32.xlu0 %v7776_v0, %s8169_s22  ;;  %7045 = vmatprep.subr.bf16.mxu1 %v7884_v52 }
0x3bb8   :  { %7797 = vrot.lane.b32.xlu1 %v7796_v21, %s8168_s17  ;;  %7046 = vmatpush3.bf16.msra.mxu1 %v7885_v7 }
0x3bb9   :  { %7782 = vrot.lane.b32.xlu0 %v7781_v32, %s8169_s22  ;;  %7047 = vmatprep.subr.bf16.mxu1 %v7888_v25 }
0x3bbc   :  { %7048 = vmatpush3.bf16.msra.mxu1 %v7889_v48 }
0x3bbd   :  { %7049 = vmatprep.subr.bf16.mxu1 %v7892_v54 }
0x3bc0   :  { %7050 = vmatpush3.bf16.msra.mxu1 %v7893_v60 }
0x3bc1   :  { %7051 = vmatprep.subr.bf16.mxu1 %v7894_v34 }
0x3bc4   :  { %7052 = vmatpush3.bf16.msra.mxu1 %v7895_v44 }
0x3c1b   :  { %v9740_v4 = vpop.permute.xlu0 %7757 }
0x3c1c   :  { %v7760_v2 = vunpack.i.h.bf16 %v9740_v4  ;;  %v7759_v37 = vunpack.i.l.bf16 %v9740_v4 }
0x3c1e   :  { %v7773_v45 = vpop.permute.xlu1 %7772  ;;  %v6309_v55 = vsel %vm212_vm2, %v9638_v23, %v7760_v2  ;;  %v6312_v41 = vsel %vm212_vm2, %v6295_v59, %v7759_v37 }
0x3c1f   :  { %v7763_v22 = vpop.permute.xlu0 %7762  ;;  %v7774_v42 = vunpack.i.l.bf16 %v7773_v45  ;;  %v7775_v9 = vunpack.i.h.bf16 %v7773_v45 }
0x3c20   :  { %v7764_v56 = vunpack.i.l.bf16 %v7763_v22  ;;  %v7765_v16 = vunpack.i.h.bf16 %v7763_v22 }
0x3c22   :  { %v5920_v63 = vsel %vm212_vm2, %v5896_v47, %v7764_v56  ;;  %v7788_v33 = vpop.permute.xlu1 %7787  ;;  %v6345_v19 = vsel %vm212_vm2, %v6328_v53, %v7765_v16 }
0x3c23   :  { %v7789_v24 = vunpack.i.l.bf16 %v7788_v33  ;;  %v7768_v26 = vpop.permute.xlu0 %7767  ;;  %v5921_v5 = vsel %vm1570_vm6, %v5920_v63, %v7774_v42  ;;  %v7790_v28 = vunpack.i.h.bf16 %v7788_v33  ;;  %v6346_v36 = vsel %vm1570_vm6, %v6345_v19, %v7775_v9 }
0x3c24   :  { %v7770_v17 = vunpack.i.h.bf16 %v7768_v26  ;;  %v7769_v12 = vunpack.i.l.bf16 %v7768_v26 }
0x3c25   :  { %v5922_v8 = vsel %vm5912_vm7, %v5921_v5, %v7789_v24  ;;  %v6347_v3 = vsel %vm5912_vm7, %v6346_v36, %v7790_v28  ;;  %v6795_v5 = vld [vmem:[%s9797_s11] ss:$0 sm:$0xff]  ;;  %s8185_s11 = smov 126  }
0x3c26   :  { %v7793_v29 = vpop.permute.xlu1 %7792  ;;  %v6005_v51 = vsel %vm6001_vm8, %v5922_v8, %v5996_v62  ;;  %v6342_v52 = vsel %vm212_vm2, %v9656_v20, %v7770_v17  ;;  %v5917_v0 = vsel %vm212_vm2, %v9539_v38, %v7769_v12  ;;  %v6351_v27 = vrot.slane %v6347_v3, 7 }
0x3c27   :  { %v7795_v46 = vunpack.i.h.bf16 %v7793_v29  ;;  %v7794_v58 = vunpack.i.l.bf16 %v7793_v29  ;;  %v7778_v61 = vpop.permute.xlu0 %7777  ;;  %v6009_v6 = vpack.c.bf16 %v6005_v51, %v6005_v51 }
0x3c28   :  { %v7780_v40 = vunpack.i.h.bf16 %v7778_v61  ;;  %v7779_v30 = vunpack.i.l.bf16 %v7778_v61 }
0x3c29   :  { %6274 = vmatprep.mubr.bf16.mxu0 %v6009_v6 }
0x3c2a   :  { %v5918_v7 = vsel %vm1570_vm6, %v5917_v0, %v7779_v30  ;;  %v6343_v21 = vsel %vm1570_vm6, %v6342_v52, %v7780_v40  ;;  %v7798_v25 = vpop.permute.xlu1 %7797 }
0x3c2b   :  { %v5919_v32 = vsel %vm5912_vm7, %v5918_v7, %v7794_v58  ;;  %v6344_v48 = vsel %vm5912_vm7, %v6343_v21, %v7795_v46  ;;  %v7800_v54 = vunpack.i.h.bf16 %v7798_v25  ;;  %v7799_v60 = vunpack.i.l.bf16 %v7798_v25  ;;  %v7783_v34 = vpop.permute.xlu0 %7782 }
0x3c2c   :  { %v6004_v20 = vsel %vm6001_vm8, %v5919_v32, %v5995_v18  ;;  %v7785_v44 = vunpack.i.h.bf16 %v7783_v34  ;;  %v7784_v38 = vunpack.i.l.bf16 %v7783_v34  ;;  %v6350_v4 = vrot.slane %v6344_v48, 7 }
0x3c2d   :  { %v6008_v15 = vpack.c.bf16 %v6004_v20, %v6004_v20  ;;  %v8184_v46 = vmov 0  }
0x3c2e   :  { %v6310_v31 = vsel %vm1570_vm6, %v6309_v55, %v7785_v44  ;;  %v6313_v14 = vsel %vm1570_vm6, %v6312_v41, %v7784_v38  ;;  %7801 = vset.pattern.permute.xlu0 %v8184_v46 }
0x3c2f   :  { %v6311_v10 = vsel %vm5912_vm7, %v6310_v31, %v7800_v54  ;;  %6275 = vmatmul.mubr.bf16.vlgmr.msra.gmra.mxu0 %v6008_v15  ;;  %v6314_v45 = vsel %vm5912_vm7, %v6313_v14, %v7799_v60 }
0x3c30   :  { %v6354_v50 = vsel %vm6001_vm8, %v6311_v10, %v6350_v4  ;;  %v6355_v47 = vsel %vm6001_vm8, %v6314_v45, %v6351_v27 }
0x3c31   :  { %v6356_v22 = vpack.c.bf16 %v6354_v50, %v6354_v50  ;;  %v6357_v23 = vpack.c.bf16 %v6355_v47, %v6355_v47 }
0x3c33   :  { %6486 = vmatprep.mubr.bf16.mxu1 %v6357_v23 }
0x3c34   :  { %6487 = vmatmul.mubr.bf16.vlgmr.msra.gmra.mxu1 %v6356_v22 }
0x3c67   :  { %v7009_v35 = vpop.f32.mrf.mxu1 }
0x3c69   :  { %v7010_v49 = vpop.f32.mrf.mxu1 }
0x3c6a   :  { %v7011_v42 = vadd.f32 %v7010_v49, %v7009_v35 }
0x3c6b   :  { %v7012_v56 = vpop.f32.mrf.mxu1 }
0x3c6d   :  { %v7013_v11 = vpop.f32.mrf.mxu1 }
0x3cef   :  { %v7031_v1 = vpop.f32.mrf.mxu0 }
0x3cf1   :  { %v7032_v16 = vpop.f32.mrf.mxu0 }
0x3cf2   :  { %v7033_v63 = vadd.f32 %v7032_v16, %v7031_v1 }
0x3cf3   :  { %v7034_v33 = vpop.f32.mrf.mxu0 }
0x3cf4   :  { %v7053_v43 = vpop.f32.mrf.mxu1  ;;  %v6277_v57 = vadd.f32 %v7033_v63, %v7011_v42 }
0x3cf5   :  { %v7035_v24 = vpop.f32.mrf.mxu0 }
0x3cf6   :  { %v7054_v26 = vpop.f32.mrf.mxu1 }
0x3cf7   :  { %v7055_v62 = vadd.f32 %v7054_v26, %v7053_v43 }
0x3cf8   :  { %v7056_v53 = vpop.f32.mrf.mxu1 }
0x3cf9   :  { %v6495_v9 = vadd.f32 %v7055_v62, %v6277_v57 }
0x3cfa   :  { %v7057_v8 = vpop.f32.mrf.mxu1 }
0x3cfb   :  { %v6502_v17 = vadd.f32 %v6795_v5, %v6495_v9 }
0x3cfd   :  { %v6504_v12 = vsel %vm6503_vm9, %v6502_v17, -inf }
0x3cfe   :  { %6505 = vmax.xlane.f32.xlu0 %v6504_v12 }
0x3d87   :  { %v6506_v13 = vpop.xlane.xlu0 %6505 }
0x3d88   :  { %v6507_v19 = vsub.f32 %v6502_v17, %v6506_v13 }
0x3d8a   :  { %v6508_v28 = vmul.f32 1.442695, %v6507_v19 }
0x3d8c   :  { %8136 = vpow2.f32 %v6508_v28 }
0x3d99   :  { %v8137_v29 = vpop.eup %8136 }
0x3d9a   :  { %v6510_v51 = vsel %vm6503_vm9, %v8137_v29, 0.0 }
0x3d9b   :  { %6511 = vadd.xlane.f32.xlu1 %v6510_v51 }
0x3e24   :  { %v6512_v58 = vpop.xlane.xlu1 %6511 }
0x3e25   :  { %8138 = vrcp.f32 %v6512_v58 }
0x3e32   :  { %v8139_v61 = vpop.eup %8138 }
0x3e33   :  { %v6514_v6 = vmul.f32 %v8139_v61, %v8137_v29 }
0x3e35   :  { %6522 = vperm.xlu1 %7802, %v6514_v6   ;;  %6517 = vperm.xlu0 %7801, %v6514_v6  }
0x3e39   :  { %7803 = vset.pattern.permute.xlu0 %v8183_v39 }
0x3eb0   :  { %v6523_v59 = vpop.permute.xlu1 %6522  ;;  %v6518_v2 = vpop.permute.xlu0 %6517 }
0x3eb1   :  { %v6525_v40 = vmul.f32 %v7055_v62, %v6523_v59  ;;  %v6520_v30 = vmul.f32 %v6518_v2, %v6277_v57 }
0x3eb3   :  { %v6526_v37 = vadd.f32 %v6525_v40, %v6520_v30 }
0x3eb5   :  { %v6527_v36 = vadd.f32 %v6795_v5, %v6526_v37 }
0x3eb7   :  { %6529 = vrot.lane.b32.xlu1 %v6527_v36, %s8185_s11 }
0x3f29   :  { %v6530_v52 = vpop.permute.xlu1 %6529 }
0x3f2a   :  { %6533 = vst.msk [vmem:[#allocation2] sm:$0x3] %vm6532_vm10, %v6530_v52 }
0x3f2b   :  { %8155 = shalt.err (!%p8152_p4)
}
0x3f2c   :  { %6543 = dma.vmem_to_hbm [thread:$0]  %s6541_s8, 32, %s9798_s12, [#allocation3]  }
0x3f2d   :  { %8164 = dma.done.wait [#allocation3], 32  }
0x3f2e   :  { %8165 = vsyncadd [#allocation3], 4294967264 }
0x3f2f   :  { %6547 = vsyncpa [#allocation3], 1 }

</bundles_post_ra>
